<compile_context>
chip_gen: v6e
topology: v6e:2x2x1
jax: 0.10.0
libtpu: 0.0.40
codegen_flags: <defaults>
</compile_context>

<pallas_src>
import jax
import jax.numpy as jnp
from jax import lax
from jax.experimental import pallas as pl
from jax.experimental.pallas import tpu as pltpu

EPS = 1e-5
PAD = 2                       # shared halo for the two SK branches (dil=1, dil=2)


def _vmem_limit_bytes():
    cap = 64 * 1024 * 1024
    try:
        cap = int(pltpu.get_tpu_info().vmem_capacity_bytes)
    except Exception:
        pass
    # Leave headroom for double-buffering / compiler scratch:
    # v5e/v6e (128 MiB) -> 96 MiB, v7x (64 MiB) -> 48 MiB.
    return min(96 * 1024 * 1024, (cap * 3) // 4)


_VMEM_LIMIT = _vmem_limit_bytes()
TILE_M = 2048 if _VMEM_LIMIT >= 80 * 1024 * 1024 else 1024


def _cparams(dims):
    return pltpu.CompilerParams(dimension_semantics=dims,
                                vmem_limit_bytes=_VMEM_LIMIT)


def _pick_tile_rows(H, W, C):
    # Budget the per-row-tile working set (f32 acc/b0/b1 + bf16 outs + slab)
    # against a quarter of the VMEM limit; also keep >= ~4 tiles per image so
    # the pipeline has several steps per core.
    budget = _VMEM_LIMIT // 4
    per_row = max(1, W * C * (3 * 4 + 2 * 2 + 2) + (W + 2 * PAD) * C * 2)
    th = max(2, min(H, budget // per_row))
    th = min(th, max(2, H // 4))
    while th > 1 and H % th:
        th -= 1
    if th < 2:
        th = H
    return th


# ----------------------------- Pallas kernels -----------------------------

def _mm_bias_relu_kernel(x_ref, w_ref, bias_ref, o_ref):
    # relu(x @ w_folded + bias); BN scale pre-folded into w (f32 fold -> bf16).
    y = jnp.dot(x_ref[...].astype(jnp.bfloat16), w_ref[...],
                preferred_element_type=jnp.float32)
    o_ref[...] = jnp.maximum(y + bias_ref[...], 0.0).astype(o_ref.dtype)


def _make_sk_branch_kernel(H, W, C, TH, n_ht):
    """SK branches (+partial GAP, +attention epilogue) per (batch, row-tile)."""
    inv_hw = 1.0 / float(H * W)

    def kernel(x_ref, w_br_ref, br_bias_ref, wfc_ref, fc_bias_ref,
               w_sel_ref, b_sel_ref, s2_ref,
               b0_ref, b1_ref, a01_ref,
               gap_ref, pad_ref):
        t = pl.program_id(1)

        # -- stage the row tile into a zero-padded VMEM slab (no HBM pad copy)
        pad_ref[...] = jnp.zeros_like(pad_ref)
        if n_ht == 1:
            pad_ref[pl.ds(PAD, H), pl.ds(PAD, W), :] = x_ref[0]
        else:
            @pl.when(t == 0)
            def _():
                pad_ref[pl.ds(PAD, TH + PAD), pl.ds(PAD, W), :] = (
                    x_ref[0, pl.ds(0, TH + PAD), :, :])

            @pl.when(t == n_ht - 1)
            def _():
                pad_ref[pl.ds(0, TH + PAD), pl.ds(PAD, W), :] = (
                    x_ref[0, pl.ds(H - TH - PAD, TH + PAD), :, :])

            @pl.when(jnp.logical_and(t > 0, t < n_ht - 1))
            def _():
                pad_ref[pl.ds(0, TH + 2 * PAD), pl.ds(PAD, W), :] = (
                    x_ref[0, pl.ds(t * TH - PAD, TH + 2 * PAD), :, :])

        # -- two 3x3 branches as 9 per-tap matmuls each (no im2col concat);
        #    BN scale is already folded into w_br, only the bias add remains.
        HWt = TH * W

        def branch(m, dil):
            off = PAD - dil
            acc = jnp.zeros((HWt, C), jnp.float32)
            for kh in range(3):
                for kw in range(3):
                    tap = pad_ref[pl.ds(off + kh * dil, TH),
                                  pl.ds(off + kw * dil, W), :]
                    acc = acc + jnp.dot(tap.reshape(HWt, C),
                                        w_br_ref[m * 9 + kh * 3 + kw],
                                        preferred_element_type=jnp.float32)
            return jnp.maximum(acc + br_bias_ref[m], 0.0)

        br0 = branch(0, 1)                                # (TH*W, C) f32
        br1 = branch(1, 2)
        b0_ref[0] = br0.reshape(TH, W, C).astype(b0_ref.dtype)
        b1_ref[0] = br1.reshape(TH, W, C).astype(b1_ref.dtype)

        # -- two-pass GAP: accumulate per-tile spatial sums across the t axis
        part = jnp.sum(br0 + br1, axis=0, keepdims=True)  # (1, C) f32

        @pl.when(t == 0)
        def _():
            gap_ref[...] = jnp.zeros_like(gap_ref)

        gap_ref[...] += part

        # -- attention epilogue, once the whole image has been reduced
        @pl.when(t == n_ht - 1)
        def _():
            s = (gap_ref[...] * inv_hw).astype(jnp.bfloat16)       # (1, C)
            z = jnp.dot(s, wfc_ref[...], preferred_element_type=jnp.float32)
            z = jnp.maximum(z + fc_bias_ref[...], 0.0).astype(jnp.bfloat16)
            l0 = jnp.dot(z, w_sel_ref[0],
                         preferred_element_type=jnp.float32) + b_sel_ref[0]
            l1 = jnp.dot(z, w_sel_ref[1],
                         preferred_element_type=jnp.float32) + b_sel_ref[1]
            mx = jnp.maximum(l0, l1)
            e0 = jnp.exp(l0 - mx)
            e1 = jnp.exp(l1 - mx)
            inv = pl.reciprocal(e0 + e1, approx=True)              # EUP slot
            # bn2 scale folded into the attention weights (a' = softmax * s2).
            a01_ref[0] = jnp.concatenate([e0 * inv, e1 * inv], axis=0) * s2_ref[...]

    return kernel


def _sk_tail_kernel(b0_ref, b1_ref, a01_ref, b2_ref, w3_ref, bias3_ref,
                    id_ref, o_ref):
    # relu( bn3(conv3( relu(a0'*b0 + a1'*b1 + b2) )) + identity ), fused.
    _, TH, W, C = b0_ref.shape
    Co = o_ref.shape[-1]
    HWt = TH * W
    a = a01_ref[0]                                       # (2, C), already * s2
    b0 = b0_ref[0].reshape(HWt, C).astype(jnp.float32)
    b1 = b1_ref[0].reshape(HWt, C).astype(jnp.float32)
    h2 = jnp.maximum(a[0:1, :] * b0 + a[1:2, :] * b1 + b2_ref[...], 0.0)
    y = jnp.dot(h2.astype(jnp.bfloat16), w3_ref[...],
                preferred_element_type=jnp.float32)
    y = y + bias3_ref[...] + id_ref[0].reshape(HWt, Co)
    o_ref[0] = jnp.maximum(y, 0.0).reshape(TH, W, Co).astype(o_ref.dtype)


# ----------------------------- Pallas wrappers -----------------------------

def pointwise_conv_bias_relu(x2d, w_bf16, bias, out_dtype=jnp.bfloat16):
    M, Cin = x2d.shape
    Co = w_bf16.shape[1]
    tm = min(TILE_M, M)
    return pl.pallas_call(
        _mm_bias_relu_kernel,
        out_shape=jax.ShapeDtypeStruct((M, Co), out_dtype),
        grid=(pl.cdiv(M, tm),),
        in_specs=[pl.BlockSpec((tm, Cin), lambda i: (i, 0)),
                  pl.BlockSpec((Cin, Co), lambda i: (0, 0)),
                  pl.BlockSpec((1, Co), lambda i: (0, 0))],
        out_specs=pl.BlockSpec((tm, Co), lambda i: (i, 0)),
        compiler_params=_cparams(("parallel",)),
    )(x2d, w_bf16, bias)


def sk_branches_and_select(h1, w_br, br_bias, wfc, fc_bias, w_sel, b_sel, s2, th):
    N, H, W, C = h1.shape
    d = wfc.shape[1]
    n_ht = H // th
    kernel = _make_sk_branch_kernel(H, W, C, th, n_ht)
    return pl.pallas_call(
        kernel,
        out_shape=(jax.ShapeDtypeStruct((N, H, W, C), jnp.bfloat16),
                   jax.ShapeDtypeStruct((N, H, W, C), jnp.bfloat16),
                   jax.ShapeDtypeStruct((N, 2, C), jnp.float32)),
        grid=(N, n_ht),
        in_specs=[
            pl.BlockSpec((1, H, W, C), lambda n, t: (n, 0, 0, 0)),
            pl.BlockSpec((18, C, C), lambda n, t: (0, 0, 0)),
            pl.BlockSpec((2, 1, C), lambda n, t: (0, 0, 0)),
            pl.BlockSpec((C, d), lambda n, t: (0, 0)),
            pl.BlockSpec((1, d), lambda n, t: (0, 0)),
            pl.BlockSpec((2, d, C), lambda n, t: (0, 0, 0)),
            pl.BlockSpec((2, 1, C), lambda n, t: (0, 0, 0)),
            pl.BlockSpec((1, C), lambda n, t: (0, 0)),
        ],
        out_specs=(
            pl.BlockSpec((1, th, W, C), lambda n, t: (n, t, 0, 0)),
            pl.BlockSpec((1, th, W, C), lambda n, t: (n, t, 0, 0)),
            pl.BlockSpec((1, 2, C), lambda n, t: (n, 0, 0)),
        ),
        scratch_shapes=[pltpu.VMEM((1, C), jnp.float32),
                        pltpu.VMEM((th + 2 * PAD, W + 2 * PAD, C), jnp.bfloat16)],
        compiler_params=_cparams(("parallel", "arbitrary")),
    )(h1, w_br, br_bias, wfc, fc_bias, w_sel, b_sel, s2)


def sk_tail(b0, b1, a01, b2_bias, w3, bias3, identity, th):
    N, H, W, C = b0.shape
    Co = w3.shape[1]
    n_ht = H // th
    return pl.pallas_call(
        _sk_tail_kernel,
        out_shape=jax.ShapeDtypeStruct((N, H, W, Co), jnp.bfloat16),
        grid=(N, n_ht),
        in_specs=[
            pl.BlockSpec((1, th, W, C), lambda n, t: (n, t, 0, 0)),
            pl.BlockSpec((1, th, W, C), lambda n, t: (n, t, 0, 0)),
            pl.BlockSpec((1, 2, C), lambda n, t: (n, 0, 0)),
            pl.BlockSpec((1, C), lambda n, t: (0, 0)),
            pl.BlockSpec((C, Co), lambda n, t: (0, 0)),
            pl.BlockSpec((1, Co), lambda n, t: (0, 0)),
            pl.BlockSpec((1, th, W, Co), lambda n, t: (n, t, 0, 0)),
        ],
        out_specs=pl.BlockSpec((1, th, W, Co), lambda n, t: (n, t, 0, 0)),
        compiler_params=_cparams(("parallel", "parallel")),
    )(b0, b1, a01, b2_bias, w3, bias3, identity)


# ----------------------------- Parameters -----------------------------

def fold_bn(bn_params):
    g, b, m, v = bn_params
    scale = g / jnp.sqrt(v + EPS)
    bias = b - m * scale
    return scale[None, :], bias[None, :]


def init_params(key, inplanes, planes, groups=1, base_width=64):
    width = int(planes * (base_width / 64.0)) * groups
    out_c = planes * 4                      # expansion = 4
    d = max(width // 16, 32)                # SKConv: r=16, L=32
    ks = jax.random.split(key, 40)
    ctr = [0]

    def nk():
        k = ks[ctr[0]]
        ctr[0] += 1
        return k

    def w(shape, scale=0.1):
        return (jax.random.normal(nk(), shape) * scale).astype(jnp.float32)

    def bn_params(c):
        gamma = (1.0 + 0.1 * jax.random.normal(nk(), (c,))).astype(jnp.float32)
        beta = (0.1 * jax.random.normal(nk(), (c,))).astype(jnp.float32)
        mean = (0.1 * jax.random.normal(nk(), (c,))).astype(jnp.float32)
        var = (1.0 + 0.5 * jax.random.uniform(nk(), (c,))).astype(jnp.float32)
        return (gamma, beta, mean, var)

    p = {}
    p["w1"] = w((inplanes, width))          # conv1 (1x1)
    p["bn1"] = bn_params(width)
    p["wb0"] = w((3, 3, width, width))      # SK branch 0 (3x3, dil=1), HWIO
    p["bnb0"] = bn_params(width)
    p["wb1"] = w((3, 3, width, width))      # SK branch 1 (3x3, dil=2), HWIO
    p["bnb1"] = bn_params(width)
    p["wfc"] = w((width, d))                # SK fuse fc (1x1, no bias)
    p["bnfc"] = bn_params(d)
    p["wa"] = w((d, width))                 # SK select fc for branch 0
    p["ba"] = (0.1 * jax.random.normal(nk(), (width,))).astype(jnp.float32)
    p["wb_sel"] = w((d, width))             # SK select fc for branch 1
    p["bb"] = (0.1 * jax.random.normal(nk(), (width,))).astype(jnp.float32)
    p["bn2"] = bn_params(width)
    p["w3"] = w((width, out_c))             # conv3 (1x1)
    p["bn3"] = bn_params(out_c)
    return p, width, out_c, d


# ----------------------------- Forward (Pallas) -----------------------------

def sk_block_forward(x_nchw, p):
    # TODO(synk): NCHW<->NHWC transposes kept only for PyTorch-spec
    # compatibility; callers that already hold NHWC should skip them.
    x = jnp.transpose(x_nchw, (0, 2, 3, 1))          # NCHW -> NHWC
    N, H, W, Cin = x.shape
    width = p["w1"].shape[1]

    # --- fold every BN scale into its conv weight (f32 fold, then bf16 cast) ---
    s1, bias1 = fold_bn(p["bn1"])
    w1f = (p["w1"] * s1).astype(jnp.bfloat16)

    sb0, biasb0 = fold_bn(p["bnb0"])
    sb1, biasb1 = fold_bn(p["bnb1"])
    w_br = jnp.concatenate(
        [(p["wb0"] * sb0[0]).reshape(9, width, width),
         (p["wb1"] * sb1[0]).reshape(9, width, width)], axis=0
    ).astype(jnp.bfloat16)                            # (18, width, width)
    br_bias = jnp.stack([biasb0, biasb1])             # (2, 1, width)

    sfc, biasfc = fold_bn(p["bnfc"])
    wfcf = (p["wfc"] * sfc).astype(jnp.bfloat16)
    w_sel = jnp.stack([p["wa"], p["wb_sel"]]).astype(jnp.bfloat16)   # (2, d, width)
    b_sel = jnp.stack([p["ba"][None, :], p["bb"][None, :]])          # (2, 1, width)
    s2, bias2 = fold_bn(p["bn2"])

    s3, bias3 = fold_bn(p["bn3"])
    w3f = (p["w3"] * s3).astype(jnp.bfloat16)

    # --- conv1 (1x1) + bn1 + relu : tiled matmul over N*H*W, bf16 out ---
    h1 = pointwise_conv_bias_relu(x.reshape(N * H * W, Cin), w1f, bias1)
    h1 = h1.reshape(N, H, W, width)

    # --- SK branches + GAP + attention, H-tiled with a 2-row halo ---
    th = _pick_tile_rows(H, W, width)
    b0, b1, a01 = sk_branches_and_select(h1, w_br, br_bias, wfcf, biasfc,
                                         w_sel, b_sel, s2, th)

    # --- attention select + bn2 + relu fused with conv3 + bn3 + residual + relu ---
    y = sk_tail(b0, b1, a01, bias2, w3f, bias3, x, th)   # (N, H, W, out_c) bf16
    return jnp.transpose(y, (0, 3, 1, 2))                # NHWC -> NCHW


# ----------------------------- Pure-JAX reference -----------------------------

def ref_forward(x_nchw, p):
    x = jnp.transpose(x_nchw, (0, 2, 3, 1))

    def bn(y, bnp):
        g, b, m, v = bnp
        return (y - m) / jnp.sqrt(v + EPS) * g + b

    h = jax.nn.relu(bn(jnp.einsum("nhwc,cd->nhwd", x, p["w1"]), p["bn1"]))

    def branch(inp, wgt, bnp, dil):
        y = lax.conv_general_dilated(inp, wgt, window_strides=(1, 1),
                                     padding=[(dil, dil), (dil, dil)],
                                     rhs_dilation=(dil, dil),
                                     dimension_numbers=("NHWC", "HWIO", "NHWC"))
        return jax.nn.relu(bn(y, bnp))

    b0 = branch(h, p["wb0"], p["bnb0"], 1)
    b1 = branch(h, p["wb1"], p["bnb1"], 2)
    u = b0 + b1
    s = jnp.mean(u, axis=(1, 2))
    z = jax.nn.relu(bn(s @ p["wfc"], p["bnfc"]))
    l0 = z @ p["wa"] + p["ba"]
    l1 = z @ p["wb_sel"] + p["bb"]
    a = jax.nn.softmax(jnp.stack([l0, l1], axis=0), axis=0)
    v = a[0][:, None, None, :] * b0 + a[1][:, None, None, :] * b1
    h2 = jax.nn.relu(bn(v, p["bn2"]))
    y = bn(jnp.einsum("nhwc,cd->nhwd", h2, p["w3"]), p["bn3"])
    y = jax.nn.relu(y + x)
    return jnp.transpose(y, (0, 3, 1, 2))


# ----------------------------- Main -----------------------------

if __name__ == "__main__":
    key = jax.random.PRNGKey(0)
    kx, kp = jax.random.split(key)

    # SKBlock(inplanes=16, planes=4): width=4, output channels = planes*4 = 16,
    # downsample=None requires inplanes == planes*expansion.
    N, inplanes, H, W = 2, 16, 16, 16
    planes = 4

    x = jax.random.normal(kx, (N, inplanes, H, W), dtype=jnp.float32)
    params, width, out_c, d = init_params(kp, inplanes, planes)

    out = jax.block_until_ready(jax.jit(sk_block_forward)(x, params))
    assert out.shape == (N, out_c, H, W), out.shape

    ref = jax.block_until_ready(ref_forward(x, params))
    max_err = float(jnp.max(jnp.abs(out.astype(jnp.float32) - ref)))
    # bf16 MXU operands, bf16 storage of h1/b0/b1 and of the final output, and
    # an approximate softmax reciprocal bound the accuracy vs the f32 reference.
    assert max_err < 8e-2, f"mismatch vs pure-JAX reference: {max_err}"

    print("KERNEL_OK")
</pallas_src>

<mosaic_0001>
module attributes {stable_mosaic.version = 11 : i64} {
  func.func @_mm_bias_relu_kernel(%arg0: i32, %arg1: memref<512x16xf32, #tpu.memory_space<vmem>>, %arg2: memref<16x4xbf16, #tpu.memory_space<vmem>>, %arg3: memref<1x4xf32, #tpu.memory_space<vmem>>, %arg4: memref<512x4xbf16, #tpu.memory_space<vmem>>) attributes {dimension_semantics = [#tpu.dimension_semantics<parallel>], iteration_bounds = array<i64: 1>, scalar_prefetch = 0 : i64, scratch_operands = 0 : i64, tpu.core_type = #tpu.core_type<tc>, window_params = [{transform_indices = @transform_0, window_bounds = array<i64: 512, 16>}, {pipeline_mode = #tpu.pipeline_mode<synchronous>, transform_indices = @transform_1, window_bounds = array<i64: 16, 4>}, {pipeline_mode = #tpu.pipeline_mode<synchronous>, transform_indices = @transform_2, window_bounds = array<i64: 1, 4>}, {transform_indices = @transform_3, window_bounds = array<i64: 512, 4>}]} {
    %c0 = arith.constant 0 : index
    %c0_0 = arith.constant 0 : index
    %0 = vector.load %arg1[%c0, %c0_0] : memref<512x16xf32, #tpu.memory_space<vmem>>, vector<512x16xf32>
    %1 = arith.truncf %0 : vector<512x16xf32> to vector<512x16xbf16>
    %c0_1 = arith.constant 0 : index
    %c0_2 = arith.constant 0 : index
    %2 = vector.load %arg2[%c0_1, %c0_2] : memref<16x4xbf16, #tpu.memory_space<vmem>>, vector<16x4xbf16>
    %cst = arith.constant dense<0.000000e+00> : vector<512x4xf32>
    %3 = tpu.matmul %1, %2, %cst {dimension_numbers = #tpu.dot_dimension_numbers<[1], [0], [0], [1], [0, 0, 1, 1], [], []>} : vector<512x16xbf16>, vector<16x4xbf16>, vector<512x4xf32> -> vector<512x4xf32>
    %c0_3 = arith.constant 0 : index
    %c0_4 = arith.constant 0 : index
    %4 = vector.load %arg3[%c0_3, %c0_4] : memref<1x4xf32, #tpu.memory_space<vmem>>, vector<1x4xf32>
    %5 = vector.broadcast %4 : vector<1x4xf32> to vector<512x4xf32>
    %6 = arith.addf %3, %5 : vector<512x4xf32>
    %cst_5 = arith.constant 0.000000e+00 : f32
    %7 = vector.broadcast %cst_5 : f32 to vector<512x4xf32>
    %8 = arith.maximumf %6, %7 : vector<512x4xf32>
    %9 = arith.truncf %8 : vector<512x4xf32> to vector<512x4xbf16>
    %c0_6 = arith.constant 0 : index
    %c0_7 = arith.constant 0 : index
    %10 = vector.load %arg4[%c0_6, %c0_7] : memref<512x4xbf16, #tpu.memory_space<vmem>>, vector<512x4xbf16>
    tpu.vector_store %arg4[%c0_6, %c0_7], %9 {strides = array<i32>} : memref<512x4xbf16, #tpu.memory_space<vmem>>, vector<512x4xbf16>,
    return
  }
  func.func @transform_0(%arg0: i32) -> (i32, i32) {
    %c0_i32 = arith.constant 0 : i32
    %c0_i32_0 = arith.constant 0 : i32
    return %arg0, %c0_i32 : i32, i32
  }
  func.func @transform_1(%arg0: i32) -> (i32, i32) {
    %c0_i32 = arith.constant 0 : i32
    %c0_i32_0 = arith.constant 0 : i32
    %c0_i32_1 = arith.constant 0 : i32
    return %c0_i32, %c0_i32_0 : i32, i32
  }
  func.func @transform_2(%arg0: i32) -> (i32, i32) {
    %c0_i32 = arith.constant 0 : i32
    %c0_i32_0 = arith.constant 0 : i32
    %c0_i32_1 = arith.constant 0 : i32
    return %c0_i32, %c0_i32_0 : i32, i32
  }
  func.func @transform_3(%arg0: i32) -> (i32, i32) {
    %c0_i32 = arith.constant 0 : i32
    %c0_i32_0 = arith.constant 0 : i32
    return %arg0, %c0_i32 : i32, i32
  }
}

module attributes {stable_mosaic.version = 11 : i64} {
  func.func @_sk_tail_kernel(%arg0: i32, %arg1: i32, %arg2: memref<1x4x16x4xbf16, #tpu.memory_space<vmem>>, %arg3: memref<1x4x16x4xbf16, #tpu.memory_space<vmem>>, %arg4: memref<1x2x4xf32, #tpu.memory_space<vmem>>, %arg5: memref<1x4xf32, #tpu.memory_space<vmem>>, %arg6: memref<4x16xbf16, #tpu.memory_space<vmem>>, %arg7: memref<1x16xf32, #tpu.memory_space<vmem>>, %arg8: memref<1x4x16x16xf32, #tpu.memory_space<vmem>>, %arg9: memref<1x4x16x16xbf16, #tpu.memory_space<vmem>>) attributes {dimension_semantics = [#tpu.dimension_semantics<parallel>, #tpu.dimension_semantics<parallel>], iteration_bounds = array<i64: 2, 4>, scalar_prefetch = 0 : i64, scratch_operands = 0 : i64, tpu.core_type = #tpu.core_type<tc>, window_params = [{transform_indices = @transform_0, window_bounds = array<i64: 1, 4, 16, 4>}, {transform_indices = @transform_1, window_bounds = array<i64: 1, 4, 16, 4>}, {transform_indices = @transform_2, window_bounds = array<i64: 1, 2, 4>}, {pipeline_mode = #tpu.pipeline_mode<synchronous>, transform_indices = @transform_3, window_bounds = array<i64: 1, 4>}, {pipeline_mode = #tpu.pipeline_mode<synchronous>, transform_indices = @transform_4, window_bounds = array<i64: 4, 16>}, {pipeline_mode = #tpu.pipeline_mode<synchronous>, transform_indices = @transform_5, window_bounds = array<i64: 1, 16>}, {transform_indices = @transform_6, window_bounds = array<i64: 1, 4, 16, 16>}, {transform_indices = @transform_7, window_bounds = array<i64: 1, 4, 16, 16>}]} {
    %c0 = arith.constant 0 : index
    %c0_0 = arith.constant 0 : index
    %c0_1 = arith.constant 0 : index
    %0 = vector.load %arg4[%c0, %c0_0, %c0_1] : memref<1x2x4xf32, #tpu.memory_space<vmem>>, vector<1x2x4xf32>
    %1 = vector.shape_cast %0 : vector<1x2x4xf32> to vector<2x4xf32>
    %c0_2 = arith.constant 0 : index
    %c0_3 = arith.constant 0 : index
    %c0_4 = arith.constant 0 : index
    %c0_5 = arith.constant 0 : index
    %2 = vector.load %arg2[%c0_2, %c0_3, %c0_4, %c0_5] : memref<1x4x16x4xbf16, #tpu.memory_space<vmem>>, vector<1x4x16x4xbf16>
    %3 = vector.shape_cast %2 : vector<1x4x16x4xbf16> to vector<4x16x4xbf16>
    %4 = vector.shape_cast %3 : vector<4x16x4xbf16> to vector<64x4xbf16>
    %5 = arith.extf %4 : vector<64x4xbf16> to vector<64x4xf32>
    %c0_6 = arith.constant 0 : index
    %c0_7 = arith.constant 0 : index
    %c0_8 = arith.constant 0 : index
    %c0_9 = arith.constant 0 : index
    %6 = vector.load %arg3[%c0_6, %c0_7, %c0_8, %c0_9] : memref<1x4x16x4xbf16, #tpu.memory_space<vmem>>, vector<1x4x16x4xbf16>
    %7 = vector.shape_cast %6 : vector<1x4x16x4xbf16> to vector<4x16x4xbf16>
    %8 = vector.shape_cast %7 : vector<4x16x4xbf16> to vector<64x4xbf16>
    %9 = arith.extf %8 : vector<64x4xbf16> to vector<64x4xf32>
    %10 = vector.extract_strided_slice %1 {offsets = [0, 0], sizes = [1, 4], strides = [1, 1]} : vector<2x4xf32> to vector<1x4xf32>
    %11 = vector.broadcast %10 : vector<1x4xf32> to vector<64x4xf32>
    %12 = arith.mulf %11, %5 : vector<64x4xf32>
    %13 = vector.extract_strided_slice %1 {offsets = [1, 0], sizes = [1, 4], strides = [1, 1]} : vector<2x4xf32> to vector<1x4xf32>
    %14 = vector.broadcast %13 : vector<1x4xf32> to vector<64x4xf32>
    %15 = arith.mulf %14, %9 : vector<64x4xf32>
    %16 = arith.addf %12, %15 : vector<64x4xf32>
    %c0_10 = arith.constant 0 : index
    %c0_11 = arith.constant 0 : index
    %17 = vector.load %arg5[%c0_10, %c0_11] : memref<1x4xf32, #tpu.memory_space<vmem>>, vector<1x4xf32>
    %18 = vector.broadcast %17 : vector<1x4xf32> to vector<64x4xf32>
    %19 = arith.addf %16, %18 : vector<64x4xf32>
    %cst = arith.constant 0.000000e+00 : f32
    %20 = vector.broadcast %cst : f32 to vector<64x4xf32>
    %21 = arith.maximumf %19, %20 : vector<64x4xf32>
    %22 = arith.truncf %21 : vector<64x4xf32> to vector<64x4xbf16>
    %c0_12 = arith.constant 0 : index
    %c0_13 = arith.constant 0 : index
    %23 = vector.load %arg6[%c0_12, %c0_13] : memref<4x16xbf16, #tpu.memory_space<vmem>>, vector<4x16xbf16>
    %cst_14 = arith.constant dense<0.000000e+00> : vector<64x16xf32>
    %24 = tpu.matmul %22, %23, %cst_14 {dimension_numbers = #tpu.dot_dimension_numbers<[1], [0], [0], [1], [0, 0, 1, 1], [], []>} : vector<64x4xbf16>, vector<4x16xbf16>, vector<64x16xf32> -> vector<64x16xf32>
    %c0_15 = arith.constant 0 : index
    %c0_16 = arith.constant 0 : index
    %25 = vector.load %arg7[%c0_15, %c0_16] : memref<1x16xf32, #tpu.memory_space<vmem>>, vector<1x16xf32>
    %26 = vector.broadcast %25 : vector<1x16xf32> to vector<64x16xf32>
    %27 = arith.addf %24, %26 : vector<64x16xf32>
    %c0_17 = arith.constant 0 : index
    %c0_18 = arith.constant 0 : index
    %c0_19 = arith.constant 0 : index
    %c0_20 = arith.constant 0 : index
    %28 = vector.load %arg8[%c0_17, %c0_18, %c0_19, %c0_20] : memref<1x4x16x16xf32, #tpu.memory_space<vmem>>, vector<1x4x16x16xf32>
    %29 = vector.shape_cast %28 : vector<1x4x16x16xf32> to vector<4x16x16xf32>
    %30 = vector.shape_cast %29 : vector<4x16x16xf32> to vector<64x16xf32>
    %31 = arith.addf %27, %30 : vector<64x16xf32>
    %cst_21 = arith.constant 0.000000e+00 : f32
    %32 = vector.broadcast %cst_21 : f32 to vector<64x16xf32>
    %33 = arith.maximumf %31, %32 : vector<64x16xf32>
    %34 = vector.shape_cast %33 : vector<64x16xf32> to vector<4x16x16xf32>
    %35 = arith.truncf %34 : vector<4x16x16xf32> to vector<4x16x16xbf16>
    %c0_22 = arith.constant 0 : index
    %c0_23 = arith.constant 0 : index
    %c0_24 = arith.constant 0 : index
    %c0_25 = arith.constant 0 : index
    %36 = vector.load %arg9[%c0_22, %c0_23, %c0_24, %c0_25] : memref<1x4x16x16xbf16, #tpu.memory_space<vmem>>, vector<1x4x16x16xbf16>
    %37 = vector.shape_cast %36 : vector<1x4x16x16xbf16> to vector<4x16x16xbf16>
    %38 = vector.shape_cast %35 : vector<4x16x16xbf16> to vector<1x4x16x16xbf16>
    tpu.vector_store %arg9[%c0_22, %c0_23, %c0_24, %c0_25], %38 {strides = array<i32>} : memref<1x4x16x16xbf16, #tpu.memory_space<vmem>>, vector<1x4x16x16xbf16>,
    return
  }
  func.func @transform_0(%arg0: i32, %arg1: i32) -> (i32, i32, i32, i32) {
    %c0_i32 = arith.constant 0 : i32
    %c0_i32_0 = arith.constant 0 : i32
    %c0_i32_1 = arith.constant 0 : i32
    return %arg0, %arg1, %c0_i32, %c0_i32_0 : i32, i32, i32, i32
  }
  func.func @transform_1(%arg0: i32, %arg1: i32) -> (i32, i32, i32, i32) {
    %c0_i32 = arith.constant 0 : i32
    %c0_i32_0 = arith.constant 0 : i32
    %c0_i32_1 = arith.constant 0 : i32
    return %arg0, %arg1, %c0_i32, %c0_i32_0 : i32, i32, i32, i32
  }
  func.func @transform_2(%arg0: i32, %arg1: i32) -> (i32, i32, i32) {
    %c0_i32 = arith.constant 0 : i32
    %c0_i32_0 = arith.constant 0 : i32
    %c0_i32_1 = arith.constant 0 : i32
    return %arg0, %c0_i32, %c0_i32_0 : i32, i32, i32
  }
  func.func @transform_3(%arg0: i32, %arg1: i32) -> (i32, i32) {
    %c0_i32 = arith.constant 0 : i32
    %c0_i32_0 = arith.constant 0 : i32
    %c0_i32_1 = arith.constant 0 : i32
    return %c0_i32, %c0_i32_0 : i32, i32
  }
  func.func @transform_4(%arg0: i32, %arg1: i32) -> (i32, i32) {
    %c0_i32 = arith.constant 0 : i32
    %c0_i32_0 = arith.constant 0 : i32
    %c0_i32_1 = arith.constant 0 : i32
    return %c0_i32, %c0_i32_0 : i32, i32
  }
  func.func @transform_5(%arg0: i32, %arg1: i32) -> (i32, i32) {
    %c0_i32 = arith.constant 0 : i32
    %c0_i32_0 = arith.constant 0 : i32
    %c0_i32_1 = arith.constant 0 : i32
    return %c0_i32, %c0_i32_0 : i32, i32
  }
  func.func @transform_6(%arg0: i32, %arg1: i32) -> (i32, i32, i32, i32) {
    %c0_i32 = arith.constant 0 : i32
    %c0_i32_0 = arith.constant 0 : i32
    %c0_i32_1 = arith.constant 0 : i32
    return %arg0, %arg1, %c0_i32, %c0_i32_0 : i32, i32, i32, i32
  }
  func.func @transform_7(%arg0: i32, %arg1: i32) -> (i32, i32, i32, i32) {
    %c0_i32 = arith.constant 0 : i32
    %c0_i32_0 = arith.constant 0 : i32
    %c0_i32_1 = arith.constant 0 : i32
    return %arg0, %arg1, %c0_i32, %c0_i32_0 : i32, i32, i32, i32
  }
}

module attributes {stable_mosaic.version = 11 : i64} {
  func.func @kernel(%arg0: i32, %arg1: i32, %arg2: memref<1x16x16x4xbf16, #tpu.memory_space<vmem>>, %arg3: memref<18x4x4xbf16, #tpu.memory_space<vmem>>, %arg4: memref<2x1x4xf32, #tpu.memory_space<vmem>>, %arg5: memref<4x32xbf16, #tpu.memory_space<vmem>>, %arg6: memref<1x32xf32, #tpu.memory_space<vmem>>, %arg7: memref<2x32x4xbf16, #tpu.memory_space<vmem>>, %arg8: memref<2x1x4xf32, #tpu.memory_space<vmem>>, %arg9: memref<1x4xf32, #tpu.memory_space<vmem>>, %arg10: memref<1x4x16x4xbf16, #tpu.memory_space<vmem>>, %arg11: memref<1x4x16x4xbf16, #tpu.memory_space<vmem>>, %arg12: memref<1x2x4xf32, #tpu.memory_space<vmem>>, %arg13: memref<1x4xf32, #tpu.memory_space<vmem>>, %arg14: memref<8x20x4xbf16, #tpu.memory_space<vmem>>) attributes {dimension_semantics = [#tpu.dimension_semantics<parallel>, #tpu.dimension_semantics<arbitrary>], iteration_bounds = array<i64: 2, 4>, scalar_prefetch = 0 : i64, scratch_operands = 2 : i64, tpu.core_type = #tpu.core_type<tc>, window_params = [{transform_indices = @transform_0, window_bounds = array<i64: 1, 16, 16, 4>}, {pipeline_mode = #tpu.pipeline_mode<synchronous>, transform_indices = @transform_1, window_bounds = array<i64: 18, 4, 4>}, {pipeline_mode = #tpu.pipeline_mode<synchronous>, transform_indices = @transform_2, window_bounds = array<i64: 2, 1, 4>}, {pipeline_mode = #tpu.pipeline_mode<synchronous>, transform_indices = @transform_3, window_bounds = array<i64: 4, 32>}, {pipeline_mode = #tpu.pipeline_mode<synchronous>, transform_indices = @transform_4, window_bounds = array<i64: 1, 32>}, {pipeline_mode = #tpu.pipeline_mode<synchronous>, transform_indices = @transform_5, window_bounds = array<i64: 2, 32, 4>}, {pipeline_mode = #tpu.pipeline_mode<synchronous>, transform_indices = @transform_6, window_bounds = array<i64: 2, 1, 4>}, {pipeline_mode = #tpu.pipeline_mode<synchronous>, transform_indices = @transform_7, window_bounds = array<i64: 1, 4>}, {transform_indices = @transform_8, window_bounds = array<i64: 1, 4, 16, 4>}, {transform_indices = @transform_9, window_bounds = array<i64: 1, 4, 16, 4>}, {transform_indices = @transform_10, window_bounds = array<i64: 1, 2, 4>}]} {
    %cst = arith.constant 0.000000e+00 : bf16
    %0 = vector.broadcast %cst : bf16 to vector<8x20x4xbf16>
    %c0 = arith.constant 0 : index
    %c0_0 = arith.constant 0 : index
    %c0_1 = arith.constant 0 : index
    %1 = vector.load %arg14[%c0, %c0_0, %c0_1] : memref<8x20x4xbf16, #tpu.memory_space<vmem>>, vector<8x20x4xbf16>
    tpu.vector_store %arg14[%c0, %c0_0, %c0_1], %0 {strides = array<i32>} : memref<8x20x4xbf16, #tpu.memory_space<vmem>>, vector<8x20x4xbf16>,
    %c0_i32 = arith.constant 0 : i32
    %2 = arith.cmpi eq, %arg1, %c0_i32 : i32
    %3 = arith.extui %2 : i1 to i32
    %c0_i32_2 = arith.constant 0 : i32
    %4 = arith.cmpi ne, %3, %c0_i32_2 : i32
    scf.if %4 {
      %c0_143 = arith.constant 0 : index
      %c0_144 = arith.constant 0 : index
      %c0_145 = arith.constant 0 : index
      %c0_146 = arith.constant 0 : index
      %157 = vector.load %arg2[%c0_143, %c0_144, %c0_145, %c0_146] : memref<1x16x16x4xbf16, #tpu.memory_space<vmem>>, vector<1x6x16x4xbf16>
      %158 = vector.shape_cast %157 : vector<1x6x16x4xbf16> to vector<6x16x4xbf16>
      %c2_147 = arith.constant 2 : index
      %c2_148 = arith.constant 2 : index
      %c0_149 = arith.constant 0 : index
      %159 = vector.load %arg14[%c2_147, %c2_148, %c0_149] : memref<8x20x4xbf16, #tpu.memory_space<vmem>>, vector<6x16x4xbf16>
      tpu.vector_store %arg14[%c2_147, %c2_148, %c0_149], %158 {strides = array<i32>} : memref<8x20x4xbf16, #tpu.memory_space<vmem>>, vector<6x16x4xbf16>,
    } else {
    }
    %c3_i32 = arith.constant 3 : i32
    %5 = arith.cmpi eq, %arg1, %c3_i32 : i32
    %6 = arith.extui %5 : i1 to i32
    %c0_i32_3 = arith.constant 0 : i32
    %7 = arith.cmpi ne, %6, %c0_i32_3 : i32
    scf.if %7 {
      %c0_143 = arith.constant 0 : index
      %c10_144 = arith.constant 10 : index
      %c0_145 = arith.constant 0 : index
      %c0_146 = arith.constant 0 : index
      %157 = vector.load %arg2[%c0_143, %c10_144, %c0_145, %c0_146] : memref<1x16x16x4xbf16, #tpu.memory_space<vmem>>, vector<1x6x16x4xbf16>
      %158 = vector.shape_cast %157 : vector<1x6x16x4xbf16> to vector<6x16x4xbf16>
      %c0_147 = arith.constant 0 : index
      %c2_148 = arith.constant 2 : index
      %c0_149 = arith.constant 0 : index
      %159 = vector.load %arg14[%c0_147, %c2_148, %c0_149] : memref<8x20x4xbf16, #tpu.memory_space<vmem>>, vector<6x16x4xbf16>
      tpu.vector_store %arg14[%c0_147, %c2_148, %c0_149], %158 {strides = array<i32>} : memref<8x20x4xbf16, #tpu.memory_space<vmem>>, vector<6x16x4xbf16>,
    } else {
    }
    %c0_i32_4 = arith.constant 0 : i32
    %8 = arith.cmpi sgt, %arg1, %c0_i32_4 : i32
    %c3_i32_5 = arith.constant 3 : i32
    %9 = arith.cmpi slt, %arg1, %c3_i32_5 : i32
    %10 = arith.andi %8, %9 : i1
    %11 = arith.extui %10 : i1 to i32
    %c0_i32_6 = arith.constant 0 : i32
    %12 = arith.cmpi ne, %11, %c0_i32_6 : i32
    scf.if %12 {
      %c4_i32 = arith.constant 4 : i32
      %157 = arith.muli %arg1, %c4_i32 : i32
      %c2_i32 = arith.constant 2 : i32
      %158 = arith.subi %157, %c2_i32 : i32
      %c0_143 = arith.constant 0 : index
      %159 = arith.index_cast %158 : i32 to index
      %c0_144 = arith.constant 0 : index
      %c0_145 = arith.constant 0 : index
      %160 = vector.load %arg2[%c0_143, %159, %c0_144, %c0_145] : memref<1x16x16x4xbf16, #tpu.memory_space<vmem>>, vector<1x8x16x4xbf16>
      %161 = vector.shape_cast %160 : vector<1x8x16x4xbf16> to vector<8x16x4xbf16>
      %c0_146 = arith.constant 0 : index
      %c2_147 = arith.constant 2 : index
      %c0_148 = arith.constant 0 : index
      %162 = vector.load %arg14[%c0_146, %c2_147, %c0_148] : memref<8x20x4xbf16, #tpu.memory_space<vmem>>, vector<8x16x4xbf16>
      tpu.vector_store %arg14[%c0_146, %c2_147, %c0_148], %161 {strides = array<i32>} : memref<8x20x4xbf16, #tpu.memory_space<vmem>>, vector<8x16x4xbf16>,
    } else {
    }
    %cst_7 = arith.constant 0.000000e+00 : f32
    %13 = vector.broadcast %cst_7 : f32 to vector<64x4xf32>
    %c1 = arith.constant 1 : index
    %c1_8 = arith.constant 1 : index
    %c0_9 = arith.constant 0 : index
    %14 = vector.load %arg14[%c1, %c1_8, %c0_9] : memref<8x20x4xbf16, #tpu.memory_space<vmem>>, vector<4x16x4xbf16>
    %15 = vector.shape_cast %14 : vector<4x16x4xbf16> to vector<64x4xbf16>
    %c0_10 = arith.constant 0 : index
    %c0_11 = arith.constant 0 : index
    %c0_12 = arith.constant 0 : index
    %16 = vector.load %arg3[%c0_10, %c0_11, %c0_12] : memref<18x4x4xbf16, #tpu.memory_space<vmem>>, vector<1x4x4xbf16>
    %17 = vector.shape_cast %16 : vector<1x4x4xbf16> to vector<4x4xbf16>
    %cst_13 = arith.constant dense<0.000000e+00> : vector<64x4xf32>
    %18 = tpu.matmul %15, %17, %cst_13 {dimension_numbers = #tpu.dot_dimension_numbers<[1], [0], [0], [1], [0, 0, 1, 1], [], []>} : vector<64x4xbf16>, vector<4x4xbf16>, vector<64x4xf32> -> vector<64x4xf32>
    %19 = arith.addf %13, %18 : vector<64x4xf32>
    %c1_14 = arith.constant 1 : index
    %c2 = arith.constant 2 : index
    %c0_15 = arith.constant 0 : index
    %20 = vector.load %arg14[%c1_14, %c2, %c0_15] : memref<8x20x4xbf16, #tpu.memory_space<vmem>>, vector<4x16x4xbf16>
    %21 = vector.shape_cast %20 : vector<4x16x4xbf16> to vector<64x4xbf16>
    %c1_16 = arith.constant 1 : index
    %c0_17 = arith.constant 0 : index
    %c0_18 = arith.constant 0 : index
    %22 = vector.load %arg3[%c1_16, %c0_17, %c0_18] : memref<18x4x4xbf16, #tpu.memory_space<vmem>>, vector<1x4x4xbf16>
    %23 = vector.shape_cast %22 : vector<1x4x4xbf16> to vector<4x4xbf16>
    %cst_19 = arith.constant dense<0.000000e+00> : vector<64x4xf32>
    %24 = tpu.matmul %21, %23, %cst_19 {dimension_numbers = #tpu.dot_dimension_numbers<[1], [0], [0], [1], [0, 0, 1, 1], [], []>} : vector<64x4xbf16>, vector<4x4xbf16>, vector<64x4xf32> -> vector<64x4xf32>
    %25 = arith.addf %19, %24 : vector<64x4xf32>
    %c1_20 = arith.constant 1 : index
    %c3 = arith.constant 3 : index
    %c0_21 = arith.constant 0 : index
    %26 = vector.load %arg14[%c1_20, %c3, %c0_21] : memref<8x20x4xbf16, #tpu.memory_space<vmem>>, vector<4x16x4xbf16>
    %27 = vector.shape_cast %26 : vector<4x16x4xbf16> to vector<64x4xbf16>
    %c2_22 = arith.constant 2 : index
    %c0_23 = arith.constant 0 : index
    %c0_24 = arith.constant 0 : index
    %28 = vector.load %arg3[%c2_22, %c0_23, %c0_24] : memref<18x4x4xbf16, #tpu.memory_space<vmem>>, vector<1x4x4xbf16>
    %29 = vector.shape_cast %28 : vector<1x4x4xbf16> to vector<4x4xbf16>
    %cst_25 = arith.constant dense<0.000000e+00> : vector<64x4xf32>
    %30 = tpu.matmul %27, %29, %cst_25 {dimension_numbers = #tpu.dot_dimension_numbers<[1], [0], [0], [1], [0, 0, 1, 1], [], []>} : vector<64x4xbf16>, vector<4x4xbf16>, vector<64x4xf32> -> vector<64x4xf32>
    %31 = arith.addf %25, %30 : vector<64x4xf32>
    %c2_26 = arith.constant 2 : index
    %c1_27 = arith.constant 1 : index
    %c0_28 = arith.constant 0 : index
    %32 = vector.load %arg14[%c2_26, %c1_27, %c0_28] : memref<8x20x4xbf16, #tpu.memory_space<vmem>>, vector<4x16x4xbf16>
    %33 = vector.shape_cast %32 : vector<4x16x4xbf16> to vector<64x4xbf16>
    %c3_29 = arith.constant 3 : index
    %c0_30 = arith.constant 0 : index
    %c0_31 = arith.constant 0 : index
    %34 = vector.load %arg3[%c3_29, %c0_30, %c0_31] : memref<18x4x4xbf16, #tpu.memory_space<vmem>>, vector<1x4x4xbf16>
    %35 = vector.shape_cast %34 : vector<1x4x4xbf16> to vector<4x4xbf16>
    %cst_32 = arith.constant dense<0.000000e+00> : vector<64x4xf32>
    %36 = tpu.matmul %33, %35, %cst_32 {dimension_numbers = #tpu.dot_dimension_numbers<[1], [0], [0], [1], [0, 0, 1, 1], [], []>} : vector<64x4xbf16>, vector<4x4xbf16>, vector<64x4xf32> -> vector<64x4xf32>
    %37 = arith.addf %31, %36 : vector<64x4xf32>
    %c2_33 = arith.constant 2 : index
    %c2_34 = arith.constant 2 : index
    %c0_35 = arith.constant 0 : index
    %38 = vector.load %arg14[%c2_33, %c2_34, %c0_35] : memref<8x20x4xbf16, #tpu.memory_space<vmem>>, vector<4x16x4xbf16>
    %39 = vector.shape_cast %38 : vector<4x16x4xbf16> to vector<64x4xbf16>
    %c4 = arith.constant 4 : index
    %c0_36 = arith.constant 0 : index
    %c0_37 = arith.constant 0 : index
    %40 = vector.load %arg3[%c4, %c0_36, %c0_37] : memref<18x4x4xbf16, #tpu.memory_space<vmem>>, vector<1x4x4xbf16>
    %41 = vector.shape_cast %40 : vector<1x4x4xbf16> to vector<4x4xbf16>
    %cst_38 = arith.constant dense<0.000000e+00> : vector<64x4xf32>
    %42 = tpu.matmul %39, %41, %cst_38 {dimension_numbers = #tpu.dot_dimension_numbers<[1], [0], [0], [1], [0, 0, 1, 1], [], []>} : vector<64x4xbf16>, vector<4x4xbf16>, vector<64x4xf32> -> vector<64x4xf32>
    %43 = arith.addf %37, %42 : vector<64x4xf32>
    %c2_39 = arith.constant 2 : index
    %c3_40 = arith.constant 3 : index
    %c0_41 = arith.constant 0 : index
    %44 = vector.load %arg14[%c2_39, %c3_40, %c0_41] : memref<8x20x4xbf16, #tpu.memory_space<vmem>>, vector<4x16x4xbf16>
    %45 = vector.shape_cast %44 : vector<4x16x4xbf16> to vector<64x4xbf16>
    %c5 = arith.constant 5 : index
    %c0_42 = arith.constant 0 : index
    %c0_43 = arith.constant 0 : index
    %46 = vector.load %arg3[%c5, %c0_42, %c0_43] : memref<18x4x4xbf16, #tpu.memory_space<vmem>>, vector<1x4x4xbf16>
    %47 = vector.shape_cast %46 : vector<1x4x4xbf16> to vector<4x4xbf16>
    %cst_44 = arith.constant dense<0.000000e+00> : vector<64x4xf32>
    %48 = tpu.matmul %45, %47, %cst_44 {dimension_numbers = #tpu.dot_dimension_numbers<[1], [0], [0], [1], [0, 0, 1, 1], [], []>} : vector<64x4xbf16>, vector<4x4xbf16>, vector<64x4xf32> -> vector<64x4xf32>
    %49 = arith.addf %43, %48 : vector<64x4xf32>
    %c3_45 = arith.constant 3 : index
    %c1_46 = arith.constant 1 : index
    %c0_47 = arith.constant 0 : index
    %50 = vector.load %arg14[%c3_45, %c1_46, %c0_47] : memref<8x20x4xbf16, #tpu.memory_space<vmem>>, vector<4x16x4xbf16>
    %51 = vector.shape_cast %50 : vector<4x16x4xbf16> to vector<64x4xbf16>
    %c6 = arith.constant 6 : index
    %c0_48 = arith.constant 0 : index
    %c0_49 = arith.constant 0 : index
    %52 = vector.load %arg3[%c6, %c0_48, %c0_49] : memref<18x4x4xbf16, #tpu.memory_space<vmem>>, vector<1x4x4xbf16>
    %53 = vector.shape_cast %52 : vector<1x4x4xbf16> to vector<4x4xbf16>
    %cst_50 = arith.constant dense<0.000000e+00> : vector<64x4xf32>
    %54 = tpu.matmul %51, %53, %cst_50 {dimension_numbers = #tpu.dot_dimension_numbers<[1], [0], [0], [1], [0, 0, 1, 1], [], []>} : vector<64x4xbf16>, vector<4x4xbf16>, vector<64x4xf32> -> vector<64x4xf32>
    %55 = arith.addf %49, %54 : vector<64x4xf32>
    %c3_51 = arith.constant 3 : index
    %c2_52 = arith.constant 2 : index
    %c0_53 = arith.constant 0 : index
    %56 = vector.load %arg14[%c3_51, %c2_52, %c0_53] : memref<8x20x4xbf16, #tpu.memory_space<vmem>>, vector<4x16x4xbf16>
    %57 = vector.shape_cast %56 : vector<4x16x4xbf16> to vector<64x4xbf16>
    %c7 = arith.constant 7 : index
    %c0_54 = arith.constant 0 : index
    %c0_55 = arith.constant 0 : index
    %58 = vector.load %arg3[%c7, %c0_54, %c0_55] : memref<18x4x4xbf16, #tpu.memory_space<vmem>>, vector<1x4x4xbf16>
    %59 = vector.shape_cast %58 : vector<1x4x4xbf16> to vector<4x4xbf16>
    %cst_56 = arith.constant dense<0.000000e+00> : vector<64x4xf32>
    %60 = tpu.matmul %57, %59, %cst_56 {dimension_numbers = #tpu.dot_dimension_numbers<[1], [0], [0], [1], [0, 0, 1, 1], [], []>} : vector<64x4xbf16>, vector<4x4xbf16>, vector<64x4xf32> -> vector<64x4xf32>
    %61 = arith.addf %55, %60 : vector<64x4xf32>
    %c3_57 = arith.constant 3 : index
    %c3_58 = arith.constant 3 : index
    %c0_59 = arith.constant 0 : index
    %62 = vector.load %arg14[%c3_57, %c3_58, %c0_59] : memref<8x20x4xbf16, #tpu.memory_space<vmem>>, vector<4x16x4xbf16>
    %63 = vector.shape_cast %62 : vector<4x16x4xbf16> to vector<64x4xbf16>
    %c8 = arith.constant 8 : index
    %c0_60 = arith.constant 0 : index
    %c0_61 = arith.constant 0 : index
    %64 = vector.load %arg3[%c8, %c0_60, %c0_61] : memref<18x4x4xbf16, #tpu.memory_space<vmem>>, vector<1x4x4xbf16>
    %65 = vector.shape_cast %64 : vector<1x4x4xbf16> to vector<4x4xbf16>
    %cst_62 = arith.constant dense<0.000000e+00> : vector<64x4xf32>
    %66 = tpu.matmul %63, %65, %cst_62 {dimension_numbers = #tpu.dot_dimension_numbers<[1], [0], [0], [1], [0, 0, 1, 1], [], []>} : vector<64x4xbf16>, vector<4x4xbf16>, vector<64x4xf32> -> vector<64x4xf32>
    %67 = arith.addf %61, %66 : vector<64x4xf32>
    %c0_63 = arith.constant 0 : index
    %c0_64 = arith.constant 0 : index
    %c0_65 = arith.constant 0 : index
    %68 = vector.load %arg4[%c0_63, %c0_64, %c0_65] : memref<2x1x4xf32, #tpu.memory_space<vmem>>, vector<1x1x4xf32>
    %69 = vector.shape_cast %68 : vector<1x1x4xf32> to vector<1x4xf32>
    %70 = vector.broadcast %69 : vector<1x4xf32> to vector<64x4xf32>
    %71 = arith.addf %67, %70 : vector<64x4xf32>
    %cst_66 = arith.constant 0.000000e+00 : f32
    %72 = vector.broadcast %cst_66 : f32 to vector<64x4xf32>
    %73 = arith.maximumf %71, %72 : vector<64x4xf32>
    %cst_67 = arith.constant 0.000000e+00 : f32
    %74 = vector.broadcast %cst_67 : f32 to vector<64x4xf32>
    %c0_68 = arith.constant 0 : index
    %c0_69 = arith.constant 0 : index
    %c0_70 = arith.constant 0 : index
    %75 = vector.load %arg14[%c0_68, %c0_69, %c0_70] : memref<8x20x4xbf16, #tpu.memory_space<vmem>>, vector<4x16x4xbf16>
    %76 = vector.shape_cast %75 : vector<4x16x4xbf16> to vector<64x4xbf16>
    %c9 = arith.constant 9 : index
    %c0_71 = arith.constant 0 : index
    %c0_72 = arith.constant 0 : index
    %77 = vector.load %arg3[%c9, %c0_71, %c0_72] : memref<18x4x4xbf16, #tpu.memory_space<vmem>>, vector<1x4x4xbf16>
    %78 = vector.shape_cast %77 : vector<1x4x4xbf16> to vector<4x4xbf16>
    %cst_73 = arith.constant dense<0.000000e+00> : vector<64x4xf32>
    %79 = tpu.matmul %76, %78, %cst_73 {dimension_numbers = #tpu.dot_dimension_numbers<[1], [0], [0], [1], [0, 0, 1, 1], [], []>} : vector<64x4xbf16>, vector<4x4xbf16>, vector<64x4xf32> -> vector<64x4xf32>
    %80 = arith.addf %74, %79 : vector<64x4xf32>
    %c0_74 = arith.constant 0 : index
    %c2_75 = arith.constant 2 : index
    %c0_76 = arith.constant 0 : index
    %81 = vector.load %arg14[%c0_74, %c2_75, %c0_76] : memref<8x20x4xbf16, #tpu.memory_space<vmem>>, vector<4x16x4xbf16>
    %82 = vector.shape_cast %81 : vector<4x16x4xbf16> to vector<64x4xbf16>
    %c10 = arith.constant 10 : index
    %c0_77 = arith.constant 0 : index
    %c0_78 = arith.constant 0 : index
    %83 = vector.load %arg3[%c10, %c0_77, %c0_78] : memref<18x4x4xbf16, #tpu.memory_space<vmem>>, vector<1x4x4xbf16>
    %84 = vector.shape_cast %83 : vector<1x4x4xbf16> to vector<4x4xbf16>
    %cst_79 = arith.constant dense<0.000000e+00> : vector<64x4xf32>
    %85 = tpu.matmul %82, %84, %cst_79 {dimension_numbers = #tpu.dot_dimension_numbers<[1], [0], [0], [1], [0, 0, 1, 1], [], []>} : vector<64x4xbf16>, vector<4x4xbf16>, vector<64x4xf32> -> vector<64x4xf32>
    %86 = arith.addf %80, %85 : vector<64x4xf32>
    %c0_80 = arith.constant 0 : index
    %c4_81 = arith.constant 4 : index
    %c0_82 = arith.constant 0 : index
    %87 = vector.load %arg14[%c0_80, %c4_81, %c0_82] : memref<8x20x4xbf16, #tpu.memory_space<vmem>>, vector<4x16x4xbf16>
    %88 = vector.shape_cast %87 : vector<4x16x4xbf16> to vector<64x4xbf16>
    %c11 = arith.constant 11 : index
    %c0_83 = arith.constant 0 : index
    %c0_84 = arith.constant 0 : index
    %89 = vector.load %arg3[%c11, %c0_83, %c0_84] : memref<18x4x4xbf16, #tpu.memory_space<vmem>>, vector<1x4x4xbf16>
    %90 = vector.shape_cast %89 : vector<1x4x4xbf16> to vector<4x4xbf16>
    %cst_85 = arith.constant dense<0.000000e+00> : vector<64x4xf32>
    %91 = tpu.matmul %88, %90, %cst_85 {dimension_numbers = #tpu.dot_dimension_numbers<[1], [0], [0], [1], [0, 0, 1, 1], [], []>} : vector<64x4xbf16>, vector<4x4xbf16>, vector<64x4xf32> -> vector<64x4xf32>
    %92 = arith.addf %86, %91 : vector<64x4xf32>
    %c2_86 = arith.constant 2 : index
    %c0_87 = arith.constant 0 : index
    %c0_88 = arith.constant 0 : index
    %93 = vector.load %arg14[%c2_86, %c0_87, %c0_88] : memref<8x20x4xbf16, #tpu.memory_space<vmem>>, vector<4x16x4xbf16>
    %94 = vector.shape_cast %93 : vector<4x16x4xbf16> to vector<64x4xbf16>
    %c12 = arith.constant 12 : index
    %c0_89 = arith.constant 0 : index
    %c0_90 = arith.constant 0 : index
    %95 = vector.load %arg3[%c12, %c0_89, %c0_90] : memref<18x4x4xbf16, #tpu.memory_space<vmem>>, vector<1x4x4xbf16>
    %96 = vector.shape_cast %95 : vector<1x4x4xbf16> to vector<4x4xbf16>
    %cst_91 = arith.constant dense<0.000000e+00> : vector<64x4xf32>
    %97 = tpu.matmul %94, %96, %cst_91 {dimension_numbers = #tpu.dot_dimension_numbers<[1], [0], [0], [1], [0, 0, 1, 1], [], []>} : vector<64x4xbf16>, vector<4x4xbf16>, vector<64x4xf32> -> vector<64x4xf32>
    %98 = arith.addf %92, %97 : vector<64x4xf32>
    %c2_92 = arith.constant 2 : index
    %c2_93 = arith.constant 2 : index
    %c0_94 = arith.constant 0 : index
    %99 = vector.load %arg14[%c2_92, %c2_93, %c0_94] : memref<8x20x4xbf16, #tpu.memory_space<vmem>>, vector<4x16x4xbf16>
    %100 = vector.shape_cast %99 : vector<4x16x4xbf16> to vector<64x4xbf16>
    %c13 = arith.constant 13 : index
    %c0_95 = arith.constant 0 : index
    %c0_96 = arith.constant 0 : index
    %101 = vector.load %arg3[%c13, %c0_95, %c0_96] : memref<18x4x4xbf16, #tpu.memory_space<vmem>>, vector<1x4x4xbf16>
    %102 = vector.shape_cast %101 : vector<1x4x4xbf16> to vector<4x4xbf16>
    %cst_97 = arith.constant dense<0.000000e+00> : vector<64x4xf32>
    %103 = tpu.matmul %100, %102, %cst_97 {dimension_numbers = #tpu.dot_dimension_numbers<[1], [0], [0], [1], [0, 0, 1, 1], [], []>} : vector<64x4xbf16>, vector<4x4xbf16>, vector<64x4xf32> -> vector<64x4xf32>
    %104 = arith.addf %98, %103 : vector<64x4xf32>
    %c2_98 = arith.constant 2 : index
    %c4_99 = arith.constant 4 : index
    %c0_100 = arith.constant 0 : index
    %105 = vector.load %arg14[%c2_98, %c4_99, %c0_100] : memref<8x20x4xbf16, #tpu.memory_space<vmem>>, vector<4x16x4xbf16>
    %106 = vector.shape_cast %105 : vector<4x16x4xbf16> to vector<64x4xbf16>
    %c14 = arith.constant 14 : index
    %c0_101 = arith.constant 0 : index
    %c0_102 = arith.constant 0 : index
    %107 = vector.load %arg3[%c14, %c0_101, %c0_102] : memref<18x4x4xbf16, #tpu.memory_space<vmem>>, vector<1x4x4xbf16>
    %108 = vector.shape_cast %107 : vector<1x4x4xbf16> to vector<4x4xbf16>
    %cst_103 = arith.constant dense<0.000000e+00> : vector<64x4xf32>
    %109 = tpu.matmul %106, %108, %cst_103 {dimension_numbers = #tpu.dot_dimension_numbers<[1], [0], [0], [1], [0, 0, 1, 1], [], []>} : vector<64x4xbf16>, vector<4x4xbf16>, vector<64x4xf32> -> vector<64x4xf32>
    %110 = arith.addf %104, %109 : vector<64x4xf32>
    %c4_104 = arith.constant 4 : index
    %c0_105 = arith.constant 0 : index
    %c0_106 = arith.constant 0 : index
    %111 = vector.load %arg14[%c4_104, %c0_105, %c0_106] : memref<8x20x4xbf16, #tpu.memory_space<vmem>>, vector<4x16x4xbf16>
    %112 = vector.shape_cast %111 : vector<4x16x4xbf16> to vector<64x4xbf16>
    %c15 = arith.constant 15 : index
    %c0_107 = arith.constant 0 : index
    %c0_108 = arith.constant 0 : index
    %113 = vector.load %arg3[%c15, %c0_107, %c0_108] : memref<18x4x4xbf16, #tpu.memory_space<vmem>>, vector<1x4x4xbf16>
    %114 = vector.shape_cast %113 : vector<1x4x4xbf16> to vector<4x4xbf16>
    %cst_109 = arith.constant dense<0.000000e+00> : vector<64x4xf32>
    %115 = tpu.matmul %112, %114, %cst_109 {dimension_numbers = #tpu.dot_dimension_numbers<[1], [0], [0], [1], [0, 0, 1, 1], [], []>} : vector<64x4xbf16>, vector<4x4xbf16>, vector<64x4xf32> -> vector<64x4xf32>
    %116 = arith.addf %110, %115 : vector<64x4xf32>
    %c4_110 = arith.constant 4 : index
    %c2_111 = arith.constant 2 : index
    %c0_112 = arith.constant 0 : index
    %117 = vector.load %arg14[%c4_110, %c2_111, %c0_112] : memref<8x20x4xbf16, #tpu.memory_space<vmem>>, vector<4x16x4xbf16>
    %118 = vector.shape_cast %117 : vector<4x16x4xbf16> to vector<64x4xbf16>
    %c16 = arith.constant 16 : index
    %c0_113 = arith.constant 0 : index
    %c0_114 = arith.constant 0 : index
    %119 = vector.load %arg3[%c16, %c0_113, %c0_114] : memref<18x4x4xbf16, #tpu.memory_space<vmem>>, vector<1x4x4xbf16>
    %120 = vector.shape_cast %119 : vector<1x4x4xbf16> to vector<4x4xbf16>
    %cst_115 = arith.constant dense<0.000000e+00> : vector<64x4xf32>
    %121 = tpu.matmul %118, %120, %cst_115 {dimension_numbers = #tpu.dot_dimension_numbers<[1], [0], [0], [1], [0, 0, 1, 1], [], []>} : vector<64x4xbf16>, vector<4x4xbf16>, vector<64x4xf32> -> vector<64x4xf32>
    %122 = arith.addf %116, %121 : vector<64x4xf32>
    %c4_116 = arith.constant 4 : index
    %c4_117 = arith.constant 4 : index
    %c0_118 = arith.constant 0 : index
    %123 = vector.load %arg14[%c4_116, %c4_117, %c0_118] : memref<8x20x4xbf16, #tpu.memory_space<vmem>>, vector<4x16x4xbf16>
    %124 = vector.shape_cast %123 : vector<4x16x4xbf16> to vector<64x4xbf16>
    %c17 = arith.constant 17 : index
    %c0_119 = arith.constant 0 : index
    %c0_120 = arith.constant 0 : index
    %125 = vector.load %arg3[%c17, %c0_119, %c0_120] : memref<18x4x4xbf16, #tpu.memory_space<vmem>>, vector<1x4x4xbf16>
    %126 = vector.shape_cast %125 : vector<1x4x4xbf16> to vector<4x4xbf16>
    %cst_121 = arith.constant dense<0.000000e+00> : vector<64x4xf32>
    %127 = tpu.matmul %124, %126, %cst_121 {dimension_numbers = #tpu.dot_dimension_numbers<[1], [0], [0], [1], [0, 0, 1, 1], [], []>} : vector<64x4xbf16>, vector<4x4xbf16>, vector<64x4xf32> -> vector<64x4xf32>
    %128 = arith.addf %122, %127 : vector<64x4xf32>
    %c1_122 = arith.constant 1 : index
    %c0_123 = arith.constant 0 : index
    %c0_124 = arith.constant 0 : index
    %129 = vector.load %arg4[%c1_122, %c0_123, %c0_124] : memref<2x1x4xf32, #tpu.memory_space<vmem>>, vector<1x1x4xf32>
    %130 = vector.shape_cast %129 : vector<1x1x4xf32> to vector<1x4xf32>
    %131 = vector.broadcast %130 : vector<1x4xf32> to vector<64x4xf32>
    %132 = arith.addf %128, %131 : vector<64x4xf32>
    %cst_125 = arith.constant 0.000000e+00 : f32
    %133 = vector.broadcast %cst_125 : f32 to vector<64x4xf32>
    %134 = arith.maximumf %132, %133 : vector<64x4xf32>
    %135 = vector.shape_cast %73 : vector<64x4xf32> to vector<4x16x4xf32>
    %136 = arith.truncf %135 : vector<4x16x4xf32> to vector<4x16x4xbf16>
    %c0_126 = arith.constant 0 : index
    %c0_127 = arith.constant 0 : index
    %c0_128 = arith.constant 0 : index
    %c0_129 = arith.constant 0 : index
    %137 = vector.load %arg10[%c0_126, %c0_127, %c0_128, %c0_129] : memref<1x4x16x4xbf16, #tpu.memory_space<vmem>>, vector<1x4x16x4xbf16>
    %138 = vector.shape_cast %137 : vector<1x4x16x4xbf16> to vector<4x16x4xbf16>
    %139 = vector.shape_cast %136 : vector<4x16x4xbf16> to vector<1x4x16x4xbf16>
    tpu.vector_store %arg10[%c0_126, %c0_127, %c0_128, %c0_129], %139 {strides = array<i32>} : memref<1x4x16x4xbf16, #tpu.memory_space<vmem>>, vector<1x4x16x4xbf16>,
    %140 = vector.shape_cast %134 : vector<64x4xf32> to vector<4x16x4xf32>
    %141 = arith.truncf %140 : vector<4x16x4xf32> to vector<4x16x4xbf16>
    %c0_130 = arith.constant 0 : index
    %c0_131 = arith.constant 0 : index
    %c0_132 = arith.constant 0 : index
    %c0_133 = arith.constant 0 : index
    %142 = vector.load %arg11[%c0_130, %c0_131, %c0_132, %c0_133] : memref<1x4x16x4xbf16, #tpu.memory_space<vmem>>, vector<1x4x16x4xbf16>
    %143 = vector.shape_cast %142 : vector<1x4x16x4xbf16> to vector<4x16x4xbf16>
    %144 = vector.shape_cast %141 : vector<4x16x4xbf16> to vector<1x4x16x4xbf16>
    tpu.vector_store %arg11[%c0_130, %c0_131, %c0_132, %c0_133], %144 {strides = array<i32>} : memref<1x4x16x4xbf16, #tpu.memory_space<vmem>>, vector<1x4x16x4xbf16>,
    %145 = arith.addf %73, %134 : vector<64x4xf32>
    %cst_134 = arith.constant dense<0.000000e+00> : vector<4xf32>
    %146 = vector.multi_reduction <add>, %145, %cst_134 [0] : vector<64x4xf32> to vector<4xf32>
    %147 = vector.shape_cast %146 : vector<4xf32> to vector<1x4xf32>
    %c0_i32_135 = arith.constant 0 : i32
    %148 = arith.cmpi eq, %arg1, %c0_i32_135 : i32
    %149 = arith.extui %148 : i1 to i32
    %c0_i32_136 = arith.constant 0 : i32
    %150 = arith.cmpi ne, %149, %c0_i32_136 : i32
    scf.if %150 {
      %cst_143 = arith.constant 0.000000e+00 : f32
      %157 = vector.broadcast %cst_143 : f32 to vector<1x4xf32>
      %c0_144 = arith.constant 0 : index
      %c0_145 = arith.constant 0 : index
      %158 = vector.load %arg13[%c0_144, %c0_145] : memref<1x4xf32, #tpu.memory_space<vmem>>, vector<1x4xf32>
      tpu.vector_store %arg13[%c0_144, %c0_145], %157 {strides = array<i32>} : memref<1x4xf32, #tpu.memory_space<vmem>>, vector<1x4xf32>,
    } else {
    }
    %c0_137 = arith.constant 0 : index
    %c0_138 = arith.constant 0 : index
    %151 = vector.load %arg13[%c0_137, %c0_138] : memref<1x4xf32, #tpu.memory_space<vmem>>, vector<1x4xf32>
    %152 = arith.addf %151, %147 : vector<1x4xf32>
    %c0_139 = arith.constant 0 : index
    %c0_140 = arith.constant 0 : index
    %153 = vector.load %arg13[%c0_139, %c0_140] : memref<1x4xf32, #tpu.memory_space<vmem>>, vector<1x4xf32>
    tpu.vector_store %arg13[%c0_139, %c0_140], %152 {strides = array<i32>} : memref<1x4xf32, #tpu.memory_space<vmem>>, vector<1x4xf32>,
    %c3_i32_141 = arith.constant 3 : i32
    %154 = arith.cmpi eq, %arg1, %c3_i32_141 : i32
    %155 = arith.extui %154 : i1 to i32
    %c0_i32_142 = arith.constant 0 : i32
    %156 = arith.cmpi ne, %155, %c0_i32_142 : i32
    scf.if %156 {
      %c0_143 = arith.constant 0 : index
      %c0_144 = arith.constant 0 : index
      %157 = vector.load %arg13[%c0_143, %c0_144] : memref<1x4xf32, #tpu.memory_space<vmem>>, vector<1x4xf32>
      %cst_145 = arith.constant 3.906250e-03 : f32
      %158 = vector.broadcast %cst_145 : f32 to vector<1x4xf32>
      %159 = arith.mulf %157, %158 : vector<1x4xf32>
      %160 = arith.truncf %159 : vector<1x4xf32> to vector<1x4xbf16>
      %c0_146 = arith.constant 0 : index
      %c0_147 = arith.constant 0 : index
      %161 = vector.load %arg5[%c0_146, %c0_147] : memref<4x32xbf16, #tpu.memory_space<vmem>>, vector<4x32xbf16>
      %cst_148 = arith.constant dense<0.000000e+00> : vector<1x32xf32>
      %162 = tpu.matmul %160, %161, %cst_148 {dimension_numbers = #tpu.dot_dimension_numbers<[1], [0], [0], [1], [0, 0, 1, 1], [], []>} : vector<1x4xbf16>, vector<4x32xbf16>, vector<1x32xf32> -> vector<1x32xf32>
      %c0_149 = arith.constant 0 : index
      %c0_150 = arith.constant 0 : index
      %163 = vector.load %arg6[%c0_149, %c0_150] : memref<1x32xf32, #tpu.memory_space<vmem>>, vector<1x32xf32>
      %164 = arith.addf %162, %163 : vector<1x32xf32>
      %cst_151 = arith.constant 0.000000e+00 : f32
      %165 = vector.broadcast %cst_151 : f32 to vector<1x32xf32>
      %166 = arith.maximumf %164, %165 : vector<1x32xf32>
      %167 = arith.truncf %166 : vector<1x32xf32> to vector<1x32xbf16>
      %c0_152 = arith.constant 0 : index
      %c0_153 = arith.constant 0 : index
      %c0_154 = arith.constant 0 : index
      %168 = vector.load %arg7[%c0_152, %c0_153, %c0_154] : memref<2x32x4xbf16, #tpu.memory_space<vmem>>, vector<1x32x4xbf16>
      %169 = vector.shape_cast %168 : vector<1x32x4xbf16> to vector<32x4xbf16>
      %cst_155 = arith.constant dense<0.000000e+00> : vector<1x4xf32>
      %170 = tpu.matmul %167, %169, %cst_155 {dimension_numbers = #tpu.dot_dimension_numbers<[1], [0], [0], [1], [0, 0, 1, 1], [], []>} : vector<1x32xbf16>, vector<32x4xbf16>, vector<1x4xf32> -> vector<1x4xf32>
      %c0_156 = arith.constant 0 : index
      %c0_157 = arith.constant 0 : index
      %c0_158 = arith.constant 0 : index
      %171 = vector.load %arg8[%c0_156, %c0_157, %c0_158] : memref<2x1x4xf32, #tpu.memory_space<vmem>>, vector<1x1x4xf32>
      %172 = vector.shape_cast %171 : vector<1x1x4xf32> to vector<1x4xf32>
      %173 = arith.addf %170, %172 : vector<1x4xf32>
      %c1_159 = arith.constant 1 : index
      %c0_160 = arith.constant 0 : index
      %c0_161 = arith.constant 0 : index
      %174 = vector.load %arg7[%c1_159, %c0_160, %c0_161] : memref<2x32x4xbf16, #tpu.memory_space<vmem>>, vector<1x32x4xbf16>
      %175 = vector.shape_cast %174 : vector<1x32x4xbf16> to vector<32x4xbf16>
      %cst_162 = arith.constant dense<0.000000e+00> : vector<1x4xf32>
      %176 = tpu.matmul %167, %175, %cst_162 {dimension_numbers = #tpu.dot_dimension_numbers<[1], [0], [0], [1], [0, 0, 1, 1], [], []>} : vector<1x32xbf16>, vector<32x4xbf16>, vector<1x4xf32> -> vector<1x4xf32>
      %c1_163 = arith.constant 1 : index
      %c0_164 = arith.constant 0 : index
      %c0_165 = arith.constant 0 : index
      %177 = vector.load %arg8[%c1_163, %c0_164, %c0_165] : memref<2x1x4xf32, #tpu.memory_space<vmem>>, vector<1x1x4xf32>
      %178 = vector.shape_cast %177 : vector<1x1x4xf32> to vector<1x4xf32>
      %179 = arith.addf %176, %178 : vector<1x4xf32>
      %180 = arith.maximumf %173, %179 : vector<1x4xf32>
      %181 = arith.subf %173, %180 : vector<1x4xf32>
      %182 = math.exp %181 : vector<1x4xf32>
      %183 = arith.subf %179, %180 : vector<1x4xf32>
      %184 = math.exp %183 : vector<1x4xf32>
      %185 = arith.addf %182, %184 : vector<1x4xf32>
      %186 = tpu.reciprocal %185 {approx = true} : vector<1x4xf32> -> vector<1x4xf32>
      %187 = arith.mulf %182, %186 : vector<1x4xf32>
      %188 = arith.mulf %184, %186 : vector<1x4xf32>
      %189 = tpu.concatenate %187, %188 in 0 : vector<1x4xf32>, vector<1x4xf32> -> vector<2x4xf32>
      %c0_166 = arith.constant 0 : index
      %c0_167 = arith.constant 0 : index
      %190 = vector.load %arg9[%c0_166, %c0_167] : memref<1x4xf32, #tpu.memory_space<vmem>>, vector<1x4xf32>
      %191 = vector.broadcast %190 : vector<1x4xf32> to vector<2x4xf32>
      %192 = arith.mulf %189, %191 : vector<2x4xf32>
      %c0_168 = arith.constant 0 : index
      %c0_169 = arith.constant 0 : index
      %c0_170 = arith.constant 0 : index
      %193 = vector.load %arg12[%c0_168, %c0_169, %c0_170] : memref<1x2x4xf32, #tpu.memory_space<vmem>>, vector<1x2x4xf32>
      %194 = vector.shape_cast %193 : vector<1x2x4xf32> to vector<2x4xf32>
      %195 = vector.shape_cast %192 : vector<2x4xf32> to vector<1x2x4xf32>
      tpu.vector_store %arg12[%c0_168, %c0_169, %c0_170], %195 {strides = array<i32>} : memref<1x2x4xf32, #tpu.memory_space<vmem>>, vector<1x2x4xf32>,
    } else {
    }
    return
  }
  func.func @transform_0(%arg0: i32, %arg1: i32) -> (i32, i32, i32, i32) {
    %c0_i32 = arith.constant 0 : i32
    %c0_i32_0 = arith.constant 0 : i32
    %c0_i32_1 = arith.constant 0 : i32
    %c0_i32_2 = arith.constant 0 : i32
    return %arg0, %c0_i32, %c0_i32_0, %c0_i32_1 : i32, i32, i32, i32
  }
  func.func @transform_1(%arg0: i32, %arg1: i32) -> (i32, i32, i32) {
    %c0_i32 = arith.constant 0 : i32
    %c0_i32_0 = arith.constant 0 : i32
    %c0_i32_1 = arith.constant 0 : i32
    %c0_i32_2 = arith.constant 0 : i32
    return %c0_i32, %c0_i32_0, %c0_i32_1 : i32, i32, i32
  }
  func.func @transform_2(%arg0: i32, %arg1: i32) -> (i32, i32, i32) {
    %c0_i32 = arith.constant 0 : i32
    %c0_i32_0 = arith.constant 0 : i32
    %c0_i32_1 = arith.constant 0 : i32
    %c0_i32_2 = arith.constant 0 : i32
    return %c0_i32, %c0_i32_0, %c0_i32_1 : i32, i32, i32
  }
  func.func @transform_3(%arg0: i32, %arg1: i32) -> (i32, i32) {
    %c0_i32 = arith.constant 0 : i32
    %c0_i32_0 = arith.constant 0 : i32
    %c0_i32_1 = arith.constant 0 : i32
    return %c0_i32, %c0_i32_0 : i32, i32
  }
  func.func @transform_4(%arg0: i32, %arg1: i32) -> (i32, i32) {
    %c0_i32 = arith.constant 0 : i32
    %c0_i32_0 = arith.constant 0 : i32
    %c0_i32_1 = arith.constant 0 : i32
    return %c0_i32, %c0_i32_0 : i32, i32
  }
  func.func @transform_5(%arg0: i32, %arg1: i32) -> (i32, i32, i32) {
    %c0_i32 = arith.constant 0 : i32
    %c0_i32_0 = arith.constant 0 : i32
    %c0_i32_1 = arith.constant 0 : i32
    %c0_i32_2 = arith.constant 0 : i32
    return %c0_i32, %c0_i32_0, %c0_i32_1 : i32, i32, i32
  }
  func.func @transform_6(%arg0: i32, %arg1: i32) -> (i32, i32, i32) {
    %c0_i32 = arith.constant 0 : i32
    %c0_i32_0 = arith.constant 0 : i32
    %c0_i32_1 = arith.constant 0 : i32
    %c0_i32_2 = arith.constant 0 : i32
    return %c0_i32, %c0_i32_0, %c0_i32_1 : i32, i32, i32
  }
  func.func @transform_7(%arg0: i32, %arg1: i32) -> (i32, i32) {
    %c0_i32 = arith.constant 0 : i32
    %c0_i32_0 = arith.constant 0 : i32
    %c0_i32_1 = arith.constant 0 : i32
    return %c0_i32, %c0_i32_0 : i32, i32
  }
  func.func @transform_8(%arg0: i32, %arg1: i32) -> (i32, i32, i32, i32) {
    %c0_i32 = arith.constant 0 : i32
    %c0_i32_0 = arith.constant 0 : i32
    %c0_i32_1 = arith.constant 0 : i32
    return %arg0, %arg1, %c0_i32, %c0_i32_0 : i32, i32, i32, i32
  }
  func.func @transform_9(%arg0: i32, %arg1: i32) -> (i32, i32, i32, i32) {
    %c0_i32 = arith.constant 0 : i32
    %c0_i32_0 = arith.constant 0 : i32
    %c0_i32_1 = arith.constant 0 : i32
    return %arg0, %arg1, %c0_i32, %c0_i32_0 : i32, i32, i32, i32
  }
  func.func @transform_10(%arg0: i32, %arg1: i32) -> (i32, i32, i32) {
    %c0_i32 = arith.constant 0 : i32
    %c0_i32_0 = arith.constant 0 : i32
    %c0_i32_1 = arith.constant 0 : i32
    return %arg0, %c0_i32, %c0_i32_0 : i32, i32, i32
  }
}

</mosaic_0001>

<bundles_post_ra>
// kernel: sk_block_forward.5
= control target key start
LH: loop header
LB: loop body
LE: loop exit
PB: predicated region body
PF: predicated region fallthrough
CT: control target
= control target key end

     0   :  { %s1042_s24 = smov 0   ;;  %s1044_s25 = smov 0   ;;  %s1167_s0 = inlined_call_operand.vmem [shape: bf16[2,16,16,4], index: 0, kind: input, shape index: {}]   ;;  %s1168_s1 = inlined_call_operand.vmem [shape: bf16[2,16,16,4], index: 1, kind: input, shape index: {}]   ;;  %s1169_s2 = inlined_call_operand.vmem [shape: f32[2,2,4], index: 2, kind: input, shape index: {}]   ;;  %s1170_s3 = inlined_call_operand.vmem [shape: f32[1,4], index: 3, kind: input, shape index: {}]   ;;  %s1171_s4 = inlined_call_operand.vmem [shape: bf16[4,16], index: 4, kind: input, shape index: {}]   ;;  %s1172_s5 = inlined_call_operand.vmem [shape: f32[1,16], index: 5, kind: input, shape index: {}]   ;;  %s1173_s6 = inlined_call_operand.vmem [shape: f32[2,16,16,16], index: 6, kind: input, shape index: {}]   ;;  %s1174_s7 = inlined_call_operand.vmem [shape: bf16[2,16,16,16], index: 7, kind: output, shape index: {}]  }
   0x1   :  { %s1046_s26 = smov 0   ;;  %s1048_s27 = smov 0  }
   0x2   :  { %s1050_s28 = smov 0  }
   0x3 LB: > { %s26_s29 = sadd.s32 1, %s992_s26  ;;  %s29_s30 = sadd.s32 1, %s996_s27  ;;  %s1000_s28 = sphi %s1050_s28, %s17_s28   ;;  %s996_s27 = sphi %s1048_s27, %s1178_s27   ;;  %s992_s26 = sphi %s1046_s26, %s1177_s26   ;;  %s988_s25 = sphi %s1044_s25, %s1176_s25   ;;  %s984_s24 = sphi %s1042_s24, %s1175_s24  }
   0x4   : > { %p27_p0 = scmp.ge.s32.totalorder %s26_s29, 4  ;;  %p823_p1 = scmp.ge.s32.totalorder %s1000_s28, 1 }
   0x5   : > { %p304_p2 = scmp.lt.s32.totalorder %s1000_s28, 9 }
   0x6   : > { %s1180_s29 = smov (%p27_p0, %s26_s29), 0  ;;  %s1182_s30 = smov (!%p27_p0, %s29_s30), %s996_s27 }
   0x7   : > { %p305_p3 = pnand %p823_p1, %p304_p2  ;;  %p31_p4 = scmp.ge.s32.totalorder %s1182_s30, 2 }
   0x8   : > { %s824_s10 = sshll.u32 (!%p305_p3), %s984_s24, 2  ;;  %p371_p5 = scmp.lt.s32.totalorder (!%p305_p3), %s988_s25, 1 }
   0x9   : > { %s1184_s30 = smov (%p31_p4, %s1182_s30), 0  ;;  %308 = sbr.rel (%p305_p3) target bundleno = 251 (0xfb), region = 48 }
   0xa   : > { %p373_p6 = scmp.lt.s32.totalorder (!%p305_p3), %s824_s10, 15 }
   0xe   : > { %v511_v0 = vld [vmem:[%s1171_s4] sm:$0x3]  ;;  %vm532_vm0 = vcmask 1041408   ;;  %v452_v1 = vlaneseq  ;;  %s1186_s25 = smov (!%p371_p5, %s988_s25), 1  ;;  %s1188_s10 = smov (!%p373_p6, %s824_s10), 15  ;;  %vm519_vm1 = vcmask 31744  }
   0xf   : > { %920 = vmatprep.subr.msk.bf16.mxu0 %vm532_vm0, %v511_v0  ;;  %921 = vmatprep.subr.msk.bf16.mxu1 %vm532_vm0, %v511_v0  ;;  %v534_v2 = vsel %vm532_vm0, %v511_v0, 0  ;;  %s826_s11 = sshll.u32 %s1186_s25, 5  ;;  %s832_s12 = sshll.u32 %s1186_s25, 1  ;;  %v841_v27 = vld [vmem:[%s1170_s3] ss:$0 sm:$0xff]  ;;  %vm657_vm2 = vcmask 125952  }
  0x10   : > { %909 = vmatpush3.bf16.msra.mxu0 %v534_v2  ;;  %919 = vmatpush3.bf16.msra.mxu1 %v534_v2  ;;  %v453_v3 = vshrl.u32 %v452_v1, 7  ;;  %s825_s13 = sshll.u32 %s1188_s10, 1  ;;  %s395_s16 = scalar_lea.vmem %s1169_s2, %s832_s12 }
  0x11   : > { %s1081_s17 = sadd.s32 %s826_s11, %s825_s13  ;;  %v419_v6 = vld [vmem:[%s395_s16] sm:$0x3] }
  0x12   : > { %v454_v4 = vsub.s32 0, %v453_v3  ;;  %v466_v5 = vsub.s32 1, %v453_v3  ;;  %s1084_s18 = sshll.u32 %s1081_s17, 2  ;;  %s836_s9 = sshll.u32 %s1081_s17, 3 }
  0x13   : > { %s1090_s21 = scalar_lea.vmem %s1167_s0, %s1084_s18  ;;  %s1096_s24 = scalar_lea.vmem %s1168_s1, %s1084_s18 }
  0x14   : > { %v455_v7 = vrot.slane %v419_v6, %v454_v4  ;;  %v467_v8 = vrot.slane %v419_v6, %v466_v5  ;;  %v866_v9 = vld [vmem:[%s1090_s21] sm:$0xff]   ;;  %v898_v11 = vld [vmem:[%s1090_s21 + $0x10] sm:$0xff]   ;;  %v897_v21 = vld [vmem:[%s1090_s21 + $0x8] sm:$0xff]   ;;  %s1117_s12 = scalar_lea.vmem %s1173_s6, %s836_s9  ;;  %s1130_s17 = scalar_lea.vmem %s1174_s7, %s1084_s18 }
  0x15   : > { %v882_v10 = vld [vmem:[%s1096_s24] sm:$0xff]   ;;  %v867_v12 = vunpack.c.l.bf16 %v866_v9  ;;  %v868_v13 = vunpack.c.h.bf16 %v866_v9  ;;  %v901_v16 = vld [vmem:[%s1096_s24 + $0x10] sm:$0xff]   ;;  %v875_v17 = vunpack.c.l.bf16 %v898_v11  ;;  %v876_v18 = vunpack.c.h.bf16 %v898_v11  ;;  %v900_v26 = vld [vmem:[%s1096_s24 + $0x8] sm:$0xff]  }
  0x16   : > { %v883_v14 = vunpack.c.l.bf16 %v882_v10  ;;  %v884_v15 = vunpack.c.h.bf16 %v882_v10  ;;  %v891_v19 = vunpack.c.l.bf16 %v901_v16  ;;  %v892_v20 = vunpack.c.h.bf16 %v901_v16  ;;  %v899_v40 = vld [vmem:[%s1090_s21 + $0x18] sm:$0xff]   ;;  %v603_v16 = vld [vmem:[%s1117_s12 + $0x10] sm:$0xff] }
  0x17   : > { %v456_v22 = vmul.f32 %v867_v12, %v455_v7  ;;  %v457_v23 = vmul.f32 %v868_v13, %v455_v7  ;;  %v460_v28 = vmul.f32 %v875_v17, %v455_v7  ;;  %v461_v29 = vmul.f32 %v876_v18, %v455_v7  ;;  %v902_v49 = vld [vmem:[%s1096_s24 + $0x18] sm:$0xff]  }
  0x18   : > { %v468_v24 = vmul.f32 %v883_v14, %v467_v8  ;;  %v469_v25 = vmul.f32 %v884_v15, %v467_v8  ;;  %v472_v30 = vmul.f32 %v891_v19, %v467_v8  ;;  %v473_v31 = vmul.f32 %v892_v20, %v467_v8  ;;  %v601_v19 = vld [vmem:[%s1117_s12] sm:$0xff] }
  0x19   : > { %v871_v34 = vunpack.c.l.bf16 %v897_v21  ;;  %v872_v35 = vunpack.c.h.bf16 %v897_v21  ;;  %v887_v38 = vunpack.c.l.bf16 %v900_v26  ;;  %v888_v39 = vunpack.c.h.bf16 %v900_v26  ;;  %v607_v26 = vld [vmem:[%s1117_s12 + $0x30] sm:$0xff] }
  0x1a   : > { %v476_v32 = vadd.f32 %v468_v24, %v456_v22  ;;  %v477_v33 = vadd.f32 %v469_v25, %v457_v23  ;;  %v480_v36 = vadd.f32 %v472_v30, %v460_v28  ;;  %v481_v37 = vadd.f32 %v473_v31, %v461_v29  ;;  %v604_v23 = vld [vmem:[%s1117_s12 + $0x18] sm:$0xff]  ;;  %v602_v31 = vld [vmem:[%s1117_s12 + $0x8] sm:$0xff] }
  0x1b   : > { %v458_v43 = vmul.f32 %v871_v34, %v455_v7  ;;  %v459_v44 = vmul.f32 %v872_v35, %v455_v7  ;;  %v470_v47 = vmul.f32 %v887_v38, %v467_v8  ;;  %v471_v48 = vmul.f32 %v888_v39, %v467_v8  ;;  %v605_v35 = vld [vmem:[%s1117_s12 + $0x20] sm:$0xff] }
  0x1c   : > { %v491_v41 = vadd.f32 %v841_v27, %v476_v32  ;;  %v492_v42 = vadd.f32 %v841_v27, %v477_v33  ;;  %v495_v45 = vadd.f32 %v841_v27, %v480_v36  ;;  %v496_v46 = vadd.f32 %v841_v27, %v481_v37 }
  0x1d   : > { %v879_v52 = vunpack.c.l.bf16 %v899_v40  ;;  %v880_v53 = vunpack.c.h.bf16 %v899_v40  ;;  %v478_v56 = vadd.f32 %v470_v47, %v458_v43  ;;  %v479_v57 = vadd.f32 %v471_v48, %v459_v44  ;;  %v608_v43 = vld [vmem:[%s1117_s12 + $0x38] sm:$0xff] }
  0x1e   : > { %v499_v50 = vmax.f32 %v491_v41, 0.0  ;;  %v500_v51 = vmax.f32 %v492_v42, 0.0  ;;  %v503_v54 = vmax.f32 %v495_v45, 0.0  ;;  %v504_v55 = vmax.f32 %v496_v46, 0.0 }
  0x1f   : > { %v895_v59 = vunpack.c.l.bf16 %v902_v49  ;;  %v896_v60 = vunpack.c.h.bf16 %v902_v49  ;;  %v462_v61 = vmul.f32 %v879_v52, %v455_v7  ;;  %v493_v63 = vadd.f32 %v841_v27, %v478_v56 }
  0x20   : > { %v507_v58 = vpack.c.bf16 %v500_v51, %v499_v50  ;;  %v509_v62 = vpack.c.bf16 %v504_v55, %v503_v54  ;;  %v494_v0 = vadd.f32 %v841_v27, %v479_v57  ;;  %v463_v1 = vmul.f32 %v880_v53, %v455_v7  ;;  %v842_v7 = vld [vmem:[%s1172_s5] ss:$0 sm:$0xff]  ;;  %v606_v51 = vld [vmem:[%s1117_s12 + $0x28] sm:$0xff] }
  0x21   : > { %v474_v2 = vmul.f32 %v895_v59, %v467_v8  ;;  %v475_v3 = vmul.f32 %v896_v60, %v467_v8  ;;  %v501_v4 = vmax.f32 %v493_v63, 0.0 }
  0x22   : > { %910 = vmatprep.mubr.msk.bf16.mxu0 %vm519_vm1, %v507_v58  ;;  %914 = vmatprep.mubr.msk.bf16.mxu1 %vm519_vm1, %v509_v62  ;;  %v502_v5 = vmax.f32 %v494_v0, 0.0 }
  0x23   : > { %v482_v6 = vadd.f32 %v474_v2, %v462_v61  ;;  %v483_v9 = vadd.f32 %v475_v3, %v463_v1 }
  0x24   : > { %v508_v10 = vpack.c.bf16 %v502_v5, %v501_v4 }
  0x25   : > { %v497_v11 = vadd.f32 %v841_v27, %v482_v6  ;;  %v498_v12 = vadd.f32 %v841_v27, %v483_v9 }
  0x26   : > { %911 = vmatmul.mubr.msk.bf16.vlgmr.msra.gmra.mxu0 %vm519_vm1, %v508_v10 }
  0x27   : > { %v505_v13 = vmax.f32 %v497_v11, 0.0  ;;  %v506_v14 = vmax.f32 %v498_v12, 0.0 }
  0x29   : > { %v510_v15 = vpack.c.bf16 %v506_v14, %v505_v13 }
  0x2b   : > { %915 = vmatmul.mubr.msk.bf16.vlgmr.msra.gmra.mxu1 %vm519_vm1, %v510_v15 }
  0xe6   : > { %v912_v8 = vpop.f32.mrf.mxu0 }
  0xe7   : > { %v579_v17 = vadd.f32 %v912_v8, %v842_v7 }
  0xe8   : > { %v570_v18 = vpop.f32.mrf.mxu0 }
  0xe9   : > { %v611_v20 = vadd.f32 %v603_v16, %v579_v17  ;;  %v571_v21 = vadd.f32 %v842_v7, %v570_v18 }
  0xea   : > { %v913_v22 = vpop.f32.mrf.mxu0 }
  0xeb   : > { %v619_v24 = vmax.f32 %v611_v20, 0.0  ;;  %v916_v25 = vpop.f32.mrf.mxu1  ;;  %v609_v27 = vadd.f32 %v601_v19, %v571_v21  ;;  %v582_v28 = vadd.f32 %v913_v22, %v842_v7 }
  0xec   : > { %v595_v29 = vadd.f32 %v916_v25, %v842_v7  ;;  %v573_v30 = vpop.f32.mrf.mxu0 }
  0xed   : > { %v859_v32 = vpack.c.bf16 %v619_v24, %v619_v24  ;;  %v617_v33 = vmax.f32 %v609_v27, 0.0  ;;  %v586_v34 = vpop.f32.mrf.mxu1  ;;  %v612_v36 = vadd.f32 %v604_v23, %v582_v28  ;;  %v574_v37 = vadd.f32 %v842_v7, %v573_v30 }
  0xee   : > { %v615_v38 = vadd.f32 %v607_v26, %v595_v29  ;;  %v587_v39 = vadd.f32 %v842_v7, %v586_v34 }
  0xef   : > { %660 = vst.msk [vmem:[%s1130_s17 + $0x8] sm:$0xf] %vm657_vm2, %v859_v32  ;;  %v857_v40 = vpack.c.bf16 %v617_v33, %v617_v33  ;;  %v620_v41 = vmax.f32 %v612_v36, 0.0  ;;  %v917_v42 = vpop.f32.mrf.mxu1  ;;  %v610_v44 = vadd.f32 %v602_v31, %v574_v37 }
  0xf0   : > { %v623_v45 = vmax.f32 %v615_v38, 0.0  ;;  %v613_v46 = vadd.f32 %v605_v35, %v587_v39  ;;  %v598_v47 = vadd.f32 %v917_v42, %v842_v7 }
  0xf1   : > { %658 = vst.msk [vmem:[%s1130_s17] sm:$0xf] %vm657_vm2, %v857_v40  ;;  %v860_v48 = vpack.c.bf16 %v620_v41, %v620_v41  ;;  %v618_v49 = vmax.f32 %v610_v44, 0.0  ;;  %v589_v50 = vpop.f32.mrf.mxu1 }
  0xf2   : > { %v863_v52 = vpack.c.bf16 %v623_v45, %v623_v45  ;;  %v621_v53 = vmax.f32 %v613_v46, 0.0  ;;  %v616_v54 = vadd.f32 %v608_v43, %v598_v47  ;;  %v590_v55 = vadd.f32 %v842_v7, %v589_v50 }
  0xf3   : > { %661 = vst.msk [vmem:[%s1130_s17 + $0xc] sm:$0xf] %vm657_vm2, %v860_v48  ;;  %v858_v56 = vpack.c.bf16 %v618_v49, %v618_v49 }
  0xf4   : > { %664 = vst.msk [vmem:[%s1130_s17 + $0x18] sm:$0xf] %vm657_vm2, %v863_v52  ;;  %v861_v57 = vpack.c.bf16 %v621_v53, %v621_v53  ;;  %v624_v58 = vmax.f32 %v616_v54, 0.0  ;;  %v614_v59 = vadd.f32 %v606_v51, %v590_v55 }
  0xf5   : > { %659 = vst.msk [vmem:[%s1130_s17 + $0x4] sm:$0xf] %vm657_vm2, %v858_v56 }
  0xf6   : > { %662 = vst.msk [vmem:[%s1130_s17 + $0x10] sm:$0xf] %vm657_vm2, %v861_v57  ;;  %v864_v60 = vpack.c.bf16 %v624_v58, %v624_v58  ;;  %v622_v61 = vmax.f32 %v614_v59, 0.0 }
  0xf8   : > { %665 = vst.msk [vmem:[%s1130_s17 + $0x1c] sm:$0xf] %vm657_vm2, %v864_v60  ;;  %v862_v62 = vpack.c.bf16 %v622_v61, %v622_v61 }
  0xfa   : > { %663 = vst.msk [vmem:[%s1130_s17 + $0x14] sm:$0xf] %vm657_vm2, %v862_v62 }
  0xfb PF: > { %s17_s28 = sadd.s32 1, %s1000_s28   ;;  %s1175_s24 = smov %s992_s26 }
  0xfc   : > { %p14_p7 = scmp.ge.s32.totalorder %s17_s28, 10   ;;  %s1176_s25 = smov %s996_s27 }
  0xfd   : > { %s1177_s26 = smov %s1180_s29  ;;  %s1178_s27 = smov %s1184_s30 }
  0xfe   :  { %16 = sbr.rel (!%p14_p7) target bundleno = 3 (0x3), region = 87 }

// kernel: sk_block_forward.3
= control target key start
LH: loop header
LB: loop body
LE: loop exit
PB: predicated region body
PF: predicated region fallthrough
CT: control target
= control target key end

     0   :  { %vm126_vm0 = vcmask 130048   ;;  %vm832_vm1 = vcmask 27648   ;;  %s1737_s1 = inlined_call_operand.vmem [shape: bf16[16,4], index: 1, kind: input, shape index: {}]   ;;  %s1738_s0 = inlined_call_operand.vmem [shape: f32[512,16], index: 0, kind: input, shape index: {}]   ;;  %s1739_s2 = inlined_call_operand.vmem [shape: f32[1,4], index: 2, kind: input, shape index: {}]   ;;  %s1740_s3 = inlined_call_operand.vmem [shape: bf16[512,4], index: 3, kind: output, shape index: {}]  }
   0x1   :  { %v1164_v0 = vld [vmem:[%s1737_s1] sm:$0xff]   ;;  %v16_v2 = vld [vmem:[%s1738_s0 + $0x8] sm:$0xff]  ;;  %v17_v6 = vld [vmem:[%s1738_s0 + $0x10] sm:$0xff] }
   0x2   :  { %v15_v1 = vld [vmem:[%s1738_s0] sm:$0xff]  ;;  %1096 = vmatprep.subr.bf16.mxu0 %v1164_v0  ;;  %1162 = vmatprep.subr.bf16.mxu1 %v1164_v0  ;;  %v48_v5 = vld [vmem:[%s1738_s0 + $0x108] sm:$0xff]  ;;  %v18_v7 = vld [vmem:[%s1738_s0 + $0x18] sm:$0xff] }
   0x3   :  { %v47_v3 = vld [vmem:[%s1738_s0 + $0x100] sm:$0xff]  ;;  %v79_v4 = vpack.c.bf16 %v16_v2, %v15_v1  ;;  %1097 = vmatpush3.bf16.msra.mxu0 %v1164_v0  ;;  %1163 = vmatpush3.bf16.msra.mxu1 %v1164_v0  ;;  %v80_v9 = vpack.c.bf16 %v18_v7, %v17_v6  ;;  %v49_v10 = vld [vmem:[%s1738_s0 + $0x110] sm:$0xff]  ;;  %v50_v11 = vld [vmem:[%s1738_s0 + $0x118] sm:$0xff] }
   0x4   :  { %v95_v8 = vpack.c.bf16 %v48_v5, %v47_v3  ;;  %v19_v12 = vld [vmem:[%s1738_s0 + $0x20] sm:$0xff]  ;;  %v96_v13 = vpack.c.bf16 %v50_v11, %v49_v10  ;;  %v20_v14 = vld [vmem:[%s1738_s0 + $0x28] sm:$0xff]  ;;  %v21_v19 = vld [vmem:[%s1738_s0 + $0x30] sm:$0xff] }
   0x5   :  { %1098 = vmatprep.mubr.msk.bf16.mxu0 %vm126_vm0, %v79_v4  ;;  %v51_v15 = vld [vmem:[%s1738_s0 + $0x120] sm:$0xff]  ;;  %v52_v16 = vld [vmem:[%s1738_s0 + $0x128] sm:$0xff]  ;;  %v81_v17 = vpack.c.bf16 %v20_v14, %v19_v12  ;;  %v22_v20 = vld [vmem:[%s1738_s0 + $0x38] sm:$0xff] }
   0x6   :  { %1130 = vmatprep.mubr.msk.bf16.mxu1 %vm126_vm0, %v95_v8  ;;  %v97_v18 = vpack.c.bf16 %v52_v16, %v51_v15  ;;  %1099 = vmatmul.mubr.msk.bf16.vlgmr.msra.gmra.mxu0 %vm126_vm0, %v80_v9  ;;  %v53_v21 = vld [vmem:[%s1738_s0 + $0x130] sm:$0xff]  ;;  %v54_v22 = vld [vmem:[%s1738_s0 + $0x138] sm:$0xff]  ;;  %v23_v23 = vld [vmem:[%s1738_s0 + $0x40] sm:$0xff]  ;;  %v82_v27 = vpack.c.bf16 %v22_v20, %v21_v19 }
   0x7   :  { %1131 = vmatmul.mubr.msk.bf16.vlgmr.msra.gmra.mxu1 %vm126_vm0, %v96_v13  ;;  %1102 = vmatprep.mubr.msk.bf16.mxu0 %vm126_vm0, %v81_v17  ;;  %v24_v24 = vld [vmem:[%s1738_s0 + $0x48] sm:$0xff]  ;;  %v55_v25 = vld [vmem:[%s1738_s0 + $0x140] sm:$0xff]  ;;  %v98_v28 = vpack.c.bf16 %v54_v22, %v53_v21  ;;  %v25_v31 = vld [vmem:[%s1738_s0 + $0x50] sm:$0xff] }
   0x8   :  { %1134 = vmatprep.mubr.msk.bf16.mxu1 %vm126_vm0, %v97_v18  ;;  %v56_v26 = vld [vmem:[%s1738_s0 + $0x148] sm:$0xff]  ;;  %v83_v29 = vpack.c.bf16 %v24_v24, %v23_v23  ;;  %v26_v32 = vld [vmem:[%s1738_s0 + $0x58] sm:$0xff]  ;;  %v57_v33 = vld [vmem:[%s1738_s0 + $0x150] sm:$0xff] }
   0x9   :  { %v99_v30 = vpack.c.bf16 %v56_v26, %v55_v25  ;;  %v58_v34 = vld [vmem:[%s1738_s0 + $0x158] sm:$0xff]  ;;  %v27_v35 = vld [vmem:[%s1738_s0 + $0x60] sm:$0xff]  ;;  %v28_v36 = vld [vmem:[%s1738_s0 + $0x68] sm:$0xff]  ;;  %v84_v39 = vpack.c.bf16 %v26_v32, %v25_v31 }
   0xa   :  { %v59_v37 = vld [vmem:[%s1738_s0 + $0x160] sm:$0xff]  ;;  %v60_v38 = vld [vmem:[%s1738_s0 + $0x168] sm:$0xff]  ;;  %v100_v40 = vpack.c.bf16 %v58_v34, %v57_v33  ;;  %v85_v41 = vpack.c.bf16 %v28_v36, %v27_v35  ;;  %v29_v43 = vld [vmem:[%s1738_s0 + $0x70] sm:$0xff] }
   0xb   :  { %v101_v42 = vpack.c.bf16 %v60_v38, %v59_v37  ;;  %v30_v44 = vld [vmem:[%s1738_s0 + $0x78] sm:$0xff]  ;;  %v61_v45 = vld [vmem:[%s1738_s0 + $0x170] sm:$0xff]  ;;  %v31_v47 = vld [vmem:[%s1738_s0 + $0x80] sm:$0xff] }
   0xc   :  { %v62_v46 = vld [vmem:[%s1738_s0 + $0x178] sm:$0xff]  ;;  %v32_v48 = vld [vmem:[%s1738_s0 + $0x88] sm:$0xff]  ;;  %v63_v49 = vld [vmem:[%s1738_s0 + $0x180] sm:$0xff]  ;;  %v86_v51 = vpack.c.bf16 %v30_v44, %v29_v43 }
   0xd   :  { %v64_v50 = vld [vmem:[%s1738_s0 + $0x188] sm:$0xff]  ;;  %v102_v52 = vpack.c.bf16 %v62_v46, %v61_v45  ;;  %v87_v53 = vpack.c.bf16 %v32_v48, %v31_v47  ;;  %v33_v55 = vld [vmem:[%s1738_s0 + $0x90] sm:$0xff]  ;;  %v34_v56 = vld [vmem:[%s1738_s0 + $0x98] sm:$0xff] }
   0xe   :  { %1103 = vmatmul.mubr.msk.bf16.gmra.mxu0 %vm126_vm0, %v82_v27  ;;  %v103_v54 = vpack.c.bf16 %v64_v50, %v63_v49  ;;  %v65_v57 = vld [vmem:[%s1738_s0 + $0x190] sm:$0xff]  ;;  %v66_v58 = vld [vmem:[%s1738_s0 + $0x198] sm:$0xff]  ;;  %v35_v59 = vld [vmem:[%s1738_s0 + $0xa0] sm:$0xff]  ;;  %v88_v63 = vpack.c.bf16 %v34_v56, %v33_v55 }
   0xf   :  { %1135 = vmatmul.mubr.msk.bf16.gmra.mxu1 %vm126_vm0, %v98_v28  ;;  %1106 = vmatprep.mubr.msk.bf16.mxu0 %vm126_vm0, %v83_v29  ;;  %v36_v60 = vld [vmem:[%s1738_s0 + $0xa8] sm:$0xff]  ;;  %v67_v61 = vld [vmem:[%s1738_s0 + $0x1a0] sm:$0xff]  ;;  %v104_v0 = vpack.c.bf16 %v66_v58, %v65_v57  ;;  %v37_v3 = vld [vmem:[%s1738_s0 + $0xb0] sm:$0xff] }
  0x10   :  { %1138 = vmatprep.mubr.msk.bf16.mxu1 %vm126_vm0, %v99_v30  ;;  %v68_v62 = vld [vmem:[%s1738_s0 + $0x1a8] sm:$0xff]  ;;  %v89_v1 = vpack.c.bf16 %v36_v60, %v35_v59  ;;  %v38_v4 = vld [vmem:[%s1738_s0 + $0xb8] sm:$0xff]  ;;  %v69_v5 = vld [vmem:[%s1738_s0 + $0x1b0] sm:$0xff] }
  0x11   :  { %v105_v2 = vpack.c.bf16 %v68_v62, %v67_v61  ;;  %v70_v6 = vld [vmem:[%s1738_s0 + $0x1b8] sm:$0xff]  ;;  %v39_v7 = vld [vmem:[%s1738_s0 + $0xc0] sm:$0xff]  ;;  %v40_v8 = vld [vmem:[%s1738_s0 + $0xc8] sm:$0xff]  ;;  %v90_v11 = vpack.c.bf16 %v38_v4, %v37_v3 }
  0x12   :  { %v71_v9 = vld [vmem:[%s1738_s0 + $0x1c0] sm:$0xff]  ;;  %v72_v10 = vld [vmem:[%s1738_s0 + $0x1c8] sm:$0xff]  ;;  %v106_v12 = vpack.c.bf16 %v70_v6, %v69_v5  ;;  %v91_v13 = vpack.c.bf16 %v40_v8, %v39_v7  ;;  %v41_v15 = vld [vmem:[%s1738_s0 + $0xd0] sm:$0xff] }
  0x13   :  { %v107_v14 = vpack.c.bf16 %v72_v10, %v71_v9  ;;  %v42_v16 = vld [vmem:[%s1738_s0 + $0xd8] sm:$0xff]  ;;  %v73_v17 = vld [vmem:[%s1738_s0 + $0x1d0] sm:$0xff]  ;;  %v43_v19 = vld [vmem:[%s1738_s0 + $0xe0] sm:$0xff] }
  0x14   :  { %v74_v18 = vld [vmem:[%s1738_s0 + $0x1d8] sm:$0xff]  ;;  %v44_v20 = vld [vmem:[%s1738_s0 + $0xe8] sm:$0xff]  ;;  %v75_v21 = vld [vmem:[%s1738_s0 + $0x1e0] sm:$0xff]  ;;  %v92_v23 = vpack.c.bf16 %v42_v16, %v41_v15 }
  0x15   :  { %v76_v22 = vld [vmem:[%s1738_s0 + $0x1e8] sm:$0xff]  ;;  %v108_v24 = vpack.c.bf16 %v74_v18, %v73_v17  ;;  %v93_v25 = vpack.c.bf16 %v44_v20, %v43_v19  ;;  %v45_v27 = vld [vmem:[%s1738_s0 + $0xf0] sm:$0xff]  ;;  %v46_v28 = vld [vmem:[%s1738_s0 + $0xf8] sm:$0xff] }
  0x16   :  { %1107 = vmatmul.mubr.msk.bf16.gmra.mxu0 %vm126_vm0, %v84_v39  ;;  %v109_v26 = vpack.c.bf16 %v76_v22, %v75_v21  ;;  %v77_v29 = vld [vmem:[%s1738_s0 + $0x1f0] sm:$0xff]  ;;  %v78_v30 = vld [vmem:[%s1738_s0 + $0x1f8] sm:$0xff]  ;;  %v94_v31 = vpack.c.bf16 %v46_v28, %v45_v27  ;;  %v1415_v33 = vld [vmem:[%s1739_s2] ss:$0 sm:$0xff] }
  0x17   :  { %1139 = vmatmul.mubr.msk.bf16.gmra.mxu1 %vm126_vm0, %v100_v40  ;;  %1110 = vmatprep.mubr.msk.bf16.mxu0 %vm126_vm0, %v85_v41  ;;  %v110_v32 = vpack.c.bf16 %v78_v30, %v77_v29 }
  0x18   :  { %1142 = vmatprep.mubr.msk.bf16.mxu1 %vm126_vm0, %v101_v42 }
  0x1e   :  { %1111 = vmatmul.mubr.msk.bf16.gmra.mxu0 %vm126_vm0, %v86_v51 }
  0x1f   :  { %1143 = vmatmul.mubr.msk.bf16.gmra.mxu1 %vm126_vm0, %v102_v52  ;;  %1114 = vmatprep.mubr.msk.bf16.mxu0 %vm126_vm0, %v87_v53 }
  0x20   :  { %1146 = vmatprep.mubr.msk.bf16.mxu1 %vm126_vm0, %v103_v54 }
  0x26   :  { %1115 = vmatmul.mubr.msk.bf16.gmra.mxu0 %vm126_vm0, %v88_v63 }
  0x27   :  { %1147 = vmatmul.mubr.msk.bf16.gmra.mxu1 %vm126_vm0, %v104_v0  ;;  %1118 = vmatprep.mubr.msk.bf16.mxu0 %vm126_vm0, %v89_v1 }
  0x28   :  { %1150 = vmatprep.mubr.msk.bf16.mxu1 %vm126_vm0, %v105_v2 }
  0x2e   :  { %1119 = vmatmul.mubr.msk.bf16.gmra.mxu0 %vm126_vm0, %v90_v11 }
  0x2f   :  { %1151 = vmatmul.mubr.msk.bf16.gmra.mxu1 %vm126_vm0, %v106_v12  ;;  %1122 = vmatprep.mubr.msk.bf16.mxu0 %vm126_vm0, %v91_v13 }
  0x30   :  { %1154 = vmatprep.mubr.msk.bf16.mxu1 %vm126_vm0, %v107_v14 }
  0x36   :  { %1123 = vmatmul.mubr.msk.bf16.gmra.mxu0 %vm126_vm0, %v92_v23 }
  0x37   :  { %1155 = vmatmul.mubr.msk.bf16.gmra.mxu1 %vm126_vm0, %v108_v24  ;;  %1126 = vmatprep.mubr.msk.bf16.mxu0 %vm126_vm0, %v93_v25 }
  0x38   :  { %1158 = vmatprep.mubr.msk.bf16.mxu1 %vm126_vm0, %v109_v26 }
  0x3e   :  { %1127 = vmatmul.mubr.msk.bf16.gmra.mxu0 %vm126_vm0, %v94_v31 }
  0x3f   :  { %1159 = vmatmul.mubr.msk.bf16.gmra.mxu1 %vm126_vm0, %v110_v32 }
  0xc6   :  { %v1100_v34 = vpop.f32.mrf.mxu0 }
  0xc7   :  { %v1132_v35 = vpop.f32.mrf.mxu1  ;;  %v266_v36 = vadd.f32 %v1100_v34, %v1415_v33 }
  0xc8   :  { %v394_v37 = vadd.f32 %v1132_v35, %v1415_v33  ;;  %v257_v38 = vpop.f32.mrf.mxu0 }
  0xc9   :  { %v385_v39 = vpop.f32.mrf.mxu1  ;;  %v514_v40 = vmax.f32 %v266_v36, 0.0  ;;  %v258_v42 = vadd.f32 %v1415_v33, %v257_v38 }
  0xca   :  { %v546_v41 = vmax.f32 %v394_v37, 0.0  ;;  %v386_v43 = vadd.f32 %v1415_v33, %v385_v39  ;;  %v1101_v44 = vpop.f32.mrf.mxu0 }
  0xcb   :  { %v1133_v45 = vpop.f32.mrf.mxu1  ;;  %v1001_v46 = vpack.c.bf16 %v514_v40, %v514_v40  ;;  %v512_v48 = vmax.f32 %v258_v42, 0.0  ;;  %v269_v50 = vadd.f32 %v1101_v44, %v1415_v33 }
  0xcc   :  { %v1033_v47 = vpack.c.bf16 %v546_v41, %v546_v41  ;;  %v544_v49 = vmax.f32 %v386_v43, 0.0  ;;  %v397_v51 = vadd.f32 %v1133_v45, %v1415_v33  ;;  %v260_v52 = vpop.f32.mrf.mxu0 }
  0xcd   :  { %v388_v53 = vpop.f32.mrf.mxu1  ;;  %835 = vst.msk [vmem:[%s1740_s3 + $0x8] sm:$0xf] %vm832_vm1, %v1001_v46  ;;  %v999_v54 = vpack.c.bf16 %v512_v48, %v512_v48  ;;  %v261_v56 = vadd.f32 %v1415_v33, %v260_v52  ;;  %v515_v58 = vmax.f32 %v269_v50, 0.0 }
  0xce   :  { %867 = vst.msk [vmem:[%s1740_s3 + $0x88] sm:$0xf] %vm832_vm1, %v1033_v47  ;;  %v1031_v55 = vpack.c.bf16 %v544_v49, %v544_v49  ;;  %v389_v57 = vadd.f32 %v1415_v33, %v388_v53  ;;  %v547_v59 = vmax.f32 %v397_v51, 0.0  ;;  %v1104_v60 = vpop.f32.mrf.mxu0 }
  0xcf   :  { %v1136_v61 = vpop.f32.mrf.mxu1  ;;  %833 = vst.msk [vmem:[%s1740_s3] sm:$0xf] %vm832_vm1, %v999_v54  ;;  %v513_v62 = vmax.f32 %v261_v56, 0.0  ;;  %v282_v0 = vadd.f32 %v1104_v60, %v1415_v33  ;;  %v1002_v2 = vpack.c.bf16 %v515_v58, %v515_v58 }
  0xd0   :  { %865 = vst.msk [vmem:[%s1740_s3 + $0x80] sm:$0xf] %vm832_vm1, %v1031_v55  ;;  %v545_v63 = vmax.f32 %v389_v57, 0.0  ;;  %v410_v1 = vadd.f32 %v1136_v61, %v1415_v33  ;;  %v1034_v3 = vpack.c.bf16 %v547_v59, %v547_v59  ;;  %v273_v4 = vpop.f32.mrf.mxu0 }
  0xd1   :  { %v401_v5 = vpop.f32.mrf.mxu1  ;;  %v1000_v6 = vpack.c.bf16 %v513_v62, %v513_v62  ;;  %v518_v8 = vmax.f32 %v282_v0, 0.0  ;;  %836 = vst.msk [vmem:[%s1740_s3 + $0xc] sm:$0xf] %vm832_vm1, %v1002_v2  ;;  %v274_v10 = vadd.f32 %v1415_v33, %v273_v4 }
  0xd2   :  { %v1032_v7 = vpack.c.bf16 %v545_v63, %v545_v63  ;;  %v550_v9 = vmax.f32 %v410_v1, 0.0  ;;  %868 = vst.msk [vmem:[%s1740_s3 + $0x8c] sm:$0xf] %vm832_vm1, %v1034_v3  ;;  %v402_v11 = vadd.f32 %v1415_v33, %v401_v5  ;;  %v1105_v12 = vpop.f32.mrf.mxu0 }
  0xd3   :  { %v1137_v13 = vpop.f32.mrf.mxu1  ;;  %834 = vst.msk [vmem:[%s1740_s3 + $0x4] sm:$0xf] %vm832_vm1, %v1000_v6  ;;  %v1005_v14 = vpack.c.bf16 %v518_v8, %v518_v8  ;;  %v285_v16 = vadd.f32 %v1105_v12, %v1415_v33  ;;  %v516_v18 = vmax.f32 %v274_v10, 0.0 }
  0xd4   :  { %866 = vst.msk [vmem:[%s1740_s3 + $0x84] sm:$0xf] %vm832_vm1, %v1032_v7  ;;  %v1037_v15 = vpack.c.bf16 %v550_v9, %v550_v9  ;;  %v413_v17 = vadd.f32 %v1137_v13, %v1415_v33  ;;  %v548_v19 = vmax.f32 %v402_v11, 0.0  ;;  %v276_v20 = vpop.f32.mrf.mxu0 }
  0xd5   :  { %v404_v21 = vpop.f32.mrf.mxu1  ;;  %839 = vst.msk [vmem:[%s1740_s3 + $0x18] sm:$0xf] %vm832_vm1, %v1005_v14  ;;  %v519_v22 = vmax.f32 %v285_v16, 0.0  ;;  %v277_v24 = vadd.f32 %v1415_v33, %v276_v20  ;;  %v1003_v26 = vpack.c.bf16 %v516_v18, %v516_v18 }
  0xd6   :  { %871 = vst.msk [vmem:[%s1740_s3 + $0x98] sm:$0xf] %vm832_vm1, %v1037_v15  ;;  %v551_v23 = vmax.f32 %v413_v17, 0.0  ;;  %v405_v25 = vadd.f32 %v1415_v33, %v404_v21  ;;  %v1035_v27 = vpack.c.bf16 %v548_v19, %v548_v19  ;;  %v1108_v28 = vpop.f32.mrf.mxu0 }
  0xd7   :  { %v1140_v29 = vpop.f32.mrf.mxu1  ;;  %v1006_v30 = vpack.c.bf16 %v519_v22, %v519_v22  ;;  %v517_v32 = vmax.f32 %v277_v24, 0.0  ;;  %837 = vst.msk [vmem:[%s1740_s3 + $0x10] sm:$0xf] %vm832_vm1, %v1003_v26  ;;  %v298_v35 = vadd.f32 %v1108_v28, %v1415_v33 }
  0xd8   :  { %v1038_v31 = vpack.c.bf16 %v551_v23, %v551_v23  ;;  %v549_v34 = vmax.f32 %v405_v25, 0.0  ;;  %869 = vst.msk [vmem:[%s1740_s3 + $0x90] sm:$0xf] %vm832_vm1, %v1035_v27  ;;  %v426_v36 = vadd.f32 %v1140_v29, %v1415_v33  ;;  %v289_v37 = vpop.f32.mrf.mxu0 }
  0xd9   :  { %v417_v38 = vpop.f32.mrf.mxu1  ;;  %840 = vst.msk [vmem:[%s1740_s3 + $0x1c] sm:$0xf] %vm832_vm1, %v1006_v30  ;;  %v1004_v39 = vpack.c.bf16 %v517_v32, %v517_v32  ;;  %v290_v41 = vadd.f32 %v1415_v33, %v289_v37  ;;  %v522_v43 = vmax.f32 %v298_v35, 0.0 }
  0xda   :  { %872 = vst.msk [vmem:[%s1740_s3 + $0x9c] sm:$0xf] %vm832_vm1, %v1038_v31  ;;  %v1036_v40 = vpack.c.bf16 %v549_v34, %v549_v34  ;;  %v418_v42 = vadd.f32 %v1415_v33, %v417_v38  ;;  %v554_v44 = vmax.f32 %v426_v36, 0.0  ;;  %v1109_v45 = vpop.f32.mrf.mxu0 }
  0xdb   :  { %v1141_v46 = vpop.f32.mrf.mxu1  ;;  %838 = vst.msk [vmem:[%s1740_s3 + $0x14] sm:$0xf] %vm832_vm1, %v1004_v39  ;;  %v520_v47 = vmax.f32 %v290_v41, 0.0  ;;  %v301_v49 = vadd.f32 %v1109_v45, %v1415_v33  ;;  %v1009_v51 = vpack.c.bf16 %v522_v43, %v522_v43 }
  0xdc   :  { %870 = vst.msk [vmem:[%s1740_s3 + $0x94] sm:$0xf] %vm832_vm1, %v1036_v40  ;;  %v552_v48 = vmax.f32 %v418_v42, 0.0  ;;  %v429_v50 = vadd.f32 %v1141_v46, %v1415_v33  ;;  %v1041_v52 = vpack.c.bf16 %v554_v44, %v554_v44  ;;  %v292_v53 = vpop.f32.mrf.mxu0 }
  0xdd   :  { %v420_v54 = vpop.f32.mrf.mxu1  ;;  %v1007_v55 = vpack.c.bf16 %v520_v47, %v520_v47  ;;  %v523_v57 = vmax.f32 %v301_v49, 0.0  ;;  %843 = vst.msk [vmem:[%s1740_s3 + $0x28] sm:$0xf] %vm832_vm1, %v1009_v51  ;;  %v293_v59 = vadd.f32 %v1415_v33, %v292_v53 }
  0xde   :  { %v1039_v56 = vpack.c.bf16 %v552_v48, %v552_v48  ;;  %v555_v58 = vmax.f32 %v429_v50, 0.0  ;;  %875 = vst.msk [vmem:[%s1740_s3 + $0xa8] sm:$0xf] %vm832_vm1, %v1041_v52  ;;  %v421_v60 = vadd.f32 %v1415_v33, %v420_v54  ;;  %v1112_v61 = vpop.f32.mrf.mxu0 }
  0xdf   :  { %v1144_v62 = vpop.f32.mrf.mxu1  ;;  %841 = vst.msk [vmem:[%s1740_s3 + $0x20] sm:$0xf] %vm832_vm1, %v1007_v55  ;;  %v1010_v63 = vpack.c.bf16 %v523_v57, %v523_v57  ;;  %v314_v1 = vadd.f32 %v1112_v61, %v1415_v33  ;;  %v521_v3 = vmax.f32 %v293_v59, 0.0 }
  0xe0   :  { %873 = vst.msk [vmem:[%s1740_s3 + $0xa0] sm:$0xf] %vm832_vm1, %v1039_v56  ;;  %v1042_v0 = vpack.c.bf16 %v555_v58, %v555_v58  ;;  %v442_v2 = vadd.f32 %v1144_v62, %v1415_v33  ;;  %v553_v4 = vmax.f32 %v421_v60, 0.0  ;;  %v305_v5 = vpop.f32.mrf.mxu0 }
  0xe1   :  { %v433_v6 = vpop.f32.mrf.mxu1  ;;  %844 = vst.msk [vmem:[%s1740_s3 + $0x2c] sm:$0xf] %vm832_vm1, %v1010_v63  ;;  %v526_v7 = vmax.f32 %v314_v1, 0.0  ;;  %v306_v9 = vadd.f32 %v1415_v33, %v305_v5  ;;  %v1008_v11 = vpack.c.bf16 %v521_v3, %v521_v3 }
  0xe2   :  { %876 = vst.msk [vmem:[%s1740_s3 + $0xac] sm:$0xf] %vm832_vm1, %v1042_v0  ;;  %v558_v8 = vmax.f32 %v442_v2, 0.0  ;;  %v434_v10 = vadd.f32 %v1415_v33, %v433_v6  ;;  %v1040_v12 = vpack.c.bf16 %v553_v4, %v553_v4  ;;  %v1113_v13 = vpop.f32.mrf.mxu0 }
  0xe3   :  { %v1145_v14 = vpop.f32.mrf.mxu1  ;;  %v1013_v15 = vpack.c.bf16 %v526_v7, %v526_v7  ;;  %v524_v17 = vmax.f32 %v306_v9, 0.0  ;;  %842 = vst.msk [vmem:[%s1740_s3 + $0x24] sm:$0xf] %vm832_vm1, %v1008_v11  ;;  %v317_v19 = vadd.f32 %v1113_v13, %v1415_v33 }
  0xe4   :  { %v1045_v16 = vpack.c.bf16 %v558_v8, %v558_v8  ;;  %v556_v18 = vmax.f32 %v434_v10, 0.0  ;;  %874 = vst.msk [vmem:[%s1740_s3 + $0xa4] sm:$0xf] %vm832_vm1, %v1040_v12  ;;  %v445_v20 = vadd.f32 %v1145_v14, %v1415_v33  ;;  %v308_v21 = vpop.f32.mrf.mxu0 }
  0xe5   :  { %v436_v22 = vpop.f32.mrf.mxu1  ;;  %847 = vst.msk [vmem:[%s1740_s3 + $0x38] sm:$0xf] %vm832_vm1, %v1013_v15  ;;  %v1011_v23 = vpack.c.bf16 %v524_v17, %v524_v17  ;;  %v309_v25 = vadd.f32 %v1415_v33, %v308_v21  ;;  %v527_v27 = vmax.f32 %v317_v19, 0.0 }
  0xe6   :  { %879 = vst.msk [vmem:[%s1740_s3 + $0xb8] sm:$0xf] %vm832_vm1, %v1045_v16  ;;  %v1043_v24 = vpack.c.bf16 %v556_v18, %v556_v18  ;;  %v437_v26 = vadd.f32 %v1415_v33, %v436_v22  ;;  %v559_v28 = vmax.f32 %v445_v20, 0.0  ;;  %v1116_v29 = vpop.f32.mrf.mxu0 }
  0xe7   :  { %v1148_v30 = vpop.f32.mrf.mxu1  ;;  %845 = vst.msk [vmem:[%s1740_s3 + $0x30] sm:$0xf] %vm832_vm1, %v1011_v23  ;;  %v525_v31 = vmax.f32 %v309_v25, 0.0  ;;  %v330_v34 = vadd.f32 %v1116_v29, %v1415_v33  ;;  %v1014_v36 = vpack.c.bf16 %v527_v27, %v527_v27 }
  0xe8   :  { %877 = vst.msk [vmem:[%s1740_s3 + $0xb0] sm:$0xf] %vm832_vm1, %v1043_v24  ;;  %v557_v32 = vmax.f32 %v437_v26, 0.0  ;;  %v458_v35 = vadd.f32 %v1148_v30, %v1415_v33  ;;  %v1046_v37 = vpack.c.bf16 %v559_v28, %v559_v28  ;;  %v321_v38 = vpop.f32.mrf.mxu0 }
  0xe9   :  { %v449_v39 = vpop.f32.mrf.mxu1  ;;  %v1012_v40 = vpack.c.bf16 %v525_v31, %v525_v31  ;;  %v530_v42 = vmax.f32 %v330_v34, 0.0  ;;  %848 = vst.msk [vmem:[%s1740_s3 + $0x3c] sm:$0xf] %vm832_vm1, %v1014_v36  ;;  %v322_v44 = vadd.f32 %v1415_v33, %v321_v38 }
  0xea   :  { %v1044_v41 = vpack.c.bf16 %v557_v32, %v557_v32  ;;  %v562_v43 = vmax.f32 %v458_v35, 0.0  ;;  %880 = vst.msk [vmem:[%s1740_s3 + $0xbc] sm:$0xf] %vm832_vm1, %v1046_v37  ;;  %v450_v45 = vadd.f32 %v1415_v33, %v449_v39  ;;  %v1117_v46 = vpop.f32.mrf.mxu0 }
  0xeb   :  { %v1149_v47 = vpop.f32.mrf.mxu1  ;;  %846 = vst.msk [vmem:[%s1740_s3 + $0x34] sm:$0xf] %vm832_vm1, %v1012_v40  ;;  %v1017_v48 = vpack.c.bf16 %v530_v42, %v530_v42  ;;  %v333_v50 = vadd.f32 %v1117_v46, %v1415_v33  ;;  %v528_v52 = vmax.f32 %v322_v44, 0.0 }
  0xec   :  { %878 = vst.msk [vmem:[%s1740_s3 + $0xb4] sm:$0xf] %vm832_vm1, %v1044_v41  ;;  %v1049_v49 = vpack.c.bf16 %v562_v43, %v562_v43  ;;  %v461_v51 = vadd.f32 %v1149_v47, %v1415_v33  ;;  %v560_v53 = vmax.f32 %v450_v45, 0.0  ;;  %v324_v54 = vpop.f32.mrf.mxu0 }
  0xed   :  { %v452_v55 = vpop.f32.mrf.mxu1  ;;  %851 = vst.msk [vmem:[%s1740_s3 + $0x48] sm:$0xf] %vm832_vm1, %v1017_v48  ;;  %v531_v56 = vmax.f32 %v333_v50, 0.0  ;;  %v325_v58 = vadd.f32 %v1415_v33, %v324_v54  ;;  %v1015_v60 = vpack.c.bf16 %v528_v52, %v528_v52 }
  0xee   :  { %883 = vst.msk [vmem:[%s1740_s3 + $0xc8] sm:$0xf] %vm832_vm1, %v1049_v49  ;;  %v563_v57 = vmax.f32 %v461_v51, 0.0  ;;  %v453_v59 = vadd.f32 %v1415_v33, %v452_v55  ;;  %v1047_v61 = vpack.c.bf16 %v560_v53, %v560_v53  ;;  %v1120_v62 = vpop.f32.mrf.mxu0 }
  0xef   :  { %v1152_v63 = vpop.f32.mrf.mxu1  ;;  %v1018_v0 = vpack.c.bf16 %v531_v56, %v531_v56  ;;  %v529_v2 = vmax.f32 %v325_v58, 0.0  ;;  %849 = vst.msk [vmem:[%s1740_s3 + $0x40] sm:$0xf] %vm832_vm1, %v1015_v60  ;;  %v346_v4 = vadd.f32 %v1120_v62, %v1415_v33 }
  0xf0   :  { %v1050_v1 = vpack.c.bf16 %v563_v57, %v563_v57  ;;  %v561_v3 = vmax.f32 %v453_v59, 0.0  ;;  %881 = vst.msk [vmem:[%s1740_s3 + $0xc0] sm:$0xf] %vm832_vm1, %v1047_v61  ;;  %v474_v5 = vadd.f32 %v1152_v63, %v1415_v33  ;;  %v337_v6 = vpop.f32.mrf.mxu0 }
  0xf1   :  { %v465_v7 = vpop.f32.mrf.mxu1  ;;  %852 = vst.msk [vmem:[%s1740_s3 + $0x4c] sm:$0xf] %vm832_vm1, %v1018_v0  ;;  %v1016_v8 = vpack.c.bf16 %v529_v2, %v529_v2  ;;  %v338_v10 = vadd.f32 %v1415_v33, %v337_v6  ;;  %v534_v12 = vmax.f32 %v346_v4, 0.0 }
  0xf2   :  { %884 = vst.msk [vmem:[%s1740_s3 + $0xcc] sm:$0xf] %vm832_vm1, %v1050_v1  ;;  %v1048_v9 = vpack.c.bf16 %v561_v3, %v561_v3  ;;  %v466_v11 = vadd.f32 %v1415_v33, %v465_v7  ;;  %v566_v13 = vmax.f32 %v474_v5, 0.0  ;;  %v1121_v14 = vpop.f32.mrf.mxu0 }
  0xf3   :  { %v1153_v15 = vpop.f32.mrf.mxu1  ;;  %850 = vst.msk [vmem:[%s1740_s3 + $0x44] sm:$0xf] %vm832_vm1, %v1016_v8  ;;  %v532_v16 = vmax.f32 %v338_v10, 0.0  ;;  %v349_v18 = vadd.f32 %v1121_v14, %v1415_v33  ;;  %v1021_v20 = vpack.c.bf16 %v534_v12, %v534_v12 }
  0xf4   :  { %882 = vst.msk [vmem:[%s1740_s3 + $0xc4] sm:$0xf] %vm832_vm1, %v1048_v9  ;;  %v564_v17 = vmax.f32 %v466_v11, 0.0  ;;  %v477_v19 = vadd.f32 %v1153_v15, %v1415_v33  ;;  %v1053_v21 = vpack.c.bf16 %v566_v13, %v566_v13  ;;  %v340_v22 = vpop.f32.mrf.mxu0 }
  0xf5   :  { %v468_v23 = vpop.f32.mrf.mxu1  ;;  %v1019_v24 = vpack.c.bf16 %v532_v16, %v532_v16  ;;  %v535_v26 = vmax.f32 %v349_v18, 0.0  ;;  %855 = vst.msk [vmem:[%s1740_s3 + $0x58] sm:$0xf] %vm832_vm1, %v1021_v20  ;;  %v341_v28 = vadd.f32 %v1415_v33, %v340_v22 }
  0xf6   :  { %v1051_v25 = vpack.c.bf16 %v564_v17, %v564_v17  ;;  %v567_v27 = vmax.f32 %v477_v19, 0.0  ;;  %887 = vst.msk [vmem:[%s1740_s3 + $0xd8] sm:$0xf] %vm832_vm1, %v1053_v21  ;;  %v469_v29 = vadd.f32 %v1415_v33, %v468_v23  ;;  %v1124_v30 = vpop.f32.mrf.mxu0 }
  0xf7   :  { %v1156_v31 = vpop.f32.mrf.mxu1  ;;  %853 = vst.msk [vmem:[%s1740_s3 + $0x50] sm:$0xf] %vm832_vm1, %v1019_v24  ;;  %v1022_v32 = vpack.c.bf16 %v535_v26, %v535_v26  ;;  %v362_v35 = vadd.f32 %v1124_v30, %v1415_v33  ;;  %v533_v37 = vmax.f32 %v341_v28, 0.0 }
  0xf8   :  { %885 = vst.msk [vmem:[%s1740_s3 + $0xd0] sm:$0xf] %vm832_vm1, %v1051_v25  ;;  %v1054_v34 = vpack.c.bf16 %v567_v27, %v567_v27  ;;  %v490_v36 = vadd.f32 %v1156_v31, %v1415_v33  ;;  %v565_v38 = vmax.f32 %v469_v29, 0.0  ;;  %v353_v39 = vpop.f32.mrf.mxu0 }
  0xf9   :  { %v481_v40 = vpop.f32.mrf.mxu1  ;;  %856 = vst.msk [vmem:[%s1740_s3 + $0x5c] sm:$0xf] %vm832_vm1, %v1022_v32  ;;  %v538_v41 = vmax.f32 %v362_v35, 0.0  ;;  %v354_v43 = vadd.f32 %v1415_v33, %v353_v39  ;;  %v1020_v45 = vpack.c.bf16 %v533_v37, %v533_v37 }
  0xfa   :  { %888 = vst.msk [vmem:[%s1740_s3 + $0xdc] sm:$0xf] %vm832_vm1, %v1054_v34  ;;  %v570_v42 = vmax.f32 %v490_v36, 0.0  ;;  %v482_v44 = vadd.f32 %v1415_v33, %v481_v40  ;;  %v1052_v46 = vpack.c.bf16 %v565_v38, %v565_v38  ;;  %v1125_v47 = vpop.f32.mrf.mxu0 }
  0xfb   :  { %v1157_v48 = vpop.f32.mrf.mxu1  ;;  %v1025_v49 = vpack.c.bf16 %v538_v41, %v538_v41  ;;  %v536_v51 = vmax.f32 %v354_v43, 0.0  ;;  %854 = vst.msk [vmem:[%s1740_s3 + $0x54] sm:$0xf] %vm832_vm1, %v1020_v45  ;;  %v365_v53 = vadd.f32 %v1125_v47, %v1415_v33 }
  0xfc   :  { %v1057_v50 = vpack.c.bf16 %v570_v42, %v570_v42  ;;  %v568_v52 = vmax.f32 %v482_v44, 0.0  ;;  %886 = vst.msk [vmem:[%s1740_s3 + $0xd4] sm:$0xf] %vm832_vm1, %v1052_v46  ;;  %v493_v54 = vadd.f32 %v1157_v48, %v1415_v33  ;;  %v356_v55 = vpop.f32.mrf.mxu0 }
  0xfd   :  { %v484_v56 = vpop.f32.mrf.mxu1  ;;  %859 = vst.msk [vmem:[%s1740_s3 + $0x68] sm:$0xf] %vm832_vm1, %v1025_v49  ;;  %v1023_v57 = vpack.c.bf16 %v536_v51, %v536_v51  ;;  %v357_v59 = vadd.f32 %v1415_v33, %v356_v55  ;;  %v539_v61 = vmax.f32 %v365_v53, 0.0 }
  0xfe   :  { %891 = vst.msk [vmem:[%s1740_s3 + $0xe8] sm:$0xf] %vm832_vm1, %v1057_v50  ;;  %v1055_v58 = vpack.c.bf16 %v568_v52, %v568_v52  ;;  %v485_v60 = vadd.f32 %v1415_v33, %v484_v56  ;;  %v571_v62 = vmax.f32 %v493_v54, 0.0  ;;  %v1128_v63 = vpop.f32.mrf.mxu0 }
  0xff   :  { %v1160_v0 = vpop.f32.mrf.mxu1  ;;  %857 = vst.msk [vmem:[%s1740_s3 + $0x60] sm:$0xf] %vm832_vm1, %v1023_v57  ;;  %v537_v1 = vmax.f32 %v357_v59, 0.0  ;;  %v378_v3 = vadd.f32 %v1128_v63, %v1415_v33  ;;  %v1026_v5 = vpack.c.bf16 %v539_v61, %v539_v61 }
 0x100   :  { %889 = vst.msk [vmem:[%s1740_s3 + $0xe0] sm:$0xf] %vm832_vm1, %v1055_v58  ;;  %v569_v2 = vmax.f32 %v485_v60, 0.0  ;;  %v506_v4 = vadd.f32 %v1160_v0, %v1415_v33  ;;  %v1058_v6 = vpack.c.bf16 %v571_v62, %v571_v62  ;;  %v369_v7 = vpop.f32.mrf.mxu0 }
 0x101   :  { %v497_v8 = vpop.f32.mrf.mxu1  ;;  %v1024_v9 = vpack.c.bf16 %v537_v1, %v537_v1  ;;  %v542_v11 = vmax.f32 %v378_v3, 0.0  ;;  %860 = vst.msk [vmem:[%s1740_s3 + $0x6c] sm:$0xf] %vm832_vm1, %v1026_v5  ;;  %v370_v13 = vadd.f32 %v1415_v33, %v369_v7 }
 0x102   :  { %v1056_v10 = vpack.c.bf16 %v569_v2, %v569_v2  ;;  %v574_v12 = vmax.f32 %v506_v4, 0.0  ;;  %892 = vst.msk [vmem:[%s1740_s3 + $0xec] sm:$0xf] %vm832_vm1, %v1058_v6  ;;  %v498_v14 = vadd.f32 %v1415_v33, %v497_v8  ;;  %v1129_v15 = vpop.f32.mrf.mxu0 }
 0x103   :  { %v1161_v16 = vpop.f32.mrf.mxu1  ;;  %858 = vst.msk [vmem:[%s1740_s3 + $0x64] sm:$0xf] %vm832_vm1, %v1024_v9  ;;  %v1029_v17 = vpack.c.bf16 %v542_v11, %v542_v11  ;;  %v381_v19 = vadd.f32 %v1129_v15, %v1415_v33  ;;  %v540_v21 = vmax.f32 %v370_v13, 0.0 }
 0x104   :  { %890 = vst.msk [vmem:[%s1740_s3 + $0xe4] sm:$0xf] %vm832_vm1, %v1056_v10  ;;  %v1061_v18 = vpack.c.bf16 %v574_v12, %v574_v12  ;;  %v509_v20 = vadd.f32 %v1161_v16, %v1415_v33  ;;  %v572_v22 = vmax.f32 %v498_v14, 0.0  ;;  %v372_v23 = vpop.f32.mrf.mxu0 }
 0x105   :  { %v500_v24 = vpop.f32.mrf.mxu1  ;;  %863 = vst.msk [vmem:[%s1740_s3 + $0x78] sm:$0xf] %vm832_vm1, %v1029_v17  ;;  %v543_v25 = vmax.f32 %v381_v19, 0.0  ;;  %v373_v27 = vadd.f32 %v1415_v33, %v372_v23  ;;  %v1027_v29 = vpack.c.bf16 %v540_v21, %v540_v21 }
 0x106   :  { %895 = vst.msk [vmem:[%s1740_s3 + $0xf8] sm:$0xf] %vm832_vm1, %v1061_v18  ;;  %v575_v26 = vmax.f32 %v509_v20, 0.0  ;;  %v501_v28 = vadd.f32 %v1415_v33, %v500_v24  ;;  %v1059_v30 = vpack.c.bf16 %v572_v22, %v572_v22 }
 0x107   :  { %v1030_v31 = vpack.c.bf16 %v543_v25, %v543_v25  ;;  %v541_v34 = vmax.f32 %v373_v27, 0.0  ;;  %861 = vst.msk [vmem:[%s1740_s3 + $0x70] sm:$0xf] %vm832_vm1, %v1027_v29 }
 0x108   :  { %v1062_v32 = vpack.c.bf16 %v575_v26, %v575_v26  ;;  %v573_v35 = vmax.f32 %v501_v28, 0.0  ;;  %893 = vst.msk [vmem:[%s1740_s3 + $0xf0] sm:$0xf] %vm832_vm1, %v1059_v30 }
 0x109   :  { %864 = vst.msk [vmem:[%s1740_s3 + $0x7c] sm:$0xf] %vm832_vm1, %v1030_v31  ;;  %v1028_v33 = vpack.c.bf16 %v541_v34, %v541_v34 }
 0x10a   :  { %896 = vst.msk [vmem:[%s1740_s3 + $0xfc] sm:$0xf] %vm832_vm1, %v1062_v32  ;;  %v1060_v36 = vpack.c.bf16 %v573_v35, %v573_v35 }
 0x10b   :  { %862 = vst.msk [vmem:[%s1740_s3 + $0x74] sm:$0xf] %vm832_vm1, %v1028_v33 }
 0x10c   :  { %894 = vst.msk [vmem:[%s1740_s3 + $0xf4] sm:$0xf] %vm832_vm1, %v1060_v36 }

// kernel: sk_block_forward.4
= control target key start
LH: loop header
LB: loop body
LE: loop exit
PB: predicated region body
PF: predicated region fallthrough
CT: control target
= control target key end

     0   :  { %s4906_s13 = smov 0   ;;  %s4908_s14 = smov 0   ;;  %s6177_s0 = inlined_call_operand.vmem [shape: bf16[2,16,16,4], index: 0, kind: input, shape index: {}]   ;;  %s6178_s1 = inlined_call_operand.vmem [shape: bf16[18,4,4], index: 1, kind: input, shape index: {}]   ;;  %s6179_s2 = inlined_call_operand.vmem [shape: f32[2,1,4], index: 2, kind: input, shape index: {}]   ;;  %s6180_s3 = inlined_call_operand.vmem [shape: bf16[4,32], index: 3, kind: input, shape index: {}]   ;;  %s6181_s4 = inlined_call_operand.vmem [shape: f32[1,32], index: 4, kind: input, shape index: {}]   ;;  %s6182_s5 = inlined_call_operand.vmem [shape: bf16[2,32,4], index: 5, kind: input, shape index: {}]   ;;  %s6183_s6 = inlined_call_operand.vmem [shape: f32[2,1,4], index: 6, kind: input, shape index: {}]   ;;  %s6184_s7 = inlined_call_operand.vmem [shape: f32[1,4], index: 7, kind: input, shape index: {}]   ;;  %s6185_s8 = inlined_call_operand.vmem [shape: bf16[2,16,16,4], index: 8, kind: output, shape index: {0}]   ;;  %s6186_s9 = inlined_call_operand.vmem [shape: bf16[2,16,16,4], index: 9, kind: output, shape index: {1}]   ;;  %s6187_s10 = inlined_call_operand.vmem [shape: f32[2,2,4], index: 10, kind: output, shape index: {2}]  }
   0x1   :  { %6199 = sst [smem:[#allocation20_spill]] %s6184_s7  ;;  %s4910_s15 = smov 0  }
   0x2   :  { %s4912_s16 = smov 0   ;;  %s4914_s17 = smov 0  }
   0x3 LB: > { %6200 = sst [smem:[#allocation4_spill]] %s4837_s15  ;;  %s30_s18 = sadd.s32 1, %s4837_s15  ;;  %s4845_s17 = sphi %s4914_s17, %s21_s17   ;;  %s4841_s16 = sphi %s4912_s16, %s6256_s16   ;;  %s4837_s15 = sphi %s4910_s15, %s6255_s15   ;;  %s4833_s14 = sphi %s4908_s14, %s6254_s14   ;;  %s4829_s13 = sphi %s4906_s13, %s6253_s13  }
   0x4   : > { %6201 = sst [smem:[#allocation5_spill]] %s4841_s16  ;;  %s33_s19 = sadd.s32 1, %s4841_s16 }
   0x5   : > { %6202 = sst [smem:[#allocation6_spill]] %s4845_s17  ;;  %p31_p0 = scmp.ge.s32.totalorder %s30_s18, 4 }
   0x6   : > { %p4146_p1 = scmp.ge.s32.totalorder %s4845_s17, 1  ;;  %p333_p2 = scmp.lt.s32.totalorder %s4845_s17, 9 }
   0x7   : > { %s6258_s18 = smov (%p31_p0, %s30_s18), 0  ;;  %s6260_s19 = smov (!%p31_p0, %s33_s19), %s4841_s16 }
   0x8   : > { %6203 = sst [smem:[#allocation7_spill]] %s6258_s18  ;;  %p334_p3 = pnand %p4146_p1, %p333_p2 }
   0x9   : > { %p35_p4 = scmp.ge.s32.totalorder %s6260_s19, 2 }
   0xa   : > { %337 = sbr.rel (%p334_p3) target bundleno = 996 (0x3e4), region = 52 }
   0xb   : > { %s6262_s19 = smov (%p35_p4, %s6260_s19), 0 }
   0xc   : > { %6204 = sst [smem:[#allocation8_spill]] %s6262_s19 }
   0xf   : > { %p390_p5 = scmp.lt.s32.totalorder %s4833_s14, 1  ;;  %s4942_s20 = sshll.u32 %s4829_s13, 2  ;;  %vm422_vm0 = vcmask 27648   ;;  %vm425_vm1 = vcmask 25600   ;;  %v4847_v0 = vmov 0  }
  0x10   : > { %p398_p6 = scmp.lt.s32.totalorder %s4942_s20, 15  ;;  %423 = vst.msk [vmem:[#allocation3] sm:$0xf] %vm422_vm0, %v4847_v0  ;;  %424 = vst.msk [vmem:[#allocation3 + $0x4] sm:$0xf] %vm422_vm0, %v4847_v0  ;;  %p4158_p7 = scmp.ne.s32.totalorder %s4829_s13, 0 }
  0x11   : > { %427 = vst.msk [vmem:[#allocation3 + $0xc] sm:$0xf] %vm422_vm0, %v4847_v0  ;;  %428 = vst.msk [vmem:[#allocation3 + $0x10] sm:$0xf] %vm422_vm0, %v4847_v0  ;;  %s6264_s14 = smov (!%p390_p5, %s4833_s14), 1 }
  0x12   : > { %430 = vst.msk [vmem:[#allocation3 + $0x18] sm:$0xf] %vm422_vm0, %v4847_v0  ;;  %431 = vst.msk [vmem:[#allocation3 + $0x1c] sm:$0xf] %vm422_vm0, %v4847_v0  ;;  %s399_s21 = scalar_select %p398_p6, %s4942_s20, 15 }
  0x13   : > { %433 = vst.msk [vmem:[#allocation3 + $0x24] sm:$0xf] %vm422_vm0, %v4847_v0  ;;  %434 = vst.msk [vmem:[#allocation3 + $0x28] sm:$0xf] %vm422_vm0, %v4847_v0  ;;  %s4401_s22 = sshll.u32 %s6264_s14, 7  ;;  %s4151_s23 = sshll.u32 %s6264_s14, 5 }
  0x14   : > { %436 = vst.msk [vmem:[#allocation3 + $0x30] sm:$0xf] %vm422_vm0, %v4847_v0  ;;  %437 = vst.msk [vmem:[#allocation3 + $0x34] sm:$0xf] %vm422_vm0, %v4847_v0  ;;  %s4978_s26 = scalar_lea.vmem %s6177_s0, %s4401_s22  ;;  %s4150_s27 = sshll.u32 %s399_s21, 1 }
  0x15   : > { %439 = vst.msk [vmem:[#allocation3 + $0x3c] sm:$0xf] %vm422_vm0, %v4847_v0  ;;  %440 = vst.msk [vmem:[#allocation3 + $0x40] sm:$0xf] %vm422_vm0, %v4847_v0  ;;  %s402_s28 = sadd.s32 %s4151_s23, %s4150_s27  ;;  %s4157_s29 = sshll.u32 %s6264_s14, 1 }
  0x16   : > { %442 = vst.msk [vmem:[#allocation3 + $0x48] sm:$0xf] %vm422_vm0, %v4847_v0  ;;  %443 = vst.msk [vmem:[#allocation3 + $0x4c] sm:$0xf] %vm422_vm0, %v4847_v0  ;;  %s4152_s30 = sshll.u32 %s402_s28, 2  ;;  %s4983_s19 = scalar_lea.vmem %s6187_s10, %s4157_s29 }
  0x17   : > { %445 = vst.msk [vmem:[#allocation3 + $0x54] sm:$0xf] %vm422_vm0, %v4847_v0  ;;  %446 = vst.msk [vmem:[#allocation3 + $0x58] sm:$0xf] %vm422_vm0, %v4847_v0  ;;  %s4988_s15 = scalar_lea.vmem %s6185_s8, %s4152_s30  ;;  %s4993_s24 = scalar_lea.vmem %s6186_s9, %s4152_s30 }
  0x18   : > { %426 = vst.msk [vmem:[#allocation3 + $0x8] sm:$0x3] %vm425_vm1, %v4847_v0  ;;  %429 = vst.msk [vmem:[#allocation3 + $0x14] sm:$0x3] %vm425_vm1, %v4847_v0  ;;  %451 = sbr.rel (%p4158_p7) target bundleno = 46 (0x2e), region = 56 }
  0x19   : > { %432 = vst.msk [vmem:[#allocation3 + $0x20] sm:$0x3] %vm425_vm1, %v4847_v0  ;;  %435 = vst.msk [vmem:[#allocation3 + $0x2c] sm:$0x3] %vm425_vm1, %v4847_v0 }
  0x1a   : > { %438 = vst.msk [vmem:[#allocation3 + $0x38] sm:$0x3] %vm425_vm1, %v4847_v0  ;;  %441 = vst.msk [vmem:[#allocation3 + $0x44] sm:$0x3] %vm425_vm1, %v4847_v0 }
  0x1b   : > { %444 = vst.msk [vmem:[#allocation3 + $0x50] sm:$0x3] %vm425_vm1, %v4847_v0  ;;  %447 = vst.msk [vmem:[#allocation3 + $0x5c] sm:$0x3] %vm425_vm1, %v4847_v0 }
  0x1d   : > { %v452_v1 = vld [vmem:[%s4978_s26] sm:$0xf]  ;;  %vm528_vm2 = vcmask 27649   ;;  %v453_v2 = vld [vmem:[%s4978_s26 + $0x4] sm:$0xf]  ;;  %vm476_vm3 = vcmask 1040384  }
  0x1e   : > { %v479_v3 = vrot.slane %v452_v1, 7  ;;  %vm477_vm4 = vcmask 1044484   ;;  %v481_v4 = vrot.slane %v453_v2, 7  ;;  %v454_v5 = vld [vmem:[%s4978_s26 + $0x8] sm:$0xf]  ;;  %vm531_vm6 = vcmask 24576  }
  0x1f   : > { %vm5001_vm5 = vmor %vm476_vm3, %vm477_vm4  ;;  %v484_v7 = vrot.slane %v454_v5, 7  ;;  %v455_v8 = vld [vmem:[%s4978_s26 + $0xc] sm:$0xf]  ;;  %v456_v9 = vld [vmem:[%s4978_s26 + $0x10] sm:$0xf] }
  0x20   : > { %v480_v10 = vrot.slane %v479_v3, 4  ;;  %529 = vst.msk [vmem:[#allocation3 + $0x18] sm:$0xe] %vm528_vm2, %v479_v3  ;;  %v483_v11 = vrot.slane %v481_v4, 4  ;;  %v486_v12 = vrot.slane %v455_v8, 7  ;;  %v489_v13 = vrot.slane %v456_v9, 7 }
  0x21   : > { %v457_v14 = vld [vmem:[%s4978_s26 + $0x14] sm:$0xf]  ;;  %v485_v15 = vrot.slane %v484_v7, 4  ;;  %533 = vst.msk [vmem:[#allocation3 + $0x24] sm:$0xe] %vm528_vm2, %v484_v7 }
  0x22   : > { %v491_v16 = vrot.slane %v457_v14, 7  ;;  %v458_v17 = vld [vmem:[%s4978_s26 + $0x18] sm:$0xf]  ;;  %v459_v18 = vld [vmem:[%s4978_s26 + $0x1c] sm:$0xf]  ;;  %v482_v19 = vsel %vm5001_vm5, %v480_v10, %v481_v4  ;;  %v488_v20 = vrot.slane %v486_v12, 4 }
  0x23   : > { %532 = vst.msk [vmem:[#allocation3 + $0x20] sm:$0x1] %vm531_vm6, %v483_v11  ;;  %v490_v21 = vrot.slane %v489_v13, 4  ;;  %v494_v22 = vrot.slane %v458_v17, 7  ;;  %v460_v23 = vld [vmem:[%s4978_s26 + $0x20] sm:$0xf]  ;;  %v487_v24 = vsel %vm5001_vm5, %v485_v15, %v486_v12 }
  0x24   : > { %536 = vst.msk [vmem:[#allocation3 + $0x30] sm:$0xe] %vm528_vm2, %v489_v13  ;;  %v493_v25 = vrot.slane %v491_v16, 4  ;;  %v496_v26 = vrot.slane %v459_v18, 7  ;;  %v499_v27 = vrot.slane %v460_v23, 7 }
  0x25   : > { %530 = vst.msk [vmem:[#allocation3 + $0x1c] sm:$0xf] %vm422_vm0, %v482_v19  ;;  %v461_v28 = vld [vmem:[%s4978_s26 + $0x24] sm:$0xf]  ;;  %534 = vst.msk [vmem:[#allocation3 + $0x28] sm:$0xf] %vm422_vm0, %v487_v24  ;;  %v492_v29 = vsel %vm5001_vm5, %v490_v21, %v491_v16 }
  0x26   : > { %535 = vst.msk [vmem:[#allocation3 + $0x2c] sm:$0x1] %vm531_vm6, %v488_v20  ;;  %v495_v30 = vrot.slane %v494_v22, 4  ;;  %v501_v31 = vrot.slane %v461_v28, 7  ;;  %v462_v32 = vld [vmem:[%s4978_s26 + $0x28] sm:$0xf] }
  0x27   : > { %539 = vst.msk [vmem:[#allocation3 + $0x3c] sm:$0xe] %vm528_vm2, %v494_v22  ;;  %v463_v33 = vld [vmem:[%s4978_s26 + $0x2c] sm:$0xf]  ;;  %v498_v34 = vrot.slane %v496_v26, 4  ;;  %v500_v35 = vrot.slane %v499_v27, 4 }
  0x28   : > { %537 = vst.msk [vmem:[#allocation3 + $0x34] sm:$0xf] %vm422_vm0, %v492_v29  ;;  %v504_v36 = vrot.slane %v462_v32, 7  ;;  %v506_v37 = vrot.slane %v463_v33, 7  ;;  %v497_v38 = vsel %vm5001_vm5, %v495_v30, %v496_v26  ;;  %v503_v39 = vrot.slane %v501_v31, 4 }
  0x29   : > { %538 = vst.msk [vmem:[#allocation3 + $0x38] sm:$0x1] %vm531_vm6, %v493_v25  ;;  %541 = vst.msk [vmem:[#allocation3 + $0x44] sm:$0x1] %vm531_vm6, %v498_v34  ;;  %v502_v40 = vsel %vm5001_vm5, %v500_v35, %v501_v31 }
  0x2a   : > { %542 = vst.msk [vmem:[#allocation3 + $0x48] sm:$0xe] %vm528_vm2, %v499_v27  ;;  %v505_v41 = vrot.slane %v504_v36, 4  ;;  %545 = vst.msk [vmem:[#allocation3 + $0x54] sm:$0xe] %vm528_vm2, %v504_v36  ;;  %v508_v42 = vrot.slane %v506_v37, 4 }
  0x2b   : > { %540 = vst.msk [vmem:[#allocation3 + $0x40] sm:$0xf] %vm422_vm0, %v497_v38  ;;  %543 = vst.msk [vmem:[#allocation3 + $0x4c] sm:$0xf] %vm422_vm0, %v502_v40 }
  0x2c   : > { %544 = vst.msk [vmem:[#allocation3 + $0x50] sm:$0x1] %vm531_vm6, %v503_v39  ;;  %v507_v43 = vsel %vm5001_vm5, %v505_v41, %v506_v37  ;;  %547 = vst.msk [vmem:[#allocation3 + $0x5c] sm:$0x1] %vm531_vm6, %v508_v42 }
  0x2d   : > { %546 = vst.msk [vmem:[#allocation3 + $0x58] sm:$0xf] %vm422_vm0, %v507_v43 }
  0x2e PF: > { %p4159_p8 = scmp.ne.s32.totalorder %s4829_s13, 3 }
  0x30   : > { %551 = sbr.rel (%p4159_p8) target bundleno = 70 (0x46), region = 60 }
  0x35   : > { %v4160_v44 = vld [vmem:[%s4978_s26 + $0x50] sm:$0xf]  ;;  %vm628_vm7 = vcmask 27649   ;;  %v4161_v45 = vld [vmem:[%s4978_s26 + $0x54] sm:$0xf]  ;;  %vm577_vm8 = vcmask 1040384  }
  0x36   : > { %v580_v46 = vrot.slane %v4160_v44, 7  ;;  %vm578_vm9 = vcmask 1044484   ;;  %v582_v47 = vrot.slane %v4161_v45, 7  ;;  %v4162_v48 = vld [vmem:[%s4978_s26 + $0x58] sm:$0xf]  ;;  %vm631_vm11 = vcmask 24576  }
  0x37   : > { %vm5050_vm10 = vmor %vm577_vm8, %vm578_vm9  ;;  %v585_v50 = vrot.slane %v4162_v48, 7  ;;  %v4163_v51 = vld [vmem:[%s4978_s26 + $0x5c] sm:$0xf]  ;;  %v4164_v52 = vld [vmem:[%s4978_s26 + $0x60] sm:$0xf] }
  0x38   : > { %v581_v53 = vrot.slane %v580_v46, 4  ;;  %629 = vst.msk [vmem:[#allocation3] sm:$0xe] %vm628_vm7, %v580_v46  ;;  %v584_v54 = vrot.slane %v582_v47, 4  ;;  %v587_v55 = vrot.slane %v4163_v51, 7  ;;  %v590_v56 = vrot.slane %v4164_v52, 7 }
  0x39   : > { %v4165_v57 = vld [vmem:[%s4978_s26 + $0x64] sm:$0xf]  ;;  %v586_v58 = vrot.slane %v585_v50, 4  ;;  %633 = vst.msk [vmem:[#allocation3 + $0xc] sm:$0xe] %vm628_vm7, %v585_v50 }
  0x3a   : > { %v592_v59 = vrot.slane %v4165_v57, 7  ;;  %v4166_v60 = vld [vmem:[%s4978_s26 + $0x68] sm:$0xf]  ;;  %v4167_v61 = vld [vmem:[%s4978_s26 + $0x6c] sm:$0xf]  ;;  %v583_v62 = vsel %vm5050_vm10, %v581_v53, %v582_v47  ;;  %v589_v63 = vrot.slane %v587_v55, 4 }
  0x3b   : > { %632 = vst.msk [vmem:[#allocation3 + $0x8] sm:$0x1] %vm631_vm11, %v584_v54  ;;  %v591_v0 = vrot.slane %v590_v56, 4  ;;  %v595_v1 = vrot.slane %v4166_v60, 7  ;;  %v4168_v2 = vld [vmem:[%s4978_s26 + $0x70] sm:$0xf]  ;;  %v588_v3 = vsel %vm5050_vm10, %v586_v58, %v587_v55 }
  0x3c   : > { %636 = vst.msk [vmem:[#allocation3 + $0x18] sm:$0xe] %vm628_vm7, %v590_v56  ;;  %v594_v4 = vrot.slane %v592_v59, 4  ;;  %v597_v5 = vrot.slane %v4167_v61, 7  ;;  %v600_v6 = vrot.slane %v4168_v2, 7 }
  0x3d   : > { %630 = vst.msk [vmem:[#allocation3 + $0x4] sm:$0xf] %vm422_vm0, %v583_v62  ;;  %v4169_v7 = vld [vmem:[%s4978_s26 + $0x74] sm:$0xf]  ;;  %634 = vst.msk [vmem:[#allocation3 + $0x10] sm:$0xf] %vm422_vm0, %v588_v3  ;;  %v593_v8 = vsel %vm5050_vm10, %v591_v0, %v592_v59 }
  0x3e   : > { %635 = vst.msk [vmem:[#allocation3 + $0x14] sm:$0x1] %vm631_vm11, %v589_v63  ;;  %v596_v9 = vrot.slane %v595_v1, 4  ;;  %v602_v10 = vrot.slane %v4169_v7, 7  ;;  %v4170_v11 = vld [vmem:[%s4978_s26 + $0x78] sm:$0xf] }
  0x3f   : > { %639 = vst.msk [vmem:[#allocation3 + $0x24] sm:$0xe] %vm628_vm7, %v595_v1  ;;  %v4171_v12 = vld [vmem:[%s4978_s26 + $0x7c] sm:$0xf]  ;;  %v599_v13 = vrot.slane %v597_v5, 4  ;;  %v601_v14 = vrot.slane %v600_v6, 4 }
  0x40   : > { %637 = vst.msk [vmem:[#allocation3 + $0x1c] sm:$0xf] %vm422_vm0, %v593_v8  ;;  %v605_v15 = vrot.slane %v4170_v11, 7  ;;  %v607_v16 = vrot.slane %v4171_v12, 7  ;;  %v598_v17 = vsel %vm5050_vm10, %v596_v9, %v597_v5  ;;  %v604_v18 = vrot.slane %v602_v10, 4 }
  0x41   : > { %638 = vst.msk [vmem:[#allocation3 + $0x20] sm:$0x1] %vm631_vm11, %v594_v4  ;;  %641 = vst.msk [vmem:[#allocation3 + $0x2c] sm:$0x1] %vm631_vm11, %v599_v13  ;;  %v603_v19 = vsel %vm5050_vm10, %v601_v14, %v602_v10 }
  0x42   : > { %642 = vst.msk [vmem:[#allocation3 + $0x30] sm:$0xe] %vm628_vm7, %v600_v6  ;;  %v606_v20 = vrot.slane %v605_v15, 4  ;;  %645 = vst.msk [vmem:[#allocation3 + $0x3c] sm:$0xe] %vm628_vm7, %v605_v15  ;;  %v609_v21 = vrot.slane %v607_v16, 4 }
  0x43   : > { %640 = vst.msk [vmem:[#allocation3 + $0x28] sm:$0xf] %vm422_vm0, %v598_v17  ;;  %643 = vst.msk [vmem:[#allocation3 + $0x34] sm:$0xf] %vm422_vm0, %v603_v19 }
  0x44   : > { %644 = vst.msk [vmem:[#allocation3 + $0x38] sm:$0x1] %vm631_vm11, %v604_v18  ;;  %v608_v22 = vsel %vm5050_vm10, %v606_v20, %v607_v16  ;;  %647 = vst.msk [vmem:[#allocation3 + $0x44] sm:$0x1] %vm631_vm11, %v609_v21 }
  0x45   : > { %646 = vst.msk [vmem:[#allocation3 + $0x40] sm:$0xf] %vm422_vm0, %v608_v22 }
  0x46 PF: > { %p648_p9 = scmp.gt.s32.totalorder %s4829_s13, 0  ;;  %p649_p10 = scmp.lt.s32.totalorder %s4829_s13, 3 }
  0x48   : > { %p650_p11 = pnand %p649_p10, %p648_p9 }
  0x49   : > { %s4173_s7 = sadd.s32 (!%p650_p11), 4294967294, %s4942_s20 }
  0x4a   : > { %653 = sbr.rel (%p650_p11) target bundleno = 101 (0x65), region = 64  ;;  %s4402_s14 = sshll.u32 (!%p650_p11), %s4173_s7, 3 }
  0x4b   : > { %s5097_s16 = scalar_lea.vmem (!%p650_p11), %s4978_s26, %s4402_s14 }
  0x4f   : > { %vm758_vm12 = vcmask 27649   ;;  %vm691_vm13 = vcmask 1040384   ;;  %vm692_vm14 = vcmask 1044484   ;;  %v659_v23 = vld [vmem:[%s5097_s16] sm:$0xf]  ;;  %vm761_vm2 = vcmask 24576  }
  0x50   : > { %v660_v24 = vld [vmem:[%s5097_s16 + $0x4] sm:$0xf]  ;;  %v661_v25 = vld [vmem:[%s5097_s16 + $0x8] sm:$0xf]  ;;  %v694_v26 = vrot.slane %v659_v23, 7  ;;  %vm5103_vm15 = vmor %vm691_vm13, %vm692_vm14 }
  0x51   : > { %v696_v27 = vrot.slane %v660_v24, 7  ;;  %v699_v28 = vrot.slane %v661_v25, 7  ;;  %v662_v29 = vld [vmem:[%s5097_s16 + $0xc] sm:$0xf]  ;;  %v663_v32 = vld [vmem:[%s5097_s16 + $0x10] sm:$0xf] }
  0x52   : > { %v701_v31 = vrot.slane %v662_v29, 7  ;;  %v664_v33 = vld [vmem:[%s5097_s16 + $0x14] sm:$0xf]  ;;  %v695_v34 = vrot.slane %v694_v26, 4  ;;  %759 = vst.msk [vmem:[#allocation3] sm:$0xe] %vm758_vm12, %v694_v26 }
  0x53   : > { %v698_v35 = vrot.slane %v696_v27, 4  ;;  %v700_v36 = vrot.slane %v699_v28, 4  ;;  %763 = vst.msk [vmem:[#allocation3 + $0xc] sm:$0xe] %vm758_vm12, %v699_v28  ;;  %v704_v37 = vrot.slane %v663_v32, 7  ;;  %v706_v40 = vrot.slane %v664_v33, 7 }
  0x54   : > { %v665_v38 = vld [vmem:[%s5097_s16 + $0x18] sm:$0xf]  ;;  %v703_v39 = vrot.slane %v701_v31, 4  ;;  %v666_v42 = vld [vmem:[%s5097_s16 + $0x1c] sm:$0xf]  ;;  %v697_v43 = vsel %vm5103_vm15, %v695_v34, %v696_v27 }
  0x55   : > { %v709_v41 = vrot.slane %v665_v38, 7  ;;  %762 = vst.msk [vmem:[#allocation3 + $0x8] sm:$0x1] %vm761_vm2, %v698_v35  ;;  %v702_v44 = vsel %vm5103_vm15, %v700_v36, %v701_v31  ;;  %v705_v45 = vrot.slane %v704_v37, 4  ;;  %v711_v46 = vrot.slane %v666_v42, 7 }
  0x56   : > { %766 = vst.msk [vmem:[#allocation3 + $0x18] sm:$0xe] %vm758_vm12, %v704_v37  ;;  %v667_v47 = vld [vmem:[%s5097_s16 + $0x20] sm:$0xf]  ;;  %v668_v48 = vld [vmem:[%s5097_s16 + $0x24] sm:$0xf] }
  0x57   : > { %760 = vst.msk [vmem:[#allocation3 + $0x4] sm:$0xf] %vm422_vm0, %v697_v43  ;;  %764 = vst.msk [vmem:[#allocation3 + $0x10] sm:$0xf] %vm422_vm0, %v702_v44  ;;  %v708_v49 = vrot.slane %v706_v40, 4  ;;  %v710_v50 = vrot.slane %v709_v41, 4  ;;  %v707_v54 = vsel %vm5103_vm15, %v705_v45, %v706_v40 }
  0x58   : > { %765 = vst.msk [vmem:[#allocation3 + $0x14] sm:$0x1] %vm761_vm2, %v703_v39  ;;  %v714_v51 = vrot.slane %v667_v47, 7  ;;  %v716_v52 = vrot.slane %v668_v48, 7  ;;  %v669_v53 = vld [vmem:[%s5097_s16 + $0x28] sm:$0xf] }
  0x59   : > { %769 = vst.msk [vmem:[#allocation3 + $0x24] sm:$0xe] %vm758_vm12, %v709_v41  ;;  %v713_v55 = vrot.slane %v711_v46, 4  ;;  %v719_v56 = vrot.slane %v669_v53, 7  ;;  %v670_v57 = vld [vmem:[%s5097_s16 + $0x2c] sm:$0xf]  ;;  %v712_v59 = vsel %vm5103_vm15, %v710_v50, %v711_v46 }
  0x5a   : > { %v671_v58 = vld [vmem:[%s5097_s16 + $0x30] sm:$0xf]  ;;  %767 = vst.msk [vmem:[#allocation3 + $0x1c] sm:$0xf] %vm422_vm0, %v707_v54  ;;  %v715_v60 = vrot.slane %v714_v51, 4  ;;  %v718_v61 = vrot.slane %v716_v52, 4 }
  0x5b   : > { %768 = vst.msk [vmem:[#allocation3 + $0x20] sm:$0x1] %vm761_vm2, %v708_v49  ;;  %v721_v62 = vrot.slane %v670_v57, 7  ;;  %v672_v63 = vld [vmem:[%s5097_s16 + $0x34] sm:$0xf]  ;;  %v720_v0 = vrot.slane %v719_v56, 4 }
  0x5c   : > { %772 = vst.msk [vmem:[#allocation3 + $0x30] sm:$0xe] %vm758_vm12, %v714_v51  ;;  %775 = vst.msk [vmem:[#allocation3 + $0x3c] sm:$0xe] %vm758_vm12, %v719_v56  ;;  %v724_v1 = vrot.slane %v671_v58, 7  ;;  %v726_v2 = vrot.slane %v672_v63, 7  ;;  %v717_v4 = vsel %vm5103_vm15, %v715_v60, %v716_v52 }
  0x5d   : > { %770 = vst.msk [vmem:[#allocation3 + $0x28] sm:$0xf] %vm422_vm0, %v712_v59  ;;  %v673_v3 = vld [vmem:[%s5097_s16 + $0x38] sm:$0xf]  ;;  %v723_v5 = vrot.slane %v721_v62, 4  ;;  %v722_v8 = vsel %vm5103_vm15, %v720_v0, %v721_v62 }
  0x5e   : > { %771 = vst.msk [vmem:[#allocation3 + $0x2c] sm:$0x1] %vm761_vm2, %v713_v55  ;;  %774 = vst.msk [vmem:[#allocation3 + $0x38] sm:$0x1] %vm761_vm2, %v718_v61  ;;  %v729_v6 = vrot.slane %v673_v3, 7  ;;  %v725_v9 = vrot.slane %v724_v1, 4 }
  0x5f   : > { %v674_v7 = vld [vmem:[%s5097_s16 + $0x3c] sm:$0xf]  ;;  %773 = vst.msk [vmem:[#allocation3 + $0x34] sm:$0xf] %vm422_vm0, %v717_v4  ;;  %v728_v10 = vrot.slane %v726_v2, 4 }
  0x60   : > { %778 = vst.msk [vmem:[#allocation3 + $0x48] sm:$0xe] %vm758_vm12, %v724_v1  ;;  %v731_v11 = vrot.slane %v674_v7, 7  ;;  %v730_v12 = vrot.slane %v729_v6, 4  ;;  %781 = vst.msk [vmem:[#allocation3 + $0x54] sm:$0xe] %vm758_vm12, %v729_v6  ;;  %v727_v13 = vsel %vm5103_vm15, %v725_v9, %v726_v2 }
  0x61   : > { %776 = vst.msk [vmem:[#allocation3 + $0x40] sm:$0xf] %vm422_vm0, %v722_v8  ;;  %779 = vst.msk [vmem:[#allocation3 + $0x4c] sm:$0xf] %vm422_vm0, %v727_v13 }
  0x62   : > { %777 = vst.msk [vmem:[#allocation3 + $0x44] sm:$0x1] %vm761_vm2, %v723_v5  ;;  %780 = vst.msk [vmem:[#allocation3 + $0x50] sm:$0x1] %vm761_vm2, %v728_v10  ;;  %v733_v14 = vrot.slane %v731_v11, 4  ;;  %v732_v15 = vsel %vm5103_vm15, %v730_v12, %v731_v11 }
  0x63   : > { %782 = vst.msk [vmem:[#allocation3 + $0x58] sm:$0xf] %vm422_vm0, %v732_v15 }
  0x64   : > { %783 = vst.msk [vmem:[#allocation3 + $0x5c] sm:$0x1] %vm761_vm2, %v733_v14 }
  0x65 PF: > { %v4180_v16 = vld [vmem:[%s6178_s1 + $0x2] sm:$0x3]  ;;  %vm971_vm3 = vcmask 1041408   ;;  %v5162_v17 = vld [vmem:[#allocation3 + $0x10] sm:$0xf]  ;;  %vm913_vm4 = vcmask 1042432  }
  0x66   : > { %4719 = vmatprep.subr.msk.bf16.mxu0 %vm971_vm3, %v4180_v16  ;;  %v973_v18 = vsel %vm971_vm3, %v4180_v16, 0  ;;  %v787_v19 = vld [vmem:[#allocation3 + $0x14] sm:$0x1]  ;;  %v897_v20 = vld [vmem:[#allocation3 + $0xc] sm:$0xe]  ;;  %vm914_vm5 = vcmask 1046532  }
  0x67   : > { %4518 = vmatpush3.bf16.msra.mxu0 %v973_v18  ;;  %vm5166_vm6 = vmor %vm913_vm4, %vm914_vm5  ;;  %v4176_v22 = vrot.slane %v897_v20, 9  ;;  %v918_v23 = vrot.slane %v5162_v17, 5  ;;  %v921_v24 = vrot.slane %v787_v19, 5  ;;  %vm958_vm7 = vcmask 31744   ;;  %v896_v25 = vld [vmem:[%s6178_s1] sm:$0x3] }
  0x68   : > { %v1140_v26 = vshrl.u32 %v897_v20, 16  ;;  %v1143_v27 = vshll.u32 %v897_v20, 16  ;;  %4720 = vmatprep.subr.msk.bf16.mxu1 %vm971_vm3, %v896_v25  ;;  %v5175_v28 = vld [vmem:[#allocation3 + $0x1c] sm:$0xf]  ;;  %v5177_v29 = vld [vmem:[#allocation3 + $0x20] sm:$0x1] }
  0x69   : > { %v919_v30 = vsel %vm5166_vm6, %v4176_v22, %v918_v23  ;;  %v920_v31 = vrot.slane %v918_v23, 4  ;;  %v898_v32 = vld [vmem:[#allocation3 + $0x18] sm:$0xe]  ;;  %v925_v33 = vrot.slane %v5175_v28, 5  ;;  %v928_v34 = vrot.slane %v5177_v29, 5 }
  0x6a   : > { %v5183_v35 = vrot.slane %v1140_v26, 5  ;;  %v5185_v36 = vrot.slane %v1143_v27, 6  ;;  %v4177_v37 = vrot.slane %v898_v32, 9  ;;  %v1163_v38 = vshrl.u32 %v898_v32, 16  ;;  %v4197_v39 = vld [vmem:[%s6178_s1 + $0x4] sm:$0x3] }
  0x6b   : > { %v922_v40 = vsel %vm5166_vm6, %v920_v31, %v921_v24  ;;  %v927_v41 = vrot.slane %v925_v33, 4  ;;  %v1166_v42 = vshll.u32 %v898_v32, 16  ;;  %v1065_v43 = vsel %vm971_vm3, %v896_v25, 0  ;;  %4721 = vmatprep.subr.msk.bf16.mxu0 %vm971_vm3, %v4197_v39  ;;  %v785_v44 = vld [vmem:[#allocation3 + $0xc] sm:$0xf] }
  0x6c   : > { %v4181_v45 = vcombine.low %v919_v30, %v922_v40  ;;  %v926_v46 = vsel %vm5166_vm6, %v4177_v37, %v925_v33  ;;  %v1165_v47 = vrot.slane %v1163_v38, 5  ;;  %4528 = vmatpush3.bf16.msra.mxu1 %v1065_v43  ;;  %v1258_v48 = vsel %vm971_vm3, %v4197_v39, 0  ;;  %v4206_v49 = vld [vmem:[%s6178_s1 + $0x6] sm:$0x3]  ;;  %v788_v50 = vld [vmem:[#allocation3 + $0x18] sm:$0xf] }
  0x6d   : > { %v929_v51 = vsel %vm5166_vm6, %v927_v41, %v928_v34  ;;  %v1168_v52 = vrot.slane %v1166_v42, 6  ;;  %vm797_vm8 = vsmask.f32 3328  ;;  %vm798_vm9 = vsmask.f32 7440  ;;  %4722 = vmatprep.subr.msk.bf16.mxu1 %vm971_vm3, %v4206_v49 }
  0x6e   : > { %4519 = vmatprep.mubr.msk.bf16.mxu0 %vm958_vm7, %v4181_v45  ;;  %v4182_v53 = vcombine.low %v926_v46, %v929_v51  ;;  %v801_v54 = vshrl.u32 %v785_v44, 16  ;;  %v804_v55 = vshll.u32 %v785_v44, 16  ;;  %v810_v56 = vshll.u32 %v5162_v17, 16  ;;  %v5214_v9 = vld [vmem:[#allocation3 + $0x28] sm:$0xf]  ;;  %vm5218_vm10 = vmor %vm797_vm8, %vm798_vm9 }
  0x6f   : > { %v1169_v57 = vor.u32 %v1168_v52, %v1165_v47  ;;  %v814_v58 = vshrl.u32 %v5162_v17, 16  ;;  %v820_v59 = vshll.u32 %v787_v19, 16  ;;  %v825_v60 = vshrl.u32 %v788_v50, 16  ;;  %v5225_v15 = vld [vmem:[#allocation3 + $0x24] sm:$0xe] }
  0x70   : > { %4520 = vmatmul.mubr.msk.bf16.vlgmr.msra.gmra.mxu0 %vm958_vm7, %v4182_v53  ;;  %v803_v61 = vrot.slane %v801_v54, 4  ;;  %v806_v62 = vrot.slane %v804_v55, 5  ;;  %v812_v63 = vrot.slane %v810_v56, 5  ;;  %v5207_v0 = vrot.slane %v810_v56, 6  ;;  %v793_v20 = vld [vmem:[#allocation3 + $0x2c] sm:$0x1] }
  0x71   : > { %v5209_v1 = vrot.slane %v1169_v57, 4  ;;  %4538 = vmatpush3.bf16.msra.mxu0 %v1258_v48  ;;  %v816_v2 = vrot.slane %v814_v58, 4  ;;  %v822_v3 = vrot.slane %v820_v59, 5  ;;  %v5211_v4 = vrot.slane %v814_v58, 5  ;;  %v5227_v26 = vld [vmem:[#allocation3 + $0x34] sm:$0xf] }
  0x72   : > { %v807_v5 = vor.u32 %v806_v62, %v803_v61  ;;  %v827_v6 = vrot.slane %v825_v60, 4  ;;  %v828_v7 = vshll.u32 %v788_v50, 16  ;;  %v834_v8 = vshll.u32 %v5175_v28, 16  ;;  %v796_v31 = vld [vmem:[#allocation3 + $0x38] sm:$0x1] }
  0x73   : > { %v817_v11 = vor.u32 %v816_v2, %v812_v63  ;;  %v838_v12 = vshrl.u32 %v5175_v28, 16  ;;  %v844_v13 = vshll.u32 %v5177_v29, 16  ;;  %v1469_v14 = vsel %vm971_vm3, %v4206_v49, 0  ;;  %v5233_v32 = vld [vmem:[#allocation3 + $0x30] sm:$0xe] }
  0x74   : > { %v808_v16 = vrot.slane %v807_v5, 4  ;;  %v830_v17 = vrot.slane %v828_v7, 5  ;;  %v836_v18 = vrot.slane %v834_v8, 5  ;;  %v1172_v19 = vrot.slane %v834_v8, 6  ;;  %v791_v39 = vld [vmem:[#allocation3 + $0x24] sm:$0xf] }
  0x75   : > { %v818_v22 = vrot.slane %v817_v11, 4  ;;  %v840_v23 = vrot.slane %v838_v12, 4  ;;  %v846_v24 = vrot.slane %v844_v13, 5  ;;  %v1171_v25 = vrot.slane %v838_v12, 5  ;;  %v5242_v40 = vld [vmem:[%s6178_s1 + $0x8] sm:$0x3] }
  0x76   : > { %v813_v27 = vsel %vm5218_vm10, %v808_v16, %v812_v63  ;;  %v831_v28 = vor.u32 %v830_v17, %v827_v6  ;;  %v4178_v29 = vrot.slane %v5225_v15, 9  ;;  %v932_v30 = vrot.slane %v5214_v9, 5  ;;  %4723 = vmatprep.subr.msk.bf16.mxu0 %vm971_vm3, %v5242_v40  ;;  %v794_v53 = vld [vmem:[#allocation3 + $0x30] sm:$0xf]  ;;  %v5268_v5 = vld [vmem:[%s6178_s1 + $0xa] sm:$0x3] }
  0x77   : > { %v823_v33 = vsel %vm5218_vm10, %v818_v22, %v822_v3  ;;  %v841_v34 = vor.u32 %v840_v23, %v836_v18  ;;  %v5237_v37 = vor.u32 %v1172_v19, %v1171_v25  ;;  %v935_v38 = vrot.slane %v793_v20, 5  ;;  %v1132_v23 = vld [vmem:[#allocation3 + $0x14] sm:$0x3] }
  0x78   : > { %v4189_v41 = vcombine.low %v813_v27, %v823_v33  ;;  %v832_v42 = vrot.slane %v831_v28, 4  ;;  %v933_v43 = vsel %vm5166_vm6, %v4178_v29, %v932_v30  ;;  %v934_v44 = vrot.slane %v932_v30, 4 }
  0x79   : > { %v842_v45 = vrot.slane %v841_v34, 4  ;;  %v1175_v46 = vrot.slane %v5237_v37, 4  ;;  %v4179_v47 = vrot.slane %v5233_v32, 9  ;;  %v939_v48 = vrot.slane %v5227_v26, 5 }
  0x7a   : > { %4529 = vmatprep.mubr.msk.bf16.mxu1 %vm958_vm7, %v4189_v41  ;;  %v837_v49 = vsel %vm5218_vm10, %v832_v42, %v836_v18  ;;  %v936_v50 = vsel %vm5166_vm6, %v934_v44, %v935_v38  ;;  %v942_v51 = vrot.slane %v796_v31, 5  ;;  %v849_v52 = vshrl.u32 %v791_v39, 16  ;;  %v1133_v44 = vld [vmem:[#allocation3 + $0x20] sm:$0x3] }
  0x7b   : > { %v847_v54 = vsel %vm5218_vm10, %v842_v45, %v846_v24  ;;  %v4183_v55 = vcombine.low %v933_v43, %v936_v50  ;;  %v940_v56 = vsel %vm5166_vm6, %v4179_v47, %v939_v48  ;;  %v941_v57 = vrot.slane %v939_v48, 4  ;;  %v1334_v48 = vld [vmem:[#allocation3 + $0x18] sm:$0xf] }
  0x7c   : > { %v4190_v58 = vcombine.low %v837_v49, %v847_v54  ;;  %v851_v59 = vrot.slane %v849_v52, 4  ;;  %v852_v60 = vshll.u32 %v791_v39, 16  ;;  %v858_v61 = vshll.u32 %v5214_v9, 16 }
  0x7d   : > { %4523 = vmatprep.mubr.msk.bf16.mxu0 %vm958_vm7, %v4183_v55  ;;  %v943_v62 = vsel %vm5166_vm6, %v941_v57, %v942_v51  ;;  %v862_v63 = vshrl.u32 %v5214_v9, 16  ;;  %v868_v2 = vshll.u32 %v793_v20, 16  ;;  %v873_v3 = vshrl.u32 %v794_v53, 16  ;;  %v5304_v55 = vld [vmem:[#allocation3 + $0x1c] sm:$0xf] }
  0x7e   : > { %4530 = vmatmul.mubr.msk.bf16.vlgmr.msra.gmra.mxu1 %vm958_vm7, %v4190_v58  ;;  %v4184_v6 = vcombine.low %v940_v56, %v943_v62  ;;  %v854_v7 = vrot.slane %v852_v60, 5  ;;  %v860_v8 = vrot.slane %v858_v61, 5  ;;  %v876_v11 = vshll.u32 %v794_v53, 16 }
  0x7f   : > { %4548 = vmatpush3.bf16.msra.mxu1 %v1469_v14  ;;  %v864_v12 = vrot.slane %v862_v63, 4  ;;  %v870_v13 = vrot.slane %v868_v2, 5  ;;  %v875_v16 = vrot.slane %v873_v3, 4  ;;  %v882_v17 = vshll.u32 %v5227_v26, 16 }
  0x80   : > { %4524 = vmatmul.mubr.msk.bf16.gmra.mxu0 %vm958_vm7, %v4184_v6  ;;  %v855_v18 = vor.u32 %v854_v7, %v851_v59  ;;  %v878_v19 = vrot.slane %v876_v11, 5  ;;  %v886_v20 = vshrl.u32 %v5227_v26, 16  ;;  %v892_v22 = vshll.u32 %v796_v31, 16  ;;  %4724 = vmatprep.subr.msk.bf16.mxu1 %vm971_vm3, %v5268_v5  ;;  %v5311_v59 = vld [vmem:[#allocation3 + $0x20] sm:$0x1] }
  0x81   : > { %v865_v24 = vor.u32 %v864_v12, %v860_v8  ;;  %v884_v14 = vrot.slane %v882_v17, 5  ;;  %vm1136_vm11 = vsmask.f32 2304  ;;  %vm1137_vm12 = vsmask.f32 6416 }
  0x82   : > { %v856_v25 = vrot.slane %v855_v18, 4  ;;  %v879_v27 = vor.u32 %v878_v19, %v875_v16  ;;  %v888_v28 = vrot.slane %v886_v20, 4  ;;  %v894_v29 = vrot.slane %v892_v22, 5  ;;  %vm5290_vm13 = vmor %vm1136_vm11, %vm1137_vm12  ;;  %v1337_v6 = vld [vmem:[#allocation3 + $0x24] sm:$0xf] }
  0x83   : > { %v866_v30 = vrot.slane %v865_v24, 4  ;;  %v1146_v31 = vor.u32 %v5185_v36, %v5183_v35  ;;  %v1150_v33 = vor.u32 %v5207_v0, %v5211_v4  ;;  %v1154_v34 = vshrl.u32 %v1132_v23, 16  ;;  %v5325_v24 = vld [vmem:[#allocation3 + $0x2c] sm:$0x1] }
  0x84   : > { %v861_v38 = vsel %vm5218_vm10, %v856_v25, %v860_v8  ;;  %v880_v39 = vrot.slane %v879_v27, 4  ;;  %v889_v41 = vor.u32 %v888_v28, %v884_v14  ;;  %v1157_v43 = vshll.u32 %v1132_v23, 16 }
  0x85   : > { %v871_v45 = vsel %vm5218_vm10, %v866_v30, %v870_v13  ;;  %v1147_v47 = vrot.slane %v1146_v31, 4  ;;  %v1152_v35 = vrot.slane %v1150_v33, 4  ;;  %v1156_v36 = vrot.slane %v1154_v34, 5  ;;  %v5317_v13 = vld [vmem:[#allocation3 + $0x28] sm:$0xf] }
  0x86   : > { %v4191_v0 = vcombine.low %v861_v38, %v871_v45  ;;  %v885_v4 = vsel %vm5218_vm10, %v880_v39, %v884_v14  ;;  %v890_v49 = vrot.slane %v889_v41, 4  ;;  %v1159_v50 = vrot.slane %v1157_v43, 6 }
  0x87   : > { %v1151_v51 = vsel %vm5290_vm13, %v1147_v47, %v1150_v33  ;;  %v1174_v52 = vsel %vm5290_vm13, %v5209_v1, %v5237_v37  ;;  %v1177_v53 = vshrl.u32 %v1133_v44, 16  ;;  %v1180_v54 = vshll.u32 %v1133_v44, 16  ;;  %v5340_v37 = vld [vmem:[%s6178_s1 + $0xc] sm:$0x3] }
  0x88   : > { %4533 = vmatprep.mubr.msk.bf16.mxu1 %vm958_vm7, %v4191_v0  ;;  %v895_v56 = vsel %vm5218_vm10, %v890_v49, %v894_v29  ;;  %v1160_v57 = vor.u32 %v1159_v50, %v1156_v36  ;;  %v1615_v58 = vsel %vm971_vm3, %v5242_v40, 0  ;;  %v1347_v60 = vshrl.u32 %v1334_v48, 16 }
  0x89   : > { %v4192_v62 = vcombine.low %v885_v4, %v895_v56  ;;  %v1179_v2 = vrot.slane %v1177_v53, 5  ;;  %v1182_v3 = vrot.slane %v1180_v54, 6  ;;  %v1350_v1 = vshll.u32 %v1334_v48, 16  ;;  %v1134_v4 = vld [vmem:[#allocation3 + $0x2c] sm:$0x3] }
  0x8a   : > { %v1161_v7 = vsel %vm5290_vm13, %v1152_v35, %v1160_v57  ;;  %v1349_v8 = vrot.slane %v1347_v60, 4  ;;  %v1356_v11 = vshll.u32 %v5304_v55, 16  ;;  %v1360_v12 = vshrl.u32 %v5304_v55, 16 }
  0x8b   : > { %4534 = vmatmul.mubr.msk.bf16.gmra.mxu1 %vm958_vm7, %v4192_v62  ;;  %v4198_v40 = vcombine.low %v1151_v51, %v1161_v7  ;;  %v1183_v16 = vor.u32 %v1182_v3, %v1179_v2  ;;  %v1352_v18 = vrot.slane %v1350_v1, 5  ;;  %v1366_v19 = vshll.u32 %v5311_v59, 16  ;;  %v1135_v1 = vld [vmem:[#allocation3 + $0x38] sm:$0x3] }
  0x8c   : > { %v1358_v22 = vrot.slane %v1356_v11, 5  ;;  %v1362_v23 = vrot.slane %v1360_v12, 4  ;;  %v1371_v14 = vshrl.u32 %v1337_v6, 16  ;;  %v1374_v25 = vshll.u32 %v1337_v6, 16 }
  0x8d   : > { %4539 = vmatprep.mubr.msk.bf16.mxu0 %vm958_vm7, %v4198_v40  ;;  %v1184_v27 = vsel %vm5290_vm13, %v1175_v46, %v1183_v16  ;;  %v1353_v28 = vor.u32 %v1352_v18, %v1349_v8  ;;  %v1368_v29 = vrot.slane %v1366_v19, 5  ;;  %v1380_v30 = vshll.u32 %v5317_v13, 16 }
  0x8e   : > { %v4199_v31 = vcombine.low %v1174_v52, %v1184_v27  ;;  %v1363_v33 = vor.u32 %v1362_v23, %v1358_v22  ;;  %v1373_v34 = vrot.slane %v1371_v14, 4  ;;  %v1376_v38 = vrot.slane %v1374_v25, 5 }
  0x8f   : > { %v1354_v39 = vrot.slane %v1353_v28, 4  ;;  %v1382_v41 = vrot.slane %v1380_v30, 5  ;;  %v1384_v43 = vshrl.u32 %v5317_v13, 16  ;;  %v1390_v44 = vshll.u32 %v5325_v24, 16 }
  0x90   : > { %4540 = vmatmul.mubr.msk.bf16.vlgmr.msra.gmra.mxu0 %vm958_vm7, %v4199_v31  ;;  %v1364_v46 = vrot.slane %v1363_v33, 4  ;;  %v1377_v45 = vor.u32 %v1376_v38, %v1373_v34  ;;  %v1813_v47 = vsel %vm971_vm3, %v5268_v5, 0  ;;  %v1186_v35 = vshrl.u32 %v5225_v15, 16  ;;  %v5372_v31 = vld [vmem:[#allocation3 + $0x34] sm:$0xf] }
  0x91   : > { %4558 = vmatpush3.bf16.msra.mxu0 %v1615_v58  ;;  %v1359_v36 = vsel %vm5218_vm10, %v1354_v39, %v1358_v22  ;;  %v1386_v48 = vrot.slane %v1384_v43, 4  ;;  %v1392_v0 = vrot.slane %v1390_v44, 5  ;;  %v1189_v49 = vshll.u32 %v5225_v15, 16  ;;  %v5377_v33 = vld [vmem:[%s6178_s1 + $0xe] sm:$0x3] }
  0x92   : > { %v1369_v50 = vsel %vm5218_vm10, %v1364_v46, %v1368_v29  ;;  %v1378_v51 = vrot.slane %v1377_v45, 4  ;;  %v1188_v52 = vrot.slane %v1186_v35, 5  ;;  %v1194_v5 = vrot.slane %v862_v63, 5  ;;  %4725 = vmatprep.subr.msk.bf16.mxu0 %vm971_vm3, %v5340_v37  ;;  %v5382_v38 = vld [vmem:[#allocation3 + $0x38] sm:$0x1] }
  0x93   : > { %v4207_v53 = vcombine.low %v1359_v36, %v1369_v50  ;;  %v1387_v54 = vor.u32 %v1386_v48, %v1382_v41  ;;  %v1191_v56 = vrot.slane %v1189_v49, 6  ;;  %v1195_v57 = vrot.slane %v858_v61, 6  ;;  %v1340_v61 = vld [vmem:[#allocation3 + $0x30] sm:$0xf]  ;;  %v5386_v49 = vld [vmem:[#allocation3 + $0x40] sm:$0xf] }
  0x94   : > { %v1383_v15 = vsel %vm5218_vm10, %v1378_v51, %v1382_v41  ;;  %v1200_v58 = vshrl.u32 %v1134_v4, 16  ;;  %v1203_v60 = vshll.u32 %v1134_v4, 16  ;;  %v1209_v62 = vshrl.u32 %v5233_v32, 16  ;;  %v1343_v41 = vld [vmem:[#allocation3 + $0x3c] sm:$0xf] }
  0x95   : > { %4549 = vmatprep.mubr.msk.bf16.mxu1 %vm958_vm7, %v4207_v53  ;;  %v1388_v2 = vrot.slane %v1387_v54, 4  ;;  %v1192_v63 = vor.u32 %v1191_v56, %v1188_v52  ;;  %v1196_v3 = vor.u32 %v1195_v57, %v1194_v5  ;;  %v1212_v6 = vshll.u32 %v5233_v32, 16  ;;  %v5398_v56 = vld [vmem:[#allocation3 + $0x44] sm:$0x1] }
  0x96   : > { %v1202_v7 = vrot.slane %v1200_v58, 5  ;;  %v1205_v8 = vrot.slane %v1203_v60, 6  ;;  %v1211_v40 = vrot.slane %v1209_v62, 5  ;;  %v1217_v9 = vrot.slane %v886_v20, 5 }
  0x97   : > { %v1393_v16 = vsel %vm5218_vm10, %v1388_v2, %v1392_v0  ;;  %v1193_v18 = vrot.slane %v1192_v63, 4  ;;  %v1198_v19 = vrot.slane %v1196_v3, 4  ;;  %v1214_v22 = vrot.slane %v1212_v6, 6  ;;  %v1544_v6 = vld [vmem:[#allocation3 + $0x18] sm:$0xe] }
  0x98   : > { %v4208_v23 = vcombine.low %v1383_v15, %v1393_v16  ;;  %v1206_v14 = vor.u32 %v1205_v8, %v1202_v7  ;;  %v1218_v25 = vrot.slane %v882_v17, 6  ;;  %v1223_v27 = vshrl.u32 %v1135_v1, 16 }
  0x99   : > { %v1197_v32 = vsel %vm5290_vm13, %v1193_v18, %v1196_v3  ;;  %v1215_v28 = vor.u32 %v1214_v22, %v1211_v40  ;;  %v1226_v29 = vshll.u32 %v1135_v1, 16  ;;  %v1395_v20 = vshrl.u32 %v1340_v61, 16  ;;  %v1545_v22 = vld [vmem:[#allocation3 + $0x24] sm:$0xe] }
  0x9a   : > { %4550 = vmatmul.mubr.msk.bf16.vlgmr.msra.gmra.mxu1 %vm958_vm7, %v4208_v23  ;;  %v1207_v26 = vsel %vm5290_vm13, %v1198_v19, %v1206_v14  ;;  %v1219_v17 = vor.u32 %v1218_v25, %v1217_v9  ;;  %v1225_v34 = vrot.slane %v1223_v27, 5  ;;  %v1398_v39 = vshll.u32 %v1340_v61, 16 }
  0x9b   : > { %4568 = vmatpush3.bf16.msra.mxu1 %v1813_v47  ;;  %v4200_v44 = vcombine.low %v1197_v32, %v1207_v26  ;;  %v1216_v46 = vrot.slane %v1215_v28, 4  ;;  %v1228_v45 = vrot.slane %v1226_v29, 6  ;;  %v1397_v35 = vrot.slane %v1395_v20, 4 }
  0x9c   : > { %v1221_v36 = vrot.slane %v1219_v17, 4  ;;  %v1400_v48 = vrot.slane %v1398_v39, 5  ;;  %v1404_v0 = vshll.u32 %v5372_v31, 16  ;;  %v1408_v4 = vshrl.u32 %v5372_v31, 16  ;;  %4726 = vmatprep.subr.msk.bf16.mxu1 %vm971_vm3, %v5377_v33 }
  0x9d   : > { %4543 = vmatprep.mubr.msk.bf16.mxu0 %vm958_vm7, %v4200_v44  ;;  %v1220_v47 = vsel %vm5290_vm13, %v1216_v46, %v1219_v17  ;;  %v1229_v50 = vor.u32 %v1228_v45, %v1225_v34  ;;  %v1414_v51 = vshll.u32 %v5382_v38, 16  ;;  %v1419_v52 = vshrl.u32 %v1343_v41, 16  ;;  %v5426_v46 = vld [vmem:[#allocation3 + $0x20] sm:$0x3] }
  0x9e   : > { %v1401_v5 = vor.u32 %v1400_v48, %v1397_v35  ;;  %v1406_v53 = vrot.slane %v1404_v0, 5  ;;  %v1410_v54 = vrot.slane %v1408_v4, 4  ;;  %v1422_v57 = vshll.u32 %v1343_v41, 16 }
  0x9f   : > { %v1230_v15 = vsel %vm5290_vm13, %v1221_v36, %v1229_v50  ;;  %v1416_v58 = vrot.slane %v1414_v51, 5  ;;  %v1421_v60 = vrot.slane %v1419_v52, 4  ;;  %v1428_v62 = vshll.u32 %v5386_v49, 16 }
  0xa0   : > { %v4201_v2 = vcombine.low %v1220_v47, %v1230_v15  ;;  %v1402_v63 = vrot.slane %v1401_v5, 4  ;;  %v1411_v3 = vor.u32 %v1410_v54, %v1406_v53  ;;  %v1424_v1 = vrot.slane %v1422_v57, 5  ;;  %v5445_v57 = vld [vmem:[#allocation3 + $0x2c] sm:$0x3] }
  0xa1   : > { %v1430_v7 = vrot.slane %v1428_v62, 5  ;;  %v1432_v8 = vshrl.u32 %v5386_v49, 16  ;;  %v1438_v40 = vshll.u32 %v5398_v56, 16  ;;  %v4215_v9 = vrot.slane %v1544_v6, 9 }
  0xa2   : > { %4544 = vmatmul.mubr.msk.bf16.gmra.mxu0 %vm958_vm7, %v4201_v2  ;;  %v1407_v61 = vsel %vm5218_vm10, %v1402_v63, %v1406_v53  ;;  %v1412_v16 = vrot.slane %v1411_v3, 4  ;;  %v1425_v18 = vor.u32 %v1424_v1, %v1421_v60  ;;  %v1562_v19 = vrot.slane %v5304_v55, 5 }
  0xa3   : > { %v1434_v23 = vrot.slane %v1432_v8, 4  ;;  %v1440_v14 = vrot.slane %v1438_v40, 5  ;;  %v1565_v25 = vrot.slane %v5311_v59, 5  ;;  %v4216_v27 = vrot.slane %v1545_v22, 9 }
  0xa4   : > { %v1417_v32 = vsel %vm5218_vm10, %v1412_v16, %v1416_v58  ;;  %v1426_v28 = vrot.slane %v1425_v18, 4  ;;  %v1563_v29 = vsel %vm5166_vm6, %v4215_v9, %v1562_v19  ;;  %v1564_v20 = vrot.slane %v1562_v19, 4  ;;  %v5452_v58 = vld [vmem:[%s6178_s1 + $0x10] sm:$0x3] }
  0xa5   : > { %v4209_v26 = vcombine.low %v1407_v61, %v1417_v32  ;;  %v1435_v17 = vor.u32 %v1434_v23, %v1430_v7  ;;  %v1569_v34 = vrot.slane %v5317_v13, 5  ;;  %v1572_v39 = vrot.slane %v5325_v24, 5  ;;  %v1547_v32 = vld [vmem:[#allocation3 + $0x3c] sm:$0xe] }
  0xa6   : > { %v1431_v41 = vsel %vm5218_vm10, %v1426_v28, %v1430_v7  ;;  %v1566_v59 = vsel %vm5166_vm6, %v1564_v20, %v1565_v25  ;;  %v2024_v44 = vsel %vm971_vm3, %v5340_v37, 0  ;;  %v1695_v45 = vshrl.u32 %v1544_v6, 16  ;;  %v1546_v25 = vld [vmem:[#allocation3 + $0x30] sm:$0xe] }
  0xa7   : > { %4553 = vmatprep.mubr.msk.bf16.mxu1 %vm958_vm7, %v4209_v26  ;;  %v1436_v35 = vrot.slane %v1435_v17, 4  ;;  %v5429_v36 = vcombine.low %v1563_v29, %v1566_v59  ;;  %v1570_v24 = vsel %vm5166_vm6, %v4216_v27, %v1569_v34  ;;  %v1571_v48 = vrot.slane %v1569_v34, 4 }
  0xa8   : > { %v1697_v47 = vrot.slane %v1695_v45, 5  ;;  %v1698_v50 = vshll.u32 %v1544_v6, 16  ;;  %v1703_v51 = vrot.slane %v1360_v12, 5  ;;  %v1704_v37 = vrot.slane %v1356_v11, 6 }
  0xa9   : > { %v1441_v52 = vsel %vm5218_vm10, %v1436_v35, %v1440_v14  ;;  %4559 = vmatprep.mubr.msk.bf16.mxu0 %vm958_vm7, %v5429_v36  ;;  %v1573_v5 = vsel %vm5166_vm6, %v1571_v48, %v1572_v39  ;;  %v1709_v53 = vshrl.u32 %v5426_v46, 16  ;;  %v1712_v54 = vshll.u32 %v5426_v46, 16  ;;  %v5480_v48 = vld [vmem:[#allocation3 + $0x38] sm:$0x3] }
  0xaa   : > { %v4210_v15 = vcombine.low %v1431_v41, %v1441_v52  ;;  %v5447_v12 = vcombine.low %v1570_v24, %v1573_v5  ;;  %v1700_v55 = vrot.slane %v1698_v50, 6  ;;  %v1705_v11 = vor.u32 %v1704_v37, %v1703_v51 }
  0xab   : > { %v1711_v60 = vrot.slane %v1709_v53, 5  ;;  %v1714_v2 = vrot.slane %v1712_v54, 6  ;;  %v1718_v63 = vshrl.u32 %v1545_v22, 16  ;;  %v1721_v3 = vshll.u32 %v1545_v22, 16 }
  0xac   : > { %4554 = vmatmul.mubr.msk.bf16.gmra.mxu1 %vm958_vm7, %v4210_v15  ;;  %4560 = vmatmul.mubr.msk.bf16.vlgmr.msra.gmra.mxu0 %vm958_vm7, %v5447_v12  ;;  %v1701_v1 = vor.u32 %v1700_v55, %v1697_v47  ;;  %v1707_v6 = vrot.slane %v1705_v11, 4  ;;  %v1726_v7 = vrot.slane %v1384_v43, 5  ;;  %v1727_v40 = vrot.slane %v1380_v30, 6  ;;  %v5495_v55 = vld [vmem:[%s6178_s1 + $0x14] sm:$0x3] }
  0xad   : > { %4578 = vmatpush3.bf16.msra.mxu0 %v2024_v44  ;;  %v1715_v9 = vor.u32 %v1714_v2, %v1711_v60  ;;  %v1720_v61 = vrot.slane %v1718_v63, 5  ;;  %v1723_v16 = vrot.slane %v1721_v3, 6  ;;  %v1732_v18 = vshrl.u32 %v5445_v57, 16 }
  0xae   : > { %v1702_v19 = vrot.slane %v1701_v1, 4  ;;  %v1728_v22 = vor.u32 %v1727_v40, %v1726_v7  ;;  %v1735_v23 = vshll.u32 %v5445_v57, 16  ;;  %v2170_v14 = vsel %vm971_vm3, %v5377_v33, 0  ;;  %4727 = vmatprep.subr.msk.bf16.mxu0 %vm971_vm3, %v5452_v58  ;;  %v1889_v40 = vld [vmem:[#allocation3 + $0x24] sm:$0xf] }
  0xaf   : > { %v1716_v13 = vsel %vm5290_vm13, %v1707_v6, %v1715_v9  ;;  %v1724_v30 = vor.u32 %v1723_v16, %v1720_v61  ;;  %v1734_v43 = vrot.slane %v1732_v18, 5  ;;  %v4217_v27 = vrot.slane %v1546_v25, 9 }
  0xb0   : > { %v1706_v28 = vsel %vm5290_vm13, %v1702_v19, %v1705_v11  ;;  %v1730_v29 = vrot.slane %v1728_v22, 4  ;;  %v1737_v20 = vrot.slane %v1735_v23, 6  ;;  %v1576_v26 = vrot.slane %v5372_v31, 5 }
  0xb1   : > { %v4229_v17 = vcombine.low %v1706_v28, %v1716_v13  ;;  %v1725_v33 = vrot.slane %v1724_v30, 4  ;;  %v1579_v34 = vrot.slane %v5382_v38, 5  ;;  %v4218_v39 = vrot.slane %v1547_v32, 9  ;;  %v5522_v13 = vld [vmem:[#allocation3 + $0x2c] sm:$0x1] }
  0xb2   : > { %v1738_v41 = vor.u32 %v1737_v20, %v1734_v43  ;;  %v1577_v59 = vsel %vm5166_vm6, %v4217_v27, %v1576_v26  ;;  %v1578_v44 = vrot.slane %v1576_v26, 4  ;;  %v1583_v45 = vrot.slane %v5386_v49, 5  ;;  %v1892_v20 = vld [vmem:[#allocation3 + $0x30] sm:$0xf] }
  0xb3   : > { %4569 = vmatprep.mubr.msk.bf16.mxu1 %vm958_vm7, %v4229_v17  ;;  %v1729_v35 = vsel %vm5290_vm13, %v1725_v33, %v1728_v22  ;;  %v1586_v24 = vrot.slane %v5398_v56, 5  ;;  %v1741_v47 = vshrl.u32 %v1546_v25, 16  ;;  %v1744_v50 = vshll.u32 %v1546_v25, 16  ;;  %v5490_v56 = vld [vmem:[#allocation3 + $0x44] sm:$0x3] }
  0xb4   : > { %v1739_v38 = vsel %vm5290_vm13, %v1730_v29, %v1738_v41  ;;  %v1580_v51 = vsel %vm5166_vm6, %v1578_v44, %v1579_v34  ;;  %v1584_v37 = vsel %vm5166_vm6, %v4218_v39, %v1583_v45  ;;  %v1585_v52 = vrot.slane %v1583_v45, 4 }
  0xb5   : > { %v4230_v5 = vcombine.low %v1729_v35, %v1739_v38  ;;  %v5488_v53 = vcombine.low %v1577_v59, %v1580_v51  ;;  %v1743_v54 = vrot.slane %v1741_v47, 5  ;;  %v1746_v15 = vrot.slane %v1744_v50, 6  ;;  %v5533_v47 = vld [vmem:[#allocation3 + $0x34] sm:$0xf] }
  0xb6   : > { %v1587_v11 = vsel %vm5166_vm6, %v1585_v52, %v1586_v24  ;;  %v1749_v60 = vrot.slane %v1408_v4, 5  ;;  %v1750_v2 = vrot.slane %v1404_v0, 6  ;;  %v1755_v63 = vshrl.u32 %v5480_v48, 16  ;;  %v5512_v0 = vld [vmem:[#allocation3 + $0x28] sm:$0xf] }
  0xb7   : > { %4570 = vmatmul.mubr.msk.bf16.vlgmr.msra.gmra.mxu1 %vm958_vm7, %v4230_v5  ;;  %4563 = vmatprep.mubr.msk.bf16.mxu0 %vm958_vm7, %v5488_v53  ;;  %v5507_v3 = vcombine.low %v1584_v37, %v1587_v11  ;;  %v1747_v1 = vor.u32 %v1746_v15, %v1743_v54  ;;  %v1758_v6 = vshll.u32 %v5480_v48, 16  ;;  %v1764_v7 = vshrl.u32 %v1547_v32, 16  ;;  %v1894_v52 = vld [vmem:[#allocation3 + $0x38] sm:$0x1]  ;;  %v5540_v54 = vld [vmem:[#allocation3 + $0x24] sm:$0xe] }
  0xb8   : > { %4588 = vmatpush3.bf16.msra.mxu1 %v2170_v14  ;;  %v1751_v9 = vor.u32 %v1750_v2, %v1749_v60  ;;  %v1757_v4 = vrot.slane %v1755_v63, 5  ;;  %v1767_v61 = vshll.u32 %v1547_v32, 16  ;;  %v1772_v31 = vrot.slane %v1432_v8, 5 }
  0xb9   : > { %4564 = vmatmul.mubr.msk.bf16.gmra.mxu0 %vm958_vm7, %v5507_v3  ;;  %v1748_v16 = vrot.slane %v1747_v1, 4  ;;  %v1760_v18 = vrot.slane %v1758_v6, 6  ;;  %v1766_v19 = vrot.slane %v1764_v7, 5  ;;  %v1773_v22 = vrot.slane %v1428_v62, 6  ;;  %4728 = vmatprep.subr.msk.bf16.mxu1 %vm971_vm3, %v5495_v55 }
  0xba   : > { %v1753_v23 = vrot.slane %v1751_v9, 4  ;;  %v1769_v14 = vrot.slane %v1767_v61, 6  ;;  %v1778_v25 = vshrl.u32 %v5490_v56, 16  ;;  %v1781_v8 = vshll.u32 %v5490_v56, 16 }
  0xbb   : > { %v1752_v30 = vsel %vm5290_vm13, %v1748_v16, %v1751_v9  ;;  %v1761_v43 = vor.u32 %v1760_v18, %v1757_v4  ;;  %v1774_v27 = vor.u32 %v1773_v22, %v1772_v31  ;;  %v1902_v32 = vshrl.u32 %v1889_v40, 16  ;;  %v5550_v31 = vld [vmem:[#allocation3 + $0x30] sm:$0xe] }
  0xbc   : > { %v1770_v28 = vor.u32 %v1769_v14, %v1766_v19  ;;  %v1780_v49 = vrot.slane %v1778_v25, 5  ;;  %v1783_v62 = vrot.slane %v1781_v8, 6  ;;  %v1905_v29 = vshll.u32 %v1889_v40, 16 }
  0xbd   : > { %v1762_v26 = vsel %vm5290_vm13, %v1753_v23, %v1761_v43  ;;  %v1776_v17 = vrot.slane %v1774_v27, 4  ;;  %v1904_v33 = vrot.slane %v1902_v32, 4  ;;  %v1911_v34 = vshll.u32 %v5512_v0, 16  ;;  %v1895_v32 = vld [vmem:[#allocation3 + $0x3c] sm:$0xf] }
  0xbe   : > { %v4231_v39 = vcombine.low %v1752_v30, %v1762_v26  ;;  %v1771_v41 = vrot.slane %v1770_v28, 4  ;;  %v1784_v59 = vor.u32 %v1783_v62, %v1780_v49  ;;  %v1907_v44 = vrot.slane %v1905_v29, 5 }
  0xbf   : > { %v1913_v45 = vrot.slane %v1911_v34, 5  ;;  %v1915_v35 = vshrl.u32 %v5512_v0, 16  ;;  %v1921_v24 = vshll.u32 %v5522_v13, 16  ;;  %v1926_v50 = vshrl.u32 %v1892_v20, 16 }
  0xc0   : > { %4573 = vmatprep.mubr.msk.bf16.mxu1 %vm958_vm7, %v4231_v39  ;;  %v1775_v38 = vsel %vm5290_vm13, %v1771_v41, %v1774_v27  ;;  %v1785_v51 = vsel %vm5290_vm13, %v1776_v17, %v1784_v59  ;;  %v1908_v37 = vor.u32 %v1907_v44, %v1904_v33  ;;  %v1929_v5 = vshll.u32 %v1892_v20, 16  ;;  %v5566_v20 = vld [vmem:[#allocation3 + $0x40] sm:$0xf]  ;;  %v5576_v44 = vld [vmem:[#allocation3 + $0x44] sm:$0x1] }
  0xc1   : > { %v4232_v15 = vcombine.low %v1775_v38, %v1785_v51  ;;  %v1917_v11 = vrot.slane %v1915_v35, 4  ;;  %v1923_v60 = vrot.slane %v1921_v24, 5  ;;  %v1928_v2 = vrot.slane %v1926_v50, 4 }
  0xc2   : > { %v1909_v63 = vrot.slane %v1908_v37, 4  ;;  %v1931_v1 = vrot.slane %v1929_v5, 5  ;;  %v1935_v6 = vshll.u32 %v5533_v47, 16  ;;  %v1939_v7 = vshrl.u32 %v5533_v47, 16  ;;  %v1898_v37 = vld [vmem:[#allocation3 + $0x48] sm:$0xf] }
  0xc3   : > { %4574 = vmatmul.mubr.msk.bf16.gmra.mxu1 %vm958_vm7, %v4232_v15  ;;  %v1918_v40 = vor.u32 %v1917_v11, %v1913_v45  ;;  %v1945_v9 = vshll.u32 %v1894_v52, 16  ;;  %v2368_v4 = vsel %vm971_vm3, %v5452_v58, 0  ;;  %v4246_v61 = vrot.slane %v5540_v54, 9 }
  0xc4   : > { %v1914_v16 = vsel %vm5218_vm10, %v1909_v63, %v1913_v45  ;;  %v1932_v18 = vor.u32 %v1931_v1, %v1928_v2  ;;  %v1937_v19 = vrot.slane %v1935_v6, 5  ;;  %v1941_v22 = vrot.slane %v1939_v7, 4  ;;  %v5587_v2 = vld [vmem:[#allocation3 + $0x3c] sm:$0xe] }
  0xc5   : > { %v1919_v23 = vrot.slane %v1918_v40, 4  ;;  %v1947_v14 = vrot.slane %v1945_v9, 5  ;;  %v2117_v25 = vrot.slane %v5512_v0, 5  ;;  %v2120_v58 = vrot.slane %v5522_v13, 5 }
  0xc6   : > { %v1933_v8 = vrot.slane %v1932_v18, 4  ;;  %v1942_v30 = vor.u32 %v1941_v22, %v1937_v19  ;;  %v4247_v43 = vrot.slane %v5550_v31, 9  ;;  %v2124_v27 = vrot.slane %v5533_v47, 5 }
  0xc7   : > { %v1924_v28 = vsel %vm5218_vm10, %v1919_v23, %v1923_v60  ;;  %v2118_v49 = vsel %vm5166_vm6, %v4246_v61, %v2117_v25  ;;  %v2119_v62 = vrot.slane %v2117_v25, 4  ;;  %v2127_v29 = vrot.slane %v1894_v52, 5  ;;  %v5582_v52 = vld [vmem:[#allocation3 + $0x4c] sm:$0xf]  ;;  %v1900_v60 = vld [vmem:[#allocation3 + $0x50] sm:$0x1] }
  0xc8   : > { %v4238_v26 = vcombine.low %v1914_v16, %v1924_v28  ;;  %v1938_v13 = vsel %vm5218_vm10, %v1933_v8, %v1937_v19  ;;  %v1943_v17 = vrot.slane %v1942_v30, 4  ;;  %v2125_v33 = vsel %vm5166_vm6, %v4247_v43, %v2124_v27  ;;  %v5596_v61 = vld [vmem:[%s6178_s1 + $0x12] sm:$0x3]  ;;  %v5605_v23 = vld [vmem:[%s6178_s1 + $0x16] sm:$0x3] }
  0xc9   : > { %v2121_v39 = vsel %vm5166_vm6, %v2119_v62, %v2120_v58  ;;  %v2126_v41 = vrot.slane %v2124_v27, 4  ;;  %v2551_v59 = vsel %vm971_vm3, %v5495_v55, 0  ;;  %v1950_v45 = vshrl.u32 %v1895_v32, 16  ;;  %v5611_v28 = vld [vmem:[#allocation3 + $0x48] sm:$0xe] }
  0xca   : > { %4579 = vmatprep.mubr.msk.bf16.mxu0 %vm958_vm7, %v4238_v26  ;;  %v1948_v24 = vsel %vm5218_vm10, %v1943_v17, %v1947_v14  ;;  %v4251_v50 = vcombine.low %v2118_v49, %v2121_v39  ;;  %v1953_v38 = vshll.u32 %v1895_v32, 16  ;;  %v1959_v51 = vshll.u32 %v5566_v20, 16 }
  0xcb   : > { %v4239_v5 = vcombine.low %v1938_v13, %v1948_v24  ;;  %v2128_v15 = vsel %vm5166_vm6, %v2126_v41, %v2127_v29  ;;  %v1952_v55 = vrot.slane %v1950_v45, 4  ;;  %v1963_v11 = vshrl.u32 %v5566_v20, 16 }
  0xcc   : > { %4589 = vmatprep.mubr.msk.bf16.mxu1 %vm958_vm7, %v4251_v50  ;;  %v4252_v63 = vcombine.low %v2125_v33, %v2128_v15  ;;  %v1955_v1 = vrot.slane %v1953_v38, 5  ;;  %v1961_v40 = vrot.slane %v1959_v51, 5  ;;  %v1969_v9 = vshll.u32 %v5576_v44, 16 }
  0xcd   : > { %4580 = vmatmul.mubr.msk.bf16.vlgmr.msra.gmra.mxu0 %vm958_vm7, %v4239_v5  ;;  %v1965_v16 = vrot.slane %v1963_v11, 4  ;;  %v1974_v18 = vshrl.u32 %v1898_v37, 16  ;;  %v1977_v19 = vshll.u32 %v1898_v37, 16  ;;  %v1983_v22 = vshll.u32 %v5582_v52, 16 }
  0xce   : > { %4598 = vmatpush3.bf16.msra.mxu0 %v2368_v4  ;;  %4590 = vmatmul.mubr.msk.bf16.vlgmr.msra.gmra.mxu1 %vm958_vm7, %v4252_v63  ;;  %v1956_v14 = vor.u32 %v1955_v1, %v1952_v55  ;;  %v1971_v25 = vrot.slane %v1969_v9, 5  ;;  %v1987_v58 = vshrl.u32 %v5582_v52, 16  ;;  %v1993_v8 = vshll.u32 %v1900_v60, 16  ;;  %v2245_v9 = vld [vmem:[#allocation3 + $0x2c] sm:$0x3] }
  0xcf   : > { %4608 = vmatpush3.bf16.msra.mxu1 %v2551_v59  ;;  %v1966_v30 = vor.u32 %v1965_v16, %v1961_v40  ;;  %v1976_v43 = vrot.slane %v1974_v18, 4  ;;  %v1979_v27 = vrot.slane %v1977_v19, 5  ;;  %v1985_v32 = vrot.slane %v1983_v22, 5  ;;  %4729 = vmatprep.subr.msk.bf16.mxu0 %vm971_vm3, %v5596_v61 }
  0xd0   : > { %v1957_v4 = vrot.slane %v1956_v14, 4  ;;  %v1989_v49 = vrot.slane %v1987_v58, 4  ;;  %v1995_v62 = vrot.slane %v1993_v8, 5  ;;  %v4248_v29 = vrot.slane %v5587_v2, 9  ;;  %4730 = vmatprep.subr.msk.bf16.mxu1 %vm971_vm3, %v5605_v23 }
  0xd1   : > { %v1967_v26 = vrot.slane %v1966_v30, 4  ;;  %v1980_v13 = vor.u32 %v1979_v27, %v1976_v43  ;;  %v2131_v17 = vrot.slane %v5566_v20, 5  ;;  %v2134_v33 = vrot.slane %v5576_v44, 5 }
  0xd2   : > { %v1962_v39 = vsel %vm5218_vm10, %v1957_v4, %v1961_v40  ;;  %v1990_v41 = vor.u32 %v1989_v49, %v1985_v32  ;;  %v4249_v59 = vrot.slane %v5611_v28, 9  ;;  %v2138_v45 = vrot.slane %v5582_v52, 5  ;;  %v2246_v49 = vld [vmem:[#allocation3 + $0x38] sm:$0x3] }
  0xd3   : > { %v1972_v24 = vsel %vm5218_vm10, %v1967_v26, %v1971_v25  ;;  %v1981_v50 = vrot.slane %v1980_v13, 4  ;;  %v2132_v38 = vsel %vm5166_vm6, %v4248_v29, %v2131_v17  ;;  %v2133_v37 = vrot.slane %v2131_v17, 4  ;;  %v5656_v17 = vld [vmem:[#allocation3 + $0x4] sm:$0xf] }
  0xd4   : > { %v4240_v5 = vcombine.low %v1962_v39, %v1972_v24  ;;  %v1991_v15 = vrot.slane %v1990_v41, 4  ;;  %v2139_v44 = vsel %vm5166_vm6, %v4249_v59, %v2138_v45  ;;  %v2140_v55 = vrot.slane %v2138_v45, 4  ;;  %v2477_v24 = vld [vmem:[#allocation3 + $0x8] sm:$0x1] }
  0xd5   : > { %v1986_v63 = vsel %vm5218_vm10, %v1981_v50, %v1985_v32  ;;  %v2135_v1 = vsel %vm5166_vm6, %v2133_v37, %v2134_v33  ;;  %v2141_v40 = vrot.slane %v1900_v60, 5  ;;  %v2250_v16 = vshrl.u32 %v5540_v54, 16  ;;  %v2476_v33 = vld [vmem:[#allocation3] sm:$0xe]  ;;  %v5658_v37 = vld [vmem:[#allocation3 + $0x10] sm:$0xf] }
  0xd6   : > { %4583 = vmatprep.mubr.msk.bf16.mxu0 %vm958_vm7, %v4240_v5  ;;  %v1996_v18 = vsel %vm5218_vm10, %v1991_v15, %v1995_v62  ;;  %v4253_v19 = vcombine.low %v2132_v38, %v2135_v1  ;;  %v2253_v14 = vshll.u32 %v5540_v54, 16  ;;  %v2258_v25 = vrot.slane %v1915_v35, 5  ;;  %v2478_v5 = vld [vmem:[#allocation3 + $0xc] sm:$0xe] }
  0xd7   : > { %v4241_v8 = vcombine.low %v1986_v63, %v1996_v18  ;;  %v2142_v30 = vsel %vm5166_vm6, %v2140_v55, %v2141_v40  ;;  %v2252_v43 = vrot.slane %v2250_v16, 5  ;;  %v2259_v60 = vrot.slane %v1911_v34, 6  ;;  %v2479_v55 = vld [vmem:[#allocation3 + $0x14] sm:$0x1] }
  0xd8   : > { %4593 = vmatprep.mubr.msk.bf16.mxu1 %vm958_vm7, %v4253_v19  ;;  %v4254_v27 = vcombine.low %v2139_v44, %v2142_v30  ;;  %v2255_v32 = vrot.slane %v2253_v14, 6  ;;  %v2264_v10 = vshrl.u32 %v2245_v9, 16  ;;  %v2267_v4 = vshll.u32 %v2245_v9, 16 }
  0xd9   : > { %4584 = vmatmul.mubr.msk.bf16.gmra.mxu0 %vm958_vm7, %v4241_v8  ;;  %v2260_v54 = vor.u32 %v2259_v60, %v2258_v25  ;;  %v2273_v35 = vshrl.u32 %v5550_v31, 16  ;;  %v2276_v62 = vshll.u32 %v5550_v31, 16  ;;  %v2281_v29 = vrot.slane %v1939_v7, 5 }
  0xda   : > { %4594 = vmatmul.mubr.msk.bf16.gmra.mxu1 %vm958_vm7, %v4254_v27  ;;  %v2256_v0 = vor.u32 %v2255_v32, %v2252_v43  ;;  %v2266_v34 = vrot.slane %v2264_v10, 5  ;;  %v2269_v26 = vrot.slane %v2267_v4, 6  ;;  %v2282_v13 = vrot.slane %v1935_v6, 6 }
  0xdb   : > { %v2262_v39 = vrot.slane %v2260_v54, 4  ;;  %v2275_v41 = vrot.slane %v2273_v35, 5  ;;  %v2278_v59 = vrot.slane %v2276_v62, 6  ;;  %v2287_v45 = vshrl.u32 %v2246_v49, 16 }
  0xdc   : > { %v2257_v31 = vrot.slane %v2256_v0, 4  ;;  %v2270_v50 = vor.u32 %v2269_v26, %v2266_v34  ;;  %v2283_v38 = vor.u32 %v2282_v13, %v2281_v29  ;;  %v2290_v7 = vshll.u32 %v2246_v49, 16 }
  0xdd   : > { %v2279_v15 = vor.u32 %v2278_v59, %v2275_v41  ;;  %v2289_v44 = vrot.slane %v2287_v45, 5  ;;  %v2647_v47 = vsel %vm971_vm3, %v5596_v61, 0  ;;  %v4270_v6 = vrot.slane %v2476_v33, 9  ;;  %v5692_v41 = vld [vmem:[%s6178_s1 + $0x18] sm:$0x3] }
  0xde   : > { %v2261_v63 = vsel %vm5290_vm13, %v2257_v31, %v2260_v54  ;;  %v2271_v1 = vsel %vm5290_vm13, %v2262_v39, %v2270_v50  ;;  %v2285_v40 = vrot.slane %v2283_v38, 4  ;;  %v2292_v9 = vrot.slane %v2290_v7, 6  ;;  %v2247_v54 = vld [vmem:[#allocation3 + $0x44] sm:$0x3]  ;;  %v2248_v39 = vld [vmem:[#allocation3 + $0x50] sm:$0x3] }
  0xdf   : > { %v4260_v16 = vcombine.low %v2261_v63, %v2271_v1  ;;  %v2280_v18 = vrot.slane %v2279_v15, 4  ;;  %v2498_v19 = vrot.slane %v5656_v17, 5  ;;  %v2501_v14 = vrot.slane %v2477_v24, 5  ;;  %v5695_v24 = vld [vmem:[#allocation3 + $0x1c] sm:$0xf] }
  0xe0   : > { %v2293_v25 = vor.u32 %v2292_v9, %v2289_v44  ;;  %v4271_v8 = vrot.slane %v2478_v5, 9  ;;  %v2505_v30 = vrot.slane %v5658_v37, 5  ;;  %v2508_v61 = vrot.slane %v2479_v55, 5 }
  0xe1   : > { %4599 = vmatprep.mubr.msk.bf16.mxu0 %vm958_vm7, %v4260_v16  ;;  %v2284_v43 = vsel %vm5290_vm13, %v2280_v18, %v2283_v38  ;;  %v2499_v60 = vsel %vm5166_vm6, %v4270_v6, %v2498_v19  ;;  %v2500_v27 = vrot.slane %v2498_v19, 4  ;;  %v2788_v32 = vsel %vm971_vm3, %v5605_v23, 0  ;;  %v5705_v38 = vld [vmem:[%s6178_s1 + $0x1a] sm:$0x3]  ;;  %v2481_v16 = vld [vmem:[#allocation3 + $0x20] sm:$0x1] }
  0xe2   : > { %v2294_v10 = vsel %vm5290_vm13, %v2285_v40, %v2293_v25  ;;  %v2506_v4 = vsel %vm5166_vm6, %v4271_v8, %v2505_v30  ;;  %v2507_v49 = vrot.slane %v2505_v30, 4  ;;  %v2296_v35 = vshrl.u32 %v5587_v2, 16  ;;  %v5712_v18 = vld [vmem:[#allocation3 + $0x28] sm:$0xf]  ;;  %v2482_v25 = vld [vmem:[#allocation3 + $0x24] sm:$0xe] }
  0xe3   : > { %v4261_v62 = vcombine.low %v2284_v43, %v2294_v10  ;;  %v2502_v29 = vsel %vm5166_vm6, %v2500_v27, %v2501_v14  ;;  %v2299_v0 = vshll.u32 %v5587_v2, 16  ;;  %v2304_v34 = vrot.slane %v1963_v11, 5  ;;  %v2466_v27 = vld [vmem:[#allocation3] sm:$0xf] }
  0xe4   : > { %v4275_v23 = vcombine.low %v2499_v60, %v2502_v29  ;;  %v2509_v26 = vsel %vm5166_vm6, %v2507_v49, %v2508_v61  ;;  %v2298_v13 = vrot.slane %v2296_v35, 5  ;;  %v2305_v33 = vrot.slane %v1959_v51, 6  ;;  %v2483_v60 = vld [vmem:[#allocation3 + $0x2c] sm:$0x1] }
  0xe5   : > { %4600 = vmatmul.mubr.msk.bf16.vlgmr.msra.gmra.mxu0 %vm958_vm7, %v4261_v62  ;;  %v4276_v2 = vcombine.low %v2506_v4, %v2509_v26  ;;  %v2301_v59 = vrot.slane %v2299_v0, 6  ;;  %v2310_v45 = vshrl.u32 %v2247_v54, 16  ;;  %v2313_v11 = vshll.u32 %v2247_v54, 16  ;;  %v2714_v26 = vld [vmem:[#allocation3] sm:$0xc] }
  0xe6   : > { %4618 = vmatpush3.bf16.msra.mxu0 %v2647_v47  ;;  %4609 = vmatprep.mubr.msk.bf16.mxu1 %vm958_vm7, %v4275_v23  ;;  %v2306_v31 = vor.u32 %v2305_v33, %v2304_v34  ;;  %v2319_v20 = vshrl.u32 %v5611_v28, 16  ;;  %v2322_v51 = vshll.u32 %v5611_v28, 16  ;;  %v2327_v50 = vrot.slane %v1987_v58, 5  ;;  %v2480_v47 = vld [vmem:[#allocation3 + $0x18] sm:$0xe] }
  0xe7   : > { %4610 = vmatmul.mubr.msk.bf16.vlgmr.msra.gmra.mxu1 %vm958_vm7, %v4276_v2  ;;  %v2302_v7 = vor.u32 %v2301_v59, %v2298_v13  ;;  %v2312_v5 = vrot.slane %v2310_v45, 5  ;;  %v2315_v15 = vrot.slane %v2313_v11, 6  ;;  %v2328_v44 = vrot.slane %v1983_v22, 6  ;;  %4731 = vmatprep.subr.msk.bf16.mxu0 %vm971_vm3, %v5692_v41  ;;  %v2715_v13 = vld [vmem:[#allocation3 + $0x8] sm:$0x3] }
  0xe8   : > { %4628 = vmatpush3.bf16.msra.mxu1 %v2788_v32  ;;  %v2308_v28 = vrot.slane %v2306_v31, 4  ;;  %v2321_v58 = vrot.slane %v2319_v20, 5  ;;  %v2324_v6 = vrot.slane %v2322_v51, 6  ;;  %v2333_v55 = vshrl.u32 %v2248_v39, 16  ;;  %v2716_v45 = vld [vmem:[#allocation3 + $0xc] sm:$0xc] }
  0xe9   : > { %v2303_v63 = vrot.slane %v2302_v7, 4  ;;  %v2316_v1 = vor.u32 %v2315_v15, %v2312_v5  ;;  %v2329_v40 = vor.u32 %v2328_v44, %v2327_v50  ;;  %v2336_v9 = vshll.u32 %v2248_v39, 16  ;;  %4732 = vmatprep.subr.msk.bf16.mxu1 %vm971_vm3, %v5705_v38  ;;  %v2717_v11 = vld [vmem:[#allocation3 + $0x14] sm:$0x3]  ;;  %v2718_v15 = vld [vmem:[#allocation3 + $0x18] sm:$0xc] }
  0xea   : > { %v2325_v52 = vor.u32 %v2324_v6, %v2321_v58  ;;  %v2335_v22 = vrot.slane %v2333_v55, 5  ;;  %v4272_v19 = vrot.slane %v2480_v47, 9  ;;  %v2512_v14 = vrot.slane %v5695_v24, 5  ;;  %v2719_v6 = vld [vmem:[#allocation3 + $0x20] sm:$0x3] }
  0xeb   : > { %v2307_v8 = vsel %vm5290_vm13, %v2303_v63, %v2306_v31  ;;  %v2317_v30 = vsel %vm5290_vm13, %v2308_v28, %v2316_v1  ;;  %v2331_v61 = vrot.slane %v2329_v40, 4  ;;  %v2338_v43 = vrot.slane %v2336_v9, 6  ;;  %v2468_v55 = vld [vmem:[#allocation3 + $0xc] sm:$0xf] }
  0xec   : > { %v4262_v32 = vcombine.low %v2307_v8, %v2317_v30  ;;  %v2326_v10 = vrot.slane %v2325_v52, 4  ;;  %v2513_v4 = vsel %vm5166_vm6, %v4272_v19, %v2512_v14  ;;  %v2514_v49 = vrot.slane %v2512_v14, 4  ;;  %v2720_v30 = vld [vmem:[#allocation3 + $0x24] sm:$0xc] }
  0xed   : > { %v2339_v54 = vor.u32 %v2338_v43, %v2335_v22  ;;  %v2515_v35 = vrot.slane %v2481_v16, 5  ;;  %v4273_v62 = vrot.slane %v2482_v25, 9  ;;  %v2519_v29 = vrot.slane %v5712_v18, 5 }
  0xee   : > { %4603 = vmatprep.mubr.msk.bf16.mxu0 %vm958_vm7, %v4262_v32  ;;  %v2330_v0 = vsel %vm5290_vm13, %v2326_v10, %v2329_v40  ;;  %v2522_v34 = vrot.slane %v2483_v60, 5  ;;  %v4283_v23 = vcombine.low %v2466_v27, %v5656_v17  ;;  %vm2731_vm14 = vcmask 1045508   ;;  %v2470_v40 = vld [vmem:[#allocation3 + $0x18] sm:$0xf] }
  0xef   : > { %v2340_v33 = vsel %vm5290_vm13, %v2331_v61, %v2339_v54  ;;  %v2516_v39 = vsel %vm5166_vm6, %v2514_v49, %v2515_v35  ;;  %v2520_v2 = vsel %vm5166_vm6, %v4273_v62, %v2519_v29  ;;  %v2521_v59 = vrot.slane %v2519_v29, 4  ;;  %vm5737_vm15 = vmor %vm971_vm3, %vm2731_vm14  ;;  %v2721_v61 = vld [vmem:[#allocation3 + $0x2c] sm:$0x3] }
  0xf0   : > { %v4263_v31 = vcombine.low %v2330_v0, %v2340_v33  ;;  %v4277_v20 = vcombine.low %v2513_v4, %v2516_v39  ;;  %v4291_v42 = vrot.slane %v2714_v26, 10  ;;  %v2735_v7 = vrot.slane %v5656_v17, 6  ;;  %v4331_v0 = vld [vmem:[%s6178_s1 + $0x1e] sm:$0x3] }
  0xf1   : > { %v2523_v51 = vsel %vm5166_vm6, %v2521_v59, %v2522_v34  ;;  %v2738_v5 = vrot.slane %v2715_v13, 6  ;;  %v4292_v47 = vrot.slane %v2716_v45, 10  ;;  %v2742_v28 = vrot.slane %v5658_v37, 6  ;;  %v4785_v26 = vld [vmem:[#allocation3 + $0x18] sm:$0xff]   ;;  %v4786_v59 = vld [vmem:[#allocation3 + $0x24] sm:$0xff]   ;;  %v4787_v45 = vld [vmem:[#allocation3 + $0x30] sm:$0xff]  }
  0xf2   : > { %4604 = vmatmul.mubr.msk.bf16.gmra.mxu0 %vm958_vm7, %v4263_v31  ;;  %4613 = vmatprep.mubr.msk.bf16.mxu1 %vm958_vm7, %v4277_v20  ;;  %v4278_v44 = vcombine.low %v2520_v2, %v2523_v51  ;;  %v2745_v58 = vrot.slane %v2717_v11, 6  ;;  %v2736_v63 = vsel %vm5737_vm15, %v4291_v42, %v2735_v7  ;;  %v2737_v1 = vrot.slane %v2735_v7, 4  ;;  %v4793_v33 = vld [vmem:[#allocation3 + $0x1c] sm:$0xf]  ;;  %v3059_v2 = vld [vmem:[#allocation3 + $0x18] sm:$0xc] }
  0xf3   : > { %4619 = vmatprep.mubr.msk.bf16.mxu0 %vm958_vm7, %v4283_v23  ;;  %v2744_v17 = vrot.slane %v2742_v28, 4  ;;  %v4293_v9 = vrot.slane %v2718_v15, 10  ;;  %v2743_v52 = vsel %vm5737_vm15, %v4292_v47, %v2742_v28  ;;  %v2749_v22 = vrot.slane %v5695_v24, 6  ;;  %v4344_v51 = vld [vmem:[%s6178_s1 + $0x20] sm:$0x3] }
  0xf4   : > { %4614 = vmatmul.mubr.msk.bf16.gmra.mxu1 %vm958_vm7, %v4278_v44  ;;  %v2739_v16 = vsel %vm5737_vm15, %v2737_v1, %v2738_v5  ;;  %v2752_v19 = vrot.slane %v2719_v6, 6  ;;  %v4284_v14 = vcombine.low %v2468_v55, %v5658_v37  ;;  %v2756_v43 = vrot.slane %v5712_v18, 6  ;;  %v4357_v5 = vld [vmem:[%s6178_s1 + $0x22] sm:$0x3]  ;;  %v3060_v44 = vld [vmem:[#allocation3 + $0x24] sm:$0xc] }
  0xf5   : > { %v4296_v25 = vcombine.low %v2736_v63, %v2739_v16  ;;  %v2746_v8 = vsel %vm5737_vm15, %v2744_v17, %v2745_v58  ;;  %v4285_v60 = vcombine.low %v2470_v40, %v5695_v24  ;;  %v2750_v27 = vsel %vm5737_vm15, %v4293_v9, %v2749_v22  ;;  %v4322_v24 = vld [vmem:[%s6178_s1 + $0x1c] sm:$0x3]  ;;  %v4795_v47 = vld [vmem:[#allocation3 + $0x34] sm:$0xf]  ;;  %v3061_v58 = vld [vmem:[#allocation3 + $0x30] sm:$0xc] }
  0xf6   : > { %v2751_v32 = vrot.slane %v2749_v22, 4  ;;  %v2906_v10 = vsel %vm971_vm3, %v5692_v41, 0  ;;  %v4297_v37 = vcombine.low %v2743_v52, %v2746_v8  ;;  %v4294_v49 = vrot.slane %v2720_v30, 10  ;;  %v2472_v41 = vld [vmem:[#allocation3 + $0x24] sm:$0xf]  ;;  %v4788_v6 = vld [vmem:[#allocation3 + $0x3c] sm:$0xff]  }
  0xf7   : > { %4629 = vmatprep.mubr.msk.bf16.mxu1 %vm958_vm7, %v4296_v25  ;;  %v2758_v54 = vrot.slane %v2756_v43, 4  ;;  %v2759_v35 = vrot.slane %v2721_v61, 6  ;;  %v2984_v62 = vsel %vm971_vm3, %v5705_v38, 0  ;;  %v4286_v23 = vcombine.low %v2472_v41, %v5712_v18  ;;  %v4789_v16 = vld [vmem:[#allocation3 + $0x30] sm:$0xff]   ;;  %v3062_v25 = vld [vmem:[#allocation3 + $0x3c] sm:$0xc] }
  0xf8   : > { %v2753_v4 = vsel %vm5737_vm15, %v2751_v32, %v2752_v19  ;;  %v2757_v34 = vsel %vm5737_vm15, %v4294_v49, %v2756_v43  ;;  %v3073_v39 = vrot.slane %v4793_v33, 6  ;;  %v3126_v18 = vsel %vm971_vm3, %v4322_v24, 0  ;;  %v3321_v52 = vld [vmem:[#allocation3 + $0x34] sm:$0xf]  ;;  %v4796_v19 = vld [vmem:[#allocation3 + $0x40] sm:$0xf] }
  0xf9   : > { %v4298_v29 = vcombine.low %v2750_v27, %v2753_v4  ;;  %v2760_v38 = vsel %vm5737_vm15, %v2758_v54, %v2759_v35  ;;  %v4318_v11 = vrot.slane %v3059_v2, 10  ;;  %v3076_v20 = vrot.slane %v5426_v46, 6  ;;  %v3320_v30 = vld [vmem:[#allocation3 + $0x30] sm:$0xe]  ;;  %v3322_v61 = vld [vmem:[#allocation3 + $0x38] sm:$0x1] }
  0xfa   : > { %4620 = vmatmul.mubr.msk.bf16.vlgmr.msra.gmra.mxu0 %vm958_vm7, %v4284_v14  ;;  %v4299_v13 = vcombine.low %v2757_v34, %v2760_v38  ;;  %v3075_v31 = vrot.slane %v3073_v39, 4  ;;  %v3245_v42 = vsel %vm971_vm3, %v4331_v0, 0  ;;  %v3087_v28 = vrot.slane %v4795_v47, 6  ;;  %v4790_v32 = vld [vmem:[#allocation3 + $0x3c] sm:$0xff]   ;;  %v3475_v49 = vld [vmem:[#allocation3 + $0x38] sm:$0x3] }
  0xfb   : > { %4638 = vmatpush3.bf16.msra.mxu0 %v2906_v10  ;;  %4623 = vmatprep.mubr.msk.bf16.mxu0 %vm958_vm7, %v4285_v60  ;;  %v3074_v46 = vsel %vm5737_vm15, %v4318_v11, %v3073_v39  ;;  %v4319_v55 = vrot.slane %v3060_v44, 10  ;;  %v3083_v1 = vrot.slane %v5445_v57, 6  ;;  %v4320_v17 = vrot.slane %v3061_v58, 10  ;;  %v3474_v60 = vld [vmem:[#allocation3 + $0x30] sm:$0xc]  ;;  %v4791_v41 = vld [vmem:[#allocation3 + $0x48] sm:$0xff]  }
  0xfc   : > { %4630 = vmatmul.mubr.msk.bf16.vlgmr.msra.gmra.mxu1 %vm958_vm7, %v4297_v37  ;;  %4733 = vmatprep.subr.msk.bf16.mxu0 %vm971_vm3, %v4322_v24  ;;  %v3077_v15 = vsel %vm5737_vm15, %v3075_v31, %v3076_v20  ;;  %v3089_v40 = vrot.slane %v3087_v28, 4  ;;  %v3090_v9 = vrot.slane %v5480_v48, 6  ;;  %v3094_v14 = vrot.slane %v4796_v19, 6  ;;  %v3323_v33 = vld [vmem:[#allocation3 + $0x3c] sm:$0xe] }
  0xfd   : > { %4648 = vmatpush3.bf16.msra.mxu1 %v2984_v62  ;;  %4633 = vmatprep.mubr.msk.bf16.mxu1 %vm958_vm7, %v4298_v29  ;;  %v3088_v57 = vsel %vm5737_vm15, %v4320_v17, %v3087_v28  ;;  %v3346_v8 = vrot.slane %v3321_v52, 5  ;;  %v3492_v27 = vrot.slane %v3321_v52, 6  ;;  %v4321_v37 = vrot.slane %v3062_v25, 10  ;;  %v3324_v29 = vld [vmem:[#allocation3 + $0x40] sm:$0xf] }
  0xfe   : > { %4734 = vmatprep.subr.msk.bf16.mxu1 %vm971_vm3, %v4331_v0  ;;  %v3091_v48 = vsel %vm5737_vm15, %v3089_v40, %v3090_v9  ;;  %v3096_v4 = vrot.slane %v3094_v14, 4  ;;  %v3399_v54 = vsel %vm971_vm3, %v4344_v51, 0  ;;  %v4340_v35 = vrot.slane %v3320_v30, 9  ;;  %v5828_v0 = vld [vmem:[#allocation3 + $0x4c] sm:$0xf] }
  0xff   : > { %v4325_v10 = vcombine.low %v3088_v57, %v3091_v48  ;;  %v3348_v24 = vrot.slane %v3346_v8, 4  ;;  %v3349_v62 = vrot.slane %v3322_v61, 5  ;;  %v3545_v34 = vsel %vm971_vm3, %v4357_v5, 0  ;;  %v3326_v20 = vld [vmem:[#allocation3 + $0x48] sm:$0xe] }
 0x100   : > { %v4353_v38 = vrot.slane %v3474_v60, 10  ;;  %v3353_v39 = vrot.slane %v3324_v29, 5  ;;  %v3347_v2 = vsel %vm5166_vm6, %v4340_v35, %v3346_v8  ;;  %v3360_v11 = vrot.slane %v5828_v0, 5  ;;  %v3330_v17 = vld [vmem:[#allocation3 + $0x58] sm:$0xf] }
 0x101   : > { %v3499_v31 = vrot.slane %v3324_v29, 6  ;;  %v4341_v47 = vrot.slane %v3323_v33, 9  ;;  %v3367_v48 = vrot.slane %v3330_v17, 5  ;;  %v3329_v30 = vld [vmem:[#allocation3 + $0x54] sm:$0xe] }
 0x102   : > { %4624 = vmatmul.mubr.msk.bf16.gmra.mxu0 %vm958_vm7, %v4286_v23  ;;  %v3494_v23 = vrot.slane %v3492_v27, 4  ;;  %v3355_v28 = vrot.slane %v3353_v39, 4  ;;  %v3331_v61 = vld [vmem:[#allocation3 + $0x5c] sm:$0x1] }
 0x103   : > { %4639 = vmatprep.mubr.msk.bf16.mxu0 %vm958_vm7, %v4785_v26  ;;  %v3495_v26 = vrot.slane %v3475_v49, 6  ;;  %v3369_v35 = vrot.slane %v3367_v48, 4 }
 0x104   : > { %4634 = vmatmul.mubr.msk.bf16.gmra.mxu1 %vm958_vm7, %v4299_v13 }
 0x105   : > { %4649 = vmatprep.mubr.msk.bf16.mxu1 %vm958_vm7, %v5429_v36  ;;  %v4794_v36 = vld [vmem:[#allocation3 + $0x28] sm:$0xf] }
 0x106   : > { %v3080_v7 = vrot.slane %v4794_v36, 6  ;;  %v3493_v36 = vsel %vm5737_vm15, %v4353_v38, %v3492_v27  ;;  %v3513_v27 = vrot.slane %v3330_v17, 6 }
 0x108   : > { %v3082_v63 = vrot.slane %v3080_v7, 4 }
 0x10a   : > { %4640 = vmatmul.mubr.msk.bf16.vlgmr.msra.gmra.mxu0 %vm958_vm7, %v4786_v59  ;;  %v3084_v22 = vsel %vm5737_vm15, %v3082_v63, %v3083_v1  ;;  %v3350_v59 = vsel %vm5166_vm6, %v3348_v24, %v3349_v62  ;;  %v3362_v63 = vrot.slane %v3360_v11, 4  ;;  %v3370_v24 = vrot.slane %v3331_v61, 5 }
 0x10b   : > { %4658 = vmatpush3.bf16.msra.mxu0 %v3126_v18  ;;  %4643 = vmatprep.mubr.msk.bf16.mxu0 %vm958_vm7, %v4787_v45  ;;  %v3325_v45 = vld [vmem:[#allocation3 + $0x44] sm:$0x1]  ;;  %v3476_v18 = vld [vmem:[#allocation3 + $0x3c] sm:$0xc]  ;;  %v4345_v44 = vcombine.low %v3347_v2, %v3350_v59 }
 0x10c   : > { %4650 = vmatmul.mubr.msk.bf16.vlgmr.msra.gmra.mxu1 %vm958_vm7, %v5447_v12  ;;  %4735 = vmatprep.subr.msk.bf16.mxu0 %vm971_vm3, %v4344_v51  ;;  %v4323_v12 = vcombine.low %v3074_v46, %v3077_v15  ;;  %v3328_v51 = vld [vmem:[#allocation3 + $0x50] sm:$0x1]  ;;  %v3478_v46 = vld [vmem:[#allocation3 + $0x48] sm:$0xc]  ;;  %v3506_v15 = vrot.slane %v5828_v0, 6  ;;  %v3356_v58 = vrot.slane %v3325_v45, 5 }
 0x10d   : > { %4668 = vmatpush3.bf16.msra.mxu1 %v3245_v42  ;;  %4653 = vmatprep.mubr.msk.bf16.mxu1 %vm958_vm7, %v5488_v53  ;;  %v3081_v53 = vsel %vm5737_vm15, %v4319_v55, %v3080_v7  ;;  %v3496_v7 = vsel %vm5737_vm15, %v3494_v23, %v3495_v26  ;;  %v4342_v55 = vrot.slane %v3326_v20, 9  ;;  %v3363_v1 = vrot.slane %v3328_v51, 5 }
 0x10e   : > { %4736 = vmatprep.subr.msk.bf16.mxu1 %vm971_vm3, %v4357_v5  ;;  %v4324_v43 = vcombine.low %v3081_v53, %v3084_v22  ;;  %v3477_v5 = vld [vmem:[#allocation3 + $0x44] sm:$0x3]  ;;  %v4358_v40 = vcombine.low %v3493_v36, %v3496_v7  ;;  %v4354_v9 = vrot.slane %v3476_v18, 10  ;;  %v4355_v53 = vrot.slane %v3478_v46, 10 }
 0x10f   : > { %v3502_v52 = vrot.slane %v3477_v5, 6  ;;  %v3508_v22 = vrot.slane %v3506_v15, 4  ;;  %v3357_v57 = vsel %vm5166_vm6, %v3355_v28, %v3356_v58  ;;  %v3361_v25 = vsel %vm5166_vm6, %v4342_v55, %v3360_v11 }
 0x110   : > { %v3364_v8 = vsel %vm5166_vm6, %v3362_v63, %v3363_v1  ;;  %v3515_v0 = vrot.slane %v3513_v27, 4  ;;  %v3371_v23 = vsel %vm5166_vm6, %v3369_v35, %v3370_v24 }
 0x111   : > { %v4347_v49 = vcombine.low %v3361_v25, %v3364_v8 }
 0x112   : > { %4644 = vmatmul.mubr.msk.bf16.gmra.mxu0 %vm958_vm7, %v4788_v6  ;;  %v3479_v6 = vld [vmem:[#allocation3 + $0x50] sm:$0x3] }
 0x113   : > { %4659 = vmatprep.mubr.msk.bf16.mxu0 %vm958_vm7, %v4323_v12  ;;  %v4792_v12 = vld [vmem:[#allocation3 + $0x54] sm:$0xff]   ;;  %v3509_v19 = vrot.slane %v3479_v6, 6 }
 0x114   : > { %4654 = vmatmul.mubr.msk.bf16.gmra.mxu1 %vm958_vm7, %v5507_v3  ;;  %v3097_v3 = vrot.slane %v5490_v56, 6  ;;  %v3095_v56 = vsel %vm5737_vm15, %v4321_v37, %v3094_v14  ;;  %v3354_v14 = vsel %vm5166_vm6, %v4341_v47, %v3353_v39 }
 0x115   : > { %4669 = vmatprep.mubr.msk.bf16.mxu1 %vm958_vm7, %v4789_v16  ;;  %v3501_v16 = vrot.slane %v3499_v31, 4  ;;  %v3510_v37 = vsel %vm5737_vm15, %v3508_v22, %v3509_v19 }
 0x116   : > { %v3098_v13 = vsel %vm5737_vm15, %v3096_v4, %v3097_v3  ;;  %v3480_v4 = vld [vmem:[#allocation3 + $0x54] sm:$0xc]  ;;  %v3481_v3 = vld [vmem:[#allocation3 + $0x5c] sm:$0x3] }
 0x117   : > { %v4326_v42 = vcombine.low %v3095_v56, %v3098_v13  ;;  %v3503_v60 = vsel %vm5737_vm15, %v3501_v16, %v3502_v52 }
 0x11a   : > { %4660 = vmatmul.mubr.msk.bf16.vlgmr.msra.gmra.mxu0 %vm958_vm7, %v4324_v43  ;;  %v3500_v43 = vsel %vm5737_vm15, %v4354_v9, %v3499_v31 }
 0x11b   : > { %4678 = vmatpush3.bf16.msra.mxu0 %v3399_v54  ;;  %4663 = vmatprep.mubr.msk.bf16.mxu0 %vm958_vm7, %v4325_v10  ;;  %v3507_v10 = vsel %vm5737_vm15, %v4355_v53, %v3506_v15  ;;  %v4343_v54 = vrot.slane %v3329_v30, 9  ;;  %v4359_v62 = vcombine.low %v3500_v43, %v3503_v60 }
 0x11c   : > { %4670 = vmatmul.mubr.msk.bf16.vlgmr.msra.gmra.mxu1 %vm958_vm7, %v4790_v32  ;;  %v4346_v32 = vcombine.low %v3354_v14, %v3357_v57  ;;  %v4360_v29 = vcombine.low %v3507_v10, %v3510_v37 }
 0x11d   : > { %4688 = vmatpush3.bf16.msra.mxu1 %v3545_v34  ;;  %4673 = vmatprep.mubr.msk.bf16.mxu1 %vm958_vm7, %v4791_v41  ;;  %v4356_v41 = vrot.slane %v3480_v4, 10  ;;  %v3516_v34 = vrot.slane %v3481_v3, 6  ;;  %v3368_v38 = vsel %vm5166_vm6, %v4343_v54, %v3367_v48 }
 0x11e   : > { %v4348_v13 = vcombine.low %v3368_v38, %v3371_v23 }
 0x11f   : > { %v3514_v26 = vsel %vm5737_vm15, %v4356_v41, %v3513_v27  ;;  %v3517_v56 = vsel %vm5737_vm15, %v3515_v0, %v3516_v34 }
 0x120   : > { %v4361_v33 = vcombine.low %v3514_v26, %v3517_v56 }
 0x122   : > { %4664 = vmatmul.mubr.msk.bf16.gmra.mxu0 %vm958_vm7, %v4326_v42 }
 0x123   : > { %4679 = vmatprep.mubr.msk.bf16.mxu0 %vm958_vm7, %v4345_v44 }
 0x124   : > { %4674 = vmatmul.mubr.msk.bf16.gmra.mxu1 %vm958_vm7, %v4792_v12 }
 0x125   : > { %4689 = vmatprep.mubr.msk.bf16.mxu1 %vm958_vm7, %v4358_v40 }
 0x12a   : > { %4680 = vmatmul.mubr.msk.bf16.vlgmr.msra.gmra.mxu0 %vm958_vm7, %v4346_v32 }
 0x12b   : > { %4683 = vmatprep.mubr.msk.bf16.mxu0 %vm958_vm7, %v4347_v49 }
 0x12c   : > { %4690 = vmatmul.mubr.msk.bf16.vlgmr.msra.gmra.mxu1 %vm958_vm7, %v4359_v62 }
 0x12d   : > { %4693 = vmatprep.mubr.msk.bf16.mxu1 %vm958_vm7, %v4360_v29 }
 0x130   : > { %v4521_v39 = vpop.f32.mrf.mxu0 }
 0x132   : > { %4684 = vmatmul.mubr.msk.bf16.gmra.mxu0 %vm958_vm7, %v4348_v13  ;;  %v1009_v2 = vpop.f32.mrf.mxu0 }
 0x134   : > { %4694 = vmatmul.mubr.msk.bf16.gmra.mxu1 %vm958_vm7, %v4361_v33  ;;  %v4522_v21 = vpop.f32.mrf.mxu0 }
 0x136   : > { %v5883_v45 = vpop.f32.mrf.mxu0 }
 0x13e   : > { %v4531_v59 = vpop.f32.mrf.mxu1 }
 0x13f   : > { %v1110_v0 = vadd.f32 %v4531_v59, %v4521_v39 }
 0x140   : > { %v1101_v18 = vpop.f32.mrf.mxu1  ;;  %v5885_v11 = vpop.f32.mrf.mxu0 }
 0x141   : > { %v1102_v38 = vadd.f32 %v1101_v18, %v1009_v2 }
 0x142   : > { %v4532_v31 = vpop.f32.mrf.mxu1  ;;  %v5887_v20 = vpop.f32.mrf.mxu0 }
 0x143   : > { %v1113_v13 = vadd.f32 %v4532_v31, %v4522_v21 }
 0x144   : > { %v1104_v50 = vpop.f32.mrf.mxu1  ;;  %v5889_v51 = vpop.f32.mrf.mxu0 }
 0x146   : > { %v5893_v36 = vpop.f32.mrf.mxu0 }
 0x14b   : > { %v5891_v42 = vpop.f32.mrf.mxu1 }
 0x14d   : > { %v5895_v7 = vpop.f32.mrf.mxu1 }
 0x14f   : > { %v5897_v46 = vpop.f32.mrf.mxu1 }
 0x150   : > { %v4541_v5 = vpop.f32.mrf.mxu0 }
 0x151   : > { %v5899_v44 = vpop.f32.mrf.mxu1  ;;  %v1327_v23 = vadd.f32 %v4541_v5, %v1110_v0 }
 0x152   : > { %v1294_v15 = vpop.f32.mrf.mxu0 }
 0x153   : > { %v1325_v33 = vadd.f32 %v1294_v15, %v1102_v38 }
 0x154   : > { %v4542_v47 = vpop.f32.mrf.mxu0 }
 0x156   : > { %v1297_v58 = vpop.f32.mrf.mxu0 }
 0x15a   : > { %v4551_v28 = vpop.f32.mrf.mxu1 }
 0x15c   : > { %v1505_v6 = vpop.f32.mrf.mxu1 }
 0x15e   : > { %v4552_v55 = vpop.f32.mrf.mxu1 }
 0x160   : > { %v1508_v17 = vpop.f32.mrf.mxu1 }
 0x162   : > { %v5901_v12 = vpop.f32.mrf.mxu0 }
 0x164   : > { %v5903_v63 = vpop.f32.mrf.mxu0 }
 0x166   : > { %v5905_v1 = vpop.f32.mrf.mxu0 }
 0x168   : > { %v5907_v40 = vpop.f32.mrf.mxu0 }
 0x16c   : > { %v5909_v9 = vpop.f32.mrf.mxu1  ;;  %v4561_v16 = vpop.f32.mrf.mxu0 }
 0x16e   : > { %v5911_v52 = vpop.f32.mrf.mxu1  ;;  %v1651_v22 = vpop.f32.mrf.mxu0 }
 0x170   : > { %v5913_v53 = vpop.f32.mrf.mxu1  ;;  %v4562_v14 = vpop.f32.mrf.mxu0 }
 0x172   : > { %v5915_v19 = vpop.f32.mrf.mxu1  ;;  %v1654_v48 = vpop.f32.mrf.mxu0 }
 0x173   : > { %6219 = vst [vmem:[#allocation9_spill] sm:$0xff] %v5915_v19  ;;  %v1536_v19 = vadd.f32 %v1505_v6, %v1325_v33 }
 0x175   : > { %v1682_v5 = vadd.f32 %v1651_v22, %v1536_v19  ;;  %v1118_v19 = vadd.f32 %v5895_v7, %v5887_v20 }
 0x177   : > { %v4571_v57 = vpop.f32.mrf.mxu1 }
 0x179   : > { %v1849_v25 = vpop.f32.mrf.mxu1  ;;  %v5917_v30 = vpop.f32.mrf.mxu0 }
 0x17a   : > { %v1880_v15 = vadd.f32 %v1849_v25, %v1682_v5  ;;  %v6230_v33 = vld [vmem:[#allocation9_spill] sm:$0xff] }
 0x17b   : > { %v4572_v8 = vpop.f32.mrf.mxu1  ;;  %v5919_v43 = vpop.f32.mrf.mxu0 }
 0x17d   : > { %v1852_v61 = vpop.f32.mrf.mxu1  ;;  %v5923_v27 = vpop.f32.mrf.mxu0 }
 0x17e   : > { %6220 = vst [vmem:[#allocation10_spill] sm:$0xff] %v5923_v27  ;;  %v1328_v27 = vadd.f32 %v4542_v47, %v1113_v13  ;;  %v1126_v47 = vadd.f32 %v5891_v42, %v5885_v11 }
 0x17f   : > { %v5929_v37 = vpop.f32.mrf.mxu0 }
 0x180   : > { %6223 = vst [vmem:[#allocation13_spill] sm:$0xff] %v5929_v37  ;;  %v1539_v18 = vadd.f32 %v4552_v55, %v1328_v27  ;;  %v1129_v27 = vadd.f32 %v5897_v46, %v5889_v51 }
 0x182   : > { %v1685_v31 = vadd.f32 %v4562_v14, %v1539_v18  ;;  %v1331_v14 = vadd.f32 %v5901_v12, %v1126_v47 }
 0x183   : > { %v5921_v60 = vpop.f32.mrf.mxu1 }
 0x185   : > { %v5925_v32 = vpop.f32.mrf.mxu1 }
 0x186   : > { %6221 = vst [vmem:[#allocation11_spill] sm:$0xff] %v5925_v32  ;;  %v1105_v32 = vadd.f32 %v1104_v50, %v5883_v45 }
 0x187   : > { %v5927_v10 = vpop.f32.mrf.mxu1 }
 0x188   : > { %6222 = vst [vmem:[#allocation12_spill] sm:$0xff] %v5927_v10  ;;  %v1326_v2 = vadd.f32 %v1297_v58, %v1105_v32  ;;  %v5955_v58 = vld [vmem:[%s6179_s2] ss:$0 sm:$0xff]  ;;  %v1542_v32 = vadd.f32 %v5909_v9, %v1331_v14 }
 0x189   : > { %v5931_v4 = vpop.f32.mrf.mxu1 }
 0x18a   : > { %6224 = vst [vmem:[#allocation14_spill] sm:$0xff] %v5931_v4  ;;  %v1538_v4 = vadd.f32 %v4551_v28, %v1327_v23  ;;  %v1537_v21 = vadd.f32 %v1508_v17, %v1326_v2  ;;  %v1688_v46 = vadd.f32 %v5917_v30, %v1542_v32  ;;  %v6231_v2 = vld [vmem:[#allocation10_spill] sm:$0xff] }
 0x18c   : > { %v1684_v39 = vadd.f32 %v4561_v16, %v1538_v4  ;;  %v1683_v23 = vadd.f32 %v1654_v48, %v1537_v21  ;;  %v6234_v21 = vld [vmem:[#allocation13_spill] sm:$0xff] }
 0x18d   : > { %v4581_v3 = vpop.f32.mrf.mxu0  ;;  %v6232_v18 = vld [vmem:[#allocation11_spill] sm:$0xff] }
 0x18e   : > { %v4591_v49 = vpop.f32.mrf.mxu1  ;;  %v1882_v0 = vadd.f32 %v4571_v57, %v1684_v39  ;;  %v1881_v55 = vadd.f32 %v1852_v61, %v1683_v23  ;;  %v1329_v61 = vadd.f32 %v5903_v63, %v1118_v19 }
 0x18f   : > { %v2060_v54 = vpop.f32.mrf.mxu0 }
 0x190   : > { %v2206_v35 = vpop.f32.mrf.mxu1  ;;  %v2093_v28 = vadd.f32 %v4581_v3, %v1882_v0  ;;  %v2091_v45 = vadd.f32 %v2060_v54, %v1880_v15  ;;  %v1332_v54 = vadd.f32 %v5905_v1, %v1129_v27  ;;  %v1540_v51 = vadd.f32 %v5911_v52, %v1329_v61  ;;  %v6235_v15 = vld [vmem:[#allocation12_spill] sm:$0xff] }
 0x191   : > { %v4582_v24 = vpop.f32.mrf.mxu0  ;;  %v1886_v52 = vadd.f32 %v5921_v60, %v1688_v46 }
 0x192   : > { %v4592_v62 = vpop.f32.mrf.mxu1  ;;  %v2239_v50 = vadd.f32 %v4591_v49, %v2093_v28  ;;  %v2237_v16 = vadd.f32 %v2206_v35, %v2091_v45  ;;  %v1121_v49 = vadd.f32 %v5899_v44, %v5893_v36  ;;  %v1543_v44 = vadd.f32 %v5913_v53, %v1332_v54 }
 0x193   : > { %v2063_v29 = vpop.f32.mrf.mxu0  ;;  %v1686_v1 = vadd.f32 %v5919_v43, %v1540_v51 }
 0x194   : > { %v2209_v41 = vpop.f32.mrf.mxu1  ;;  %v2092_v25 = vadd.f32 %v2063_v29, %v1881_v55  ;;  %v1330_v36 = vadd.f32 %v5907_v40, %v1121_v49  ;;  %v1689_v40 = vadd.f32 %v6231_v2, %v1543_v44 }
 0x195   : > { %v1884_v53 = vadd.f32 %v6232_v18, %v1686_v1 }
 0x196   : > { %v2238_v20 = vadd.f32 %v2209_v41, %v2092_v25  ;;  %v1541_v39 = vadd.f32 %v6230_v33, %v1330_v36  ;;  %v1887_v28 = vadd.f32 %v6235_v15, %v1689_v40 }
 0x199   : > { %v5933_v34 = vpop.f32.mrf.mxu0 }
 0x19a   : > { %v5935_v26 = vpop.f32.mrf.mxu1  ;;  %v2097_v43 = vadd.f32 %v5933_v34, %v1886_v52 }
 0x19b   : > { %6225 = vst [vmem:[#allocation15_spill] sm:$0xff] %v5935_v26  ;;  %v5937_v56 = vpop.f32.mrf.mxu0 }
 0x19c   : > { %v5939_v10 = vpop.f32.mrf.mxu1  ;;  %v2095_v23 = vadd.f32 %v5937_v56, %v1884_v53 }
 0x19d   : > { %6226 = vst [vmem:[#allocation16_spill] sm:$0xff] %v5939_v10  ;;  %v5941_v37 = vpop.f32.mrf.mxu0  ;;  %v1883_v10 = vadd.f32 %v4572_v8, %v1685_v31  ;;  %v1687_v31 = vadd.f32 %v6234_v21, %v1541_v39 }
 0x19e   : > { %v5944_v59 = vpop.f32.mrf.mxu1 }
 0x19f   : > { %v5946_v26 = vpop.f32.mrf.mxu0  ;;  %v2094_v17 = vadd.f32 %v4582_v24, %v1883_v10 }
 0x1a0   : > { %v5948_v38 = vpop.f32.mrf.mxu1 }
 0x1a1   : > { %v2240_v11 = vadd.f32 %v4592_v62, %v2094_v17  ;;  %v2098_v17 = vadd.f32 %v5941_v37, %v1887_v28 }
 0x1a2   : > { %v6236_v45 = vld [vmem:[#allocation15_spill] sm:$0xff] }
 0x1a3   : > { %v2244_v25 = vadd.f32 %v5944_v59, %v2098_v17 }
 0x1a5   : > { %v4601_v6 = vpop.f32.mrf.mxu0 }
 0x1a6   : > { %v2437_v22 = vadd.f32 %v4601_v6, %v2239_v50  ;;  %v2243_v50 = vadd.f32 %v6236_v45, %v2097_v43  ;;  %v6237_v6 = vld [vmem:[#allocation14_spill] sm:$0xff] }
 0x1a7   : > { %v2404_v57 = vpop.f32.mrf.mxu0  ;;  %v5960_v48 = vpop.f32.mrf.mxu1  ;;  %v1885_v55 = vadd.f32 %v6237_v6, %v1687_v31 }
 0x1a8   : > { %v2452_v42 = vadd.f32 %v5955_v58, %v2437_v22  ;;  %v2435_v8 = vadd.f32 %v2404_v57, %v2237_v16  ;;  %v6238_v16 = vld [vmem:[#allocation16_spill] sm:$0xff] }
 0x1a9   : > { %v4602_v10 = vpop.f32.mrf.mxu0  ;;  %v5967_v4 = vpop.f32.mrf.mxu1  ;;  %v2241_v22 = vadd.f32 %v6238_v16, %v2095_v23  ;;  %v2096_v56 = vadd.f32 %v5946_v26, %v1885_v55 }
 0x1aa   : > { %v5969_v7 = vmax.f32 %v2452_v42, 0.0  ;;  %v2450_v12 = vadd.f32 %v5955_v58, %v2435_v8  ;;  %v2438_v3 = vadd.f32 %v4602_v10, %v2240_v11 }
 0x1ab   : > { %v2407_v63 = vpop.f32.mrf.mxu0  ;;  %v5982_v29 = vpop.f32.mrf.mxu1  ;;  %v2242_v37 = vadd.f32 %v5948_v38, %v2096_v56 }
 0x1ac   : > { %6227 = vst [vmem:[#allocation17_spill] sm:$0xff] %v5969_v7  ;;  %v4405_v9 = vpack.c.bf16 %v5969_v7, %v5969_v7  ;;  %v5979_v35 = vmax.f32 %v2450_v12, 0.0  ;;  %v2453_v24 = vadd.f32 %v5955_v58, %v2438_v3  ;;  %v2436_v62 = vadd.f32 %v2407_v63, %v2238_v20 }
 0x1ad   : > { %v6005_v0 = vpop.f32.mrf.mxu1 }
 0x1ae   : > { %6228 = vst [vmem:[#allocation18_spill] sm:$0xff] %v5979_v35  ;;  %3678 = vst.msk [vmem:[%s4988_s15 + $0x8] sm:$0xf] %vm422_vm0, %v4405_v9  ;;  %v4403_v30 = vpack.c.bf16 %v5979_v35, %v5979_v35  ;;  %v5992_v41 = vmax.f32 %v2453_v24, 0.0  ;;  %v2451_v13 = vadd.f32 %v5955_v58, %v2436_v62 }
 0x1b0   : > { %6229 = vst [vmem:[#allocation19_spill] sm:$0xff] %v5992_v41  ;;  %3676 = vst.msk [vmem:[%s4988_s15] sm:$0xf] %vm422_vm0, %v4403_v30  ;;  %v4406_v60 = vpack.c.bf16 %v5992_v41, %v5992_v41  ;;  %v6003_v5 = vmax.f32 %v2451_v13, 0.0 }
 0x1b2   : > { %6233 = vst [vmem:[#allocation9_spill] sm:$0xff] %v6003_v5  ;;  %3679 = vst.msk [vmem:[%s4988_s15 + $0xc] sm:$0xf] %vm422_vm0, %v4406_v60  ;;  %v4404_v34 = vpack.c.bf16 %v6003_v5, %v6003_v5  ;;  %v4605_v47 = vpop.f32.mrf.mxu0 }
 0x1b3   : > { %v2441_v19 = vadd.f32 %v4605_v47, %v2243_v50 }
 0x1b4   : > { %3677 = vst.msk [vmem:[%s4988_s15 + $0x4] sm:$0xf] %vm422_vm0, %v4404_v34  ;;  %v2420_v14 = vpop.f32.mrf.mxu0  ;;  %v6020_v57 = vpop.f32.mrf.mxu1 }
 0x1b5   : > { %v2456_v11 = vadd.f32 %v5955_v58, %v2441_v19  ;;  %v2439_v42 = vadd.f32 %v2420_v14, %v2241_v22 }
 0x1b6   : > { %v4606_v8 = vpop.f32.mrf.mxu0  ;;  %v6025_v27 = vpop.f32.mrf.mxu1 }
 0x1b7   : > { %v6028_v61 = vmax.f32 %v2456_v11, 0.0  ;;  %v2454_v32 = vadd.f32 %v5955_v58, %v2439_v42  ;;  %v2442_v10 = vadd.f32 %v4606_v8, %v2244_v25 }
 0x1b8   : > { %v2423_v20 = vpop.f32.mrf.mxu0  ;;  %v6031_v12 = vpop.f32.mrf.mxu1 }
 0x1b9   : > { %6239 = vst [vmem:[#allocation10_spill] sm:$0xff] %v6028_v61  ;;  %v4409_v26 = vpack.c.bf16 %v6028_v61, %v6028_v61  ;;  %v6035_v59 = vmax.f32 %v2454_v32, 0.0  ;;  %v2457_v3 = vadd.f32 %v5955_v58, %v2442_v10  ;;  %v2440_v49 = vadd.f32 %v2423_v20, %v2242_v37 }
 0x1ba   : > { %v4621_v54 = vpop.f32.mrf.mxu0  ;;  %v6038_v38 = vpop.f32.mrf.mxu1 }
 0x1bb   : > { %6240 = vst [vmem:[#allocation11_spill] sm:$0xff] %v6035_v59  ;;  %3682 = vst.msk [vmem:[%s4988_s15 + $0x18] sm:$0xf] %vm422_vm0, %v4409_v26  ;;  %v4407_v51 = vpack.c.bf16 %v6035_v59, %v6035_v59  ;;  %v6044_v46 = vmax.f32 %v2457_v3, 0.0  ;;  %v2455_v63 = vadd.f32 %v5955_v58, %v2440_v49  ;;  %v2692_v37 = vadd.f32 %v4621_v54, %v5960_v48 }
 0x1bc   : > { %v2683_v9 = vpop.f32.mrf.mxu0  ;;  %v4631_v24 = vpop.f32.mrf.mxu1 }
 0x1bd   : > { %6241 = vst [vmem:[#allocation13_spill] sm:$0xff] %v6044_v46  ;;  %3680 = vst.msk [vmem:[%s4988_s15 + $0x10] sm:$0xf] %vm422_vm0, %v4407_v51  ;;  %v4410_v62 = vpack.c.bf16 %v6044_v46, %v6044_v46  ;;  %v6051_v36 = vmax.f32 %v2455_v63, 0.0  ;;  %v2684_v20 = vadd.f32 %v2683_v9, %v5967_v4  ;;  %v2857_v26 = vadd.f32 %v4631_v24, %v2692_v37 }
 0x1be   : > { %v4622_v44 = vpop.f32.mrf.mxu0  ;;  %v2824_v1 = vpop.f32.mrf.mxu1 }
 0x1bf   : > { %6242 = vst [vmem:[#allocation12_spill] sm:$0xff] %v6051_v36  ;;  %3683 = vst.msk [vmem:[%s4988_s15 + $0x1c] sm:$0xf] %vm422_vm0, %v4410_v62  ;;  %v4408_v52 = vpack.c.bf16 %v6051_v36, %v6051_v36  ;;  %v2695_v51 = vadd.f32 %v4622_v44, %v5982_v29  ;;  %v2855_v63 = vadd.f32 %v2824_v1, %v2684_v20 }
 0x1c0   : > { %v2686_v30 = vpop.f32.mrf.mxu0  ;;  %v4632_v13 = vpop.f32.mrf.mxu1 }
 0x1c1   : > { %3681 = vst.msk [vmem:[%s4988_s15 + $0x14] sm:$0xf] %vm422_vm0, %v4408_v52  ;;  %v2858_v36 = vadd.f32 %v4632_v13, %v2695_v51  ;;  %v2687_v41 = vadd.f32 %v2686_v30, %v6005_v0 }
 0x1c2   : > { %v4625_v58 = vpop.f32.mrf.mxu0  ;;  %v2827_v33 = vpop.f32.mrf.mxu1 }
 0x1c3   : > { %v2708_v4 = vadd.f32 %v4625_v58, %v6020_v57  ;;  %v2856_v9 = vadd.f32 %v2827_v33, %v2687_v41 }
 0x1c4   : > { %v2699_v39 = vpop.f32.mrf.mxu0  ;;  %v4635_v2 = vpop.f32.mrf.mxu1 }
 0x1c5   : > { %v2700_v29 = vadd.f32 %v2699_v39, %v6025_v27 }
 0x1c6   : > { %v4626_v40 = vpop.f32.mrf.mxu0  ;;  %v2840_v18 = vpop.f32.mrf.mxu1 }
 0x1c7   : > { %v2711_v13 = vadd.f32 %v4626_v40, %v6031_v12  ;;  %v2859_v20 = vadd.f32 %v2840_v18, %v2700_v29 }
 0x1c8   : > { %v2702_v53 = vpop.f32.mrf.mxu0  ;;  %v4636_v43 = vpop.f32.mrf.mxu1 }
 0x1c9   : > { %v2703_v57 = vadd.f32 %v2702_v53, %v6038_v38  ;;  %v2862_v41 = vadd.f32 %v4636_v43, %v2711_v13 }
 0x1ca   : > { %v4641_v60 = vpop.f32.mrf.mxu0  ;;  %v6059_v21 = vpop.f32.mrf.mxu1 }
 0x1cb   : > { %v2975_v62 = vadd.f32 %v4641_v60, %v2857_v26  ;;  %v2860_v40 = vadd.f32 %v6059_v21, %v2703_v57 }
 0x1cc   : > { %v2942_v31 = vpop.f32.mrf.mxu0  ;;  %v4651_v15 = vpop.f32.mrf.mxu1 }
 0x1cd   : > { %v2973_v61 = vadd.f32 %v2942_v31, %v2855_v63  ;;  %v3053_v59 = vadd.f32 %v4651_v15, %v2975_v62  ;;  %v2861_v31 = vadd.f32 %v4635_v2, %v2708_v4 }
 0x1ce   : > { %v4642_v28 = vpop.f32.mrf.mxu0  ;;  %v3020_v23 = vpop.f32.mrf.mxu1 }
 0x1cf   : > { %v2976_v54 = vadd.f32 %v4642_v28, %v2858_v36  ;;  %v3051_v7 = vadd.f32 %v3020_v23, %v2973_v61 }
 0x1d0   : > { %v2945_v45 = vpop.f32.mrf.mxu0  ;;  %v4652_v50 = vpop.f32.mrf.mxu1 }
 0x1d1   : > { %v3054_v44 = vadd.f32 %v4652_v50, %v2976_v54  ;;  %v2974_v15 = vadd.f32 %v2945_v45, %v2856_v9 }
 0x1d2   : > { %v4645_v34 = vpop.f32.mrf.mxu0  ;;  %v3023_v47 = vpop.f32.mrf.mxu1 }
 0x1d3   : > { %v2979_v58 = vadd.f32 %v4645_v34, %v2861_v31  ;;  %v3052_v33 = vadd.f32 %v3023_v47, %v2974_v15 }
 0x1d4   : > { %v2958_v6 = vpop.f32.mrf.mxu0  ;;  %v4655_v55 = vpop.f32.mrf.mxu1 }
 0x1d5   : > { %v3057_v23 = vadd.f32 %v4655_v55, %v2979_v58 }
 0x1d6   : > { %v4646_v17 = vpop.f32.mrf.mxu0  ;;  %v6061_v16 = vpop.f32.mrf.mxu1 }
 0x1d7   : > { %v2980_v18 = vadd.f32 %v4646_v17, %v2862_v41 }
 0x1d8   : > { %v6063_v22 = vpop.f32.mrf.mxu0  ;;  %v6065_v19 = vpop.f32.mrf.mxu1 }
 0x1da   : > { %v4661_v14 = vpop.f32.mrf.mxu0  ;;  %v6067_v56 = vpop.f32.mrf.mxu1 }
 0x1db   : > { %v3195_v35 = vadd.f32 %v4661_v14, %v3053_v59  ;;  %v2978_v14 = vadd.f32 %v6063_v22, %v2860_v40 }
 0x1dc   : > { %v3162_v25 = vpop.f32.mrf.mxu0  ;;  %v4671_v11 = vpop.f32.mrf.mxu1 }
 0x1dd   : > { %v3193_v1 = vadd.f32 %v3162_v25, %v3051_v7  ;;  %v3314_v60 = vadd.f32 %v4671_v11, %v3195_v35  ;;  %v6080_v7 = vld [vmem:[%s6179_s2 + $0x1] ss:$0 sm:$0xff]  ;;  %v2977_v35 = vadd.f32 %v2958_v6, %v2859_v20  ;;  %v3058_v6 = vadd.f32 %v6065_v19, %v2980_v18  ;;  %v6243_v20 = vld [vmem:[#allocation18_spill] sm:$0xff] }
 0x1de   : > { %v4662_v42 = vpop.f32.mrf.mxu0  ;;  %v3281_v8 = vpop.f32.mrf.mxu1 }
 0x1df   : > { %v3196_v36 = vadd.f32 %v4662_v42, %v3054_v44  ;;  %v3312_v61 = vadd.f32 %v3281_v8, %v3193_v1  ;;  %v3055_v43 = vadd.f32 %v6061_v16, %v2977_v35  ;;  %v6245_v35 = vld [vmem:[#allocation9_spill] sm:$0xff] }
 0x1e0   : > { %v3165_v32 = vpop.f32.mrf.mxu0  ;;  %v4672_v10 = vpop.f32.mrf.mxu1 }
 0x1e1   : > { %v3315_v12 = vadd.f32 %v4672_v10, %v3196_v36  ;;  %v3194_v45 = vadd.f32 %v3165_v32, %v3052_v33  ;;  %v3056_v10 = vadd.f32 %v6067_v56, %v2978_v14 }
 0x1e2   : > { %v4665_v3 = vpop.f32.mrf.mxu0  ;;  %v3284_v49 = vpop.f32.mrf.mxu1 }
 0x1e3   : > { %v3199_v25 = vadd.f32 %v4665_v3, %v3057_v23  ;;  %v3313_v11 = vadd.f32 %v3284_v49, %v3194_v45 }
 0x1e4   : > { %v3178_v52 = vpop.f32.mrf.mxu0  ;;  %v4675_v46 = vpop.f32.mrf.mxu1 }
 0x1e5   : > { %v3197_v21 = vadd.f32 %v3178_v52, %v3055_v43  ;;  %v3318_v16 = vadd.f32 %v4675_v46, %v3199_v25  ;;  %v6247_v25 = vld [vmem:[#allocation11_spill] sm:$0xff] }
 0x1e6   : > { %v4666_v5 = vpop.f32.mrf.mxu0  ;;  %v3297_v48 = vpop.f32.mrf.mxu1 }
 0x1e7   : > { %v3200_v62 = vadd.f32 %v4666_v5, %v3058_v6  ;;  %v3316_v22 = vadd.f32 %v3297_v48, %v3197_v21 }
 0x1e8   : > { %v3181_v24 = vpop.f32.mrf.mxu0  ;;  %v4676_v37 = vpop.f32.mrf.mxu1 }
 0x1e9   : > { %v3198_v29 = vadd.f32 %v3181_v24, %v3056_v10  ;;  %v3319_v44 = vadd.f32 %v4676_v37, %v3200_v62  ;;  %v6248_v10 = vld [vmem:[#allocation10_spill] sm:$0xff] }
 0x1ea   : > { %v4681_v0 = vpop.f32.mrf.mxu0  ;;  %v3300_v30 = vpop.f32.mrf.mxu1 }
 0x1eb   : > { %v3468_v59 = vadd.f32 %v4681_v0, %v3314_v60  ;;  %v3317_v31 = vadd.f32 %v3300_v30, %v3198_v29 }
 0x1ec   : > { %v3435_v28 = vpop.f32.mrf.mxu0  ;;  %v4691_v27 = vpop.f32.mrf.mxu1 }
 0x1ed   : > { %v3466_v39 = vadd.f32 %v3435_v28, %v3312_v61  ;;  %v3614_v2 = vadd.f32 %v4691_v27, %v3468_v59  ;;  %v6244_v28 = vld [vmem:[#allocation17_spill] sm:$0xff] }
 0x1ee   : > { %v4682_v38 = vpop.f32.mrf.mxu0  ;;  %v3581_v53 = vpop.f32.mrf.mxu1 }
 0x1ef   : > { %v3469_v50 = vadd.f32 %v4682_v38, %v3315_v12  ;;  %v3630_v34 = vadd.f32 %v6080_v7, %v3614_v2  ;;  %v3612_v47 = vadd.f32 %v3581_v53, %v3466_v39  ;;  %v6246_v38 = vld [vmem:[#allocation19_spill] sm:$0xff] }
 0x1f0   : > { %v3438_v42 = vpop.f32.mrf.mxu0  ;;  %v4692_v8 = vpop.f32.mrf.mxu1 }
 0x1f1   : > { %v3638_v17 = vmax.f32 %v3630_v34, 0.0  ;;  %v3628_v55 = vadd.f32 %v6080_v7, %v3612_v47  ;;  %v3615_v32 = vadd.f32 %v4692_v8, %v3469_v50  ;;  %v3467_v26 = vadd.f32 %v3438_v42, %v3313_v11 }
 0x1f2   : > { %v4685_v51 = vpop.f32.mrf.mxu0  ;;  %v3584_v63 = vpop.f32.mrf.mxu1 }
 0x1f3   : > { %v4413_v54 = vpack.c.bf16 %v3638_v17, %v3638_v17  ;;  %v3636_v19 = vmax.f32 %v3628_v55, 0.0  ;;  %v3472_v3 = vadd.f32 %v4685_v51, %v3318_v16  ;;  %v3631_v49 = vadd.f32 %v6080_v7, %v3615_v32 }
 0x1f4   : > { %v3451_v52 = vpop.f32.mrf.mxu0  ;;  %v3613_v4 = vadd.f32 %v3584_v63, %v3467_v26  ;;  %v4695_v9 = vpop.f32.mrf.mxu1  ;;  %v3726_v27 = vadd.f32 %v3638_v17, %v6244_v28  ;;  %v6249_v63 = vld [vmem:[#allocation12_spill] sm:$0xff] }
 0x1f5   : > { %3718 = vst.msk [vmem:[%s4993_s24 + $0x8] sm:$0xf] %vm422_vm0, %v4413_v54  ;;  %v4411_v56 = vpack.c.bf16 %v3636_v19, %v3636_v19  ;;  %v3470_v46 = vadd.f32 %v3451_v52, %v3316_v22  ;;  %v3639_v1 = vmax.f32 %v3631_v49, 0.0  ;;  %v3618_v48 = vadd.f32 %v4695_v9, %v3472_v3  ;;  %v6250_v54 = vld [vmem:[#allocation13_spill] sm:$0xff] }
 0x1f6   : > { %v3629_v60 = vadd.f32 %v6080_v7, %v3613_v4  ;;  %v4686_v5 = vpop.f32.mrf.mxu0  ;;  %v3597_v13 = vpop.f32.mrf.mxu1  ;;  %v3724_v36 = vadd.f32 %v3636_v19, %v6243_v20  ;;  %v3735_v6 = vsel %vm958_vm7, %v3726_v27, 0.0 }
 0x1f7   : > { %3716 = vst.msk [vmem:[%s4993_s24] sm:$0xf] %vm422_vm0, %v4411_v56  ;;  %v3473_v15 = vadd.f32 %v4686_v5, %v3319_v44  ;;  %v3616_v0 = vadd.f32 %v3597_v13, %v3470_v46  ;;  %v4414_v24 = vpack.c.bf16 %v3639_v1, %v3639_v1  ;;  %v3634_v61 = vadd.f32 %v6080_v7, %v3618_v48 }
 0x1f8   : > { %v3637_v37 = vmax.f32 %v3629_v60, 0.0  ;;  %v3454_v59 = vpop.f32.mrf.mxu0  ;;  %v4696_v57 = vpop.f32.mrf.mxu1  ;;  %v3732_v45 = vsel %vm958_vm7, %v3724_v36, 0.0  ;;  %v3727_v53 = vadd.f32 %v3639_v1, %v6246_v38 }
 0x1f9   : > { %v3471_v41 = vadd.f32 %v3454_v59, %v3317_v31  ;;  %v3632_v58 = vadd.f32 %v6080_v7, %v3616_v0  ;;  %v3619_v33 = vadd.f32 %v4696_v57, %v3473_v15  ;;  %3719 = vst.msk [vmem:[%s4993_s24 + $0xc] sm:$0xf] %vm422_vm0, %v4414_v24  ;;  %v3642_v39 = vmax.f32 %v3634_v61, 0.0 }
 0x1fa   : > { %v4412_v30 = vpack.c.bf16 %v3637_v37, %v3637_v37  ;;  %v3725_v12 = vadd.f32 %v3637_v37, %v6245_v35  ;;  %v3600_v2 = vpop.f32.mrf.mxu1  ;;  %v3737_v17 = vsel %vm958_vm7, %v3727_v53, 0.0 }
 0x1fb   : > { %v3640_v40 = vmax.f32 %v3632_v58, 0.0  ;;  %v3635_v18 = vadd.f32 %v6080_v7, %v3619_v33  ;;  %v3617_v23 = vadd.f32 %v3600_v2, %v3471_v41  ;;  %v4417_v50 = vpack.c.bf16 %v3642_v39, %v3642_v39 }
 0x1fc   : > { %3717 = vst.msk [vmem:[%s4993_s24 + $0x4] sm:$0xf] %vm422_vm0, %v4412_v30  ;;  %v3733_v43 = vsel %vm958_vm7, %v3725_v12, 0.0  ;;  %v3730_v16 = vadd.f32 %v3642_v39, %v6248_v10 }
 0x1fd   : > { %v3734_v34 = vadd.f32 %v3733_v43, %v3732_v45  ;;  %v4415_v47 = vpack.c.bf16 %v3640_v40, %v3640_v40  ;;  %v3643_v14 = vmax.f32 %v3635_v18, 0.0  ;;  %3722 = vst.msk [vmem:[%s4993_s24 + $0x18] sm:$0xf] %vm422_vm0, %v4417_v50  ;;  %v3728_v11 = vadd.f32 %v3640_v40, %v6247_v25 }
 0x1fe   : > { %v3633_v42 = vadd.f32 %v6080_v7, %v3617_v23  ;;  %v3743_v49 = vsel %vm958_vm7, %v3730_v16, 0.0 }
 0x1ff   : > { %v3736_v8 = vadd.f32 %v3735_v6, %v3734_v34  ;;  %3720 = vst.msk [vmem:[%s4993_s24 + $0x10] sm:$0xf] %vm422_vm0, %v4415_v47  ;;  %v4418_v21 = vpack.c.bf16 %v3643_v14, %v3643_v14  ;;  %v3739_v26 = vsel %vm958_vm7, %v3728_v11, 0.0  ;;  %v3731_v7 = vadd.f32 %v3643_v14, %v6250_v54 }
 0x200   : > { %v3641_v55 = vmax.f32 %v3633_v42, 0.0 }
 0x201   : > { %v3738_v32 = vadd.f32 %v3737_v17, %v3736_v8  ;;  %3723 = vst.msk [vmem:[%s4993_s24 + $0x1c] sm:$0xf] %vm422_vm0, %v4418_v21  ;;  %v3745_v4 = vsel %vm958_vm7, %v3731_v7, 0.0 }
 0x202   : > { %v4416_v51 = vpack.c.bf16 %v3641_v55, %v3641_v55  ;;  %v3729_v62 = vadd.f32 %v3641_v55, %v6249_v63 }
 0x203   : > { %v3740_v22 = vadd.f32 %v3739_v26, %v3738_v32 }
 0x204   : > { %3721 = vst.msk [vmem:[%s4993_s24 + $0x14] sm:$0xf] %vm422_vm0, %v4416_v51  ;;  %v3741_v19 = vsel %vm958_vm7, %v3729_v62, 0.0 }
 0x205   : > { %v3742_v3 = vadd.f32 %v3741_v19, %v3740_v22 }
 0x207   : > { %v3744_v52 = vadd.f32 %v3743_v49, %v3742_v3 }
 0x209   : > { %v3746_v9 = vadd.f32 %v3745_v4, %v3744_v52 }
 0x20b   : > { %v3747_v29 = vrot.slane %v3746_v9, 4 }
 0x20d   : > { %v3748_v44 = vadd.f32 %v3747_v29, %v3746_v9 }
 0x20f   : > { %v3749_v56 = vrot.slane %v3748_v44, 2 }
 0x211   : > { %v3750_v46 = vadd.f32 %v3749_v56, %v3748_v44  ;;  %3755 = sbr.rel (%p4158_p7) target bundleno = 536 (0x218), region = 68 }
 0x213   : > { %v3751_v1 = vrot.slane %v3750_v46, 1 }
 0x215   : > { %v3752_v60 = vadd.f32 %v3751_v1, %v3750_v46 }
 0x216   : > { %vm3756_vm2 = vcmask 24576   ;;  %v4848_v5 = vmov 0.0  }
 0x217   : > { %3757 = vst.msk [vmem:[#allocation2] sm:$0x1] %vm3756_vm2, %v4848_v5 }
 0x218 PF: > { %vm3760_vm0 = vcmask 24576   ;;  %s6251_s15 = sld [smem:[#allocation20_spill]] (!%p4159_p8) }
 0x21d   : > { %3764 = sbr.rel (%p4159_p8) target bundleno = 996 (0x3e4), region = 72 }
 0x21e   : > { %v3758_v48 = vld [vmem:[#allocation2] sm:$0x1] }
 0x21f   : > { %v3759_v13 = vadd.f32 %v3758_v48, %v3752_v60 }
 0x221   : > { %3761 = vst.msk [vmem:[#allocation2] sm:$0x1] %vm3760_vm0, %v3759_v13 }
 0x222   : > { %v3768_v31 = vld [vmem:[%s6180_s3] sm:$0x3]  ;;  %v4849_v0 = vmov 0.0   ;;  %vm4850_vm4 = vmmov 0   ;;  %v4797_v24 = vld [vmem:[%s6182_s5 + $0x18] sm:$0xff]   ;;  %v4798_v61 = vld [vmem:[%s6182_s5 + $0x8] sm:$0xff]  }
 0x223   : > { %4697 = vmatprep.subr.bf16.mxu0 %v4849_v0  ;;  %v3774_v20 = vsel %vm971_vm3, %v3768_v31, 0  ;;  %4699 = vmatprep.mubr.msk.bf16.mxu0 %vm4850_vm4, %v4849_v0  ;;  %v4799_v59 = vld [vmem:[%s6182_s5 + $0x10] sm:$0xff]   ;;  %v4800_v57 = vld [vmem:[%s6182_s5] sm:$0xff]   ;;  %vm3835_vm3 = vcmask 261120   ;;  %vm3952_vm5 = vcmask 1040384  }
 0x224   : > { %4698 = vmatpush3.bf16.msra.mxu0 %v3774_v20  ;;  %4703 = vmatprep.subr.bf16.mxu1 %v4849_v0  ;;  %v3769_v41 = vld [vmem:[%s6181_s4] sm:$0x1]  ;;  %v4394_v2 = vld [vmem:[%s6183_s6 + $0x1] sm:$0x1] }
 0x225   : > { %4711 = vmatprep.subr.bf16.mxu0 %v4849_v0  ;;  %4707 = vmatprep.mubr.msk.bf16.mxu1 %vm4850_vm4, %v4849_v0  ;;  %v3822_v39 = vld [vmem:[%s6183_s6] sm:$0x1] }
 0x226   : > { %4704 = vmatpush3.bf16.msra.mxu1 %v4798_v61  ;;  %v4398_v26 = vld [vmem:[%s6251_s15] ss:$0 sm:$0xff] }
 0x227   : > { %4705 = vmatprep.subr.bf16.mxu1 %v4849_v0 }
 0x228   : > { %v3765_v15 = vld [vmem:[#allocation2] sm:$0x1] }
 0x229   : > { %v3766_v36 = vmul.f32 0.00390625, %v3765_v15 }
 0x22a   : > { %4706 = vmatpush3.bf16.msra.mxu1 %v4800_v57 }
 0x22b   : > { %v3767_v37 = vpack.c.bf16 %v3766_v36, %v3766_v36 }
 0x22d   : > { %4700 = vmatmul.mubr.msk.bf16.vlgmr.msra.gmra.mxu0 %vm958_vm7, %v3767_v37 }
 0x22e   : > { %4712 = vmatpush3.bf16.msra.mxu0 %v4797_v24  ;;  %4715 = vmatprep.mubr.msk.bf16.mxu0 %vm4850_vm4, %v4849_v0 }
 0x22f   : > { %4713 = vmatprep.subr.bf16.mxu0 %v4849_v0 }
 0x232   : > { %4714 = vmatpush3.bf16.msra.mxu0 %v4799_v59 }
 0x2ed   : > { %v3810_v58 = vpop.f32.mrf.mxu0 }
 0x2ee   : > { %v3811_v33 = vadd.f32 %v3810_v58, %v3769_v41 }
 0x2ef   : > { %v4701_v28 = vpop.f32.mrf.mxu0 }
 0x2f0   : > { %v3816_v27 = vmax.f32 %v3811_v33, 0.0 }
 0x2f1   : > { %v3813_v30 = vpop.f32.mrf.mxu0 }
 0x2f2   : > { %v3817_v35 = vpack.c.bf16 %v3816_v27, %v3816_v27 }
 0x2f3   : > { %v4702_v12 = vpop.f32.mrf.mxu0 }
 0x2f4   : > { %4708 = vmatmul.mubr.msk.bf16.vlgmr.msra.gmra.mxu1 %vm3835_vm3, %v3817_v35  ;;  %4716 = vmatmul.mubr.msk.bf16.vlgmr.msra.gmra.mxu0 %vm3835_vm3, %v3817_v35 }
 0x3b4   : > { %v3873_v40 = vpop.f32.mrf.mxu1  ;;  %v3932_v18 = vpop.f32.mrf.mxu0 }
 0x3b5   : > { %v3874_v23 = vadd.f32 %v3873_v40, %v3822_v39  ;;  %v3933_v45 = vadd.f32 %v4394_v2, %v3932_v18 }
 0x3b6   : > { %v4709_v38 = vpop.f32.mrf.mxu1  ;;  %v4717_v53 = vpop.f32.mrf.mxu0 }
 0x3b7   : > { %v3938_v43 = vmax.f32 %v3874_v23, %v3933_v45 }
 0x3b8   : > { %v3876_v50 = vpop.f32.mrf.mxu1  ;;  %v3935_v34 = vpop.f32.mrf.mxu0 }
 0x3b9   : > { %v3939_v47 = vsub.f32 %v3874_v23, %v3938_v43  ;;  %v3942_v14 = vsub.f32 %v3933_v45, %v3938_v43 }
 0x3ba   : > { %v4710_v6 = vpop.f32.mrf.mxu1  ;;  %v4718_v25 = vpop.f32.mrf.mxu0 }
 0x3bb   : > { %v3940_v11 = vmul.f32 1.442695, %v3939_v47  ;;  %v3943_v42 = vmul.f32 1.442695, %v3942_v14 }
 0x3bd   : > { %4801 = vpow2.f32 %v3940_v11 }
 0x3be   : > { %4803 = vpow2.f32 %v3943_v42 }
 0x3ca   : > { %v4802_v8 = vpop.eup %4801 }
 0x3cb   : > { %v4804_v21 = vpop.eup %4803 }
 0x3cc   : > { %v3945_v17 = vadd.f32 %v4804_v21, %v4802_v8 }
 0x3ce   : > { %4805 = vrcp.f32 %v3945_v17 }
 0x3db   : > { %v4806_v55 = vpop.eup %4805 }
 0x3dc   : > { %v3948_v32 = vmul.f32 %v4806_v55, %v4804_v21  ;;  %v3947_v10 = vmul.f32 %v4806_v55, %v4802_v8 }
 0x3de   : > { %v3950_v16 = vrot.slane %v3948_v32, 7 }
 0x3e0   : > { %v3953_v51 = vsel %vm3952_vm5, %v3947_v10, %v3950_v16 }
 0x3e1   : > { %v3961_v63 = vmul.f32 %v4398_v26, %v3953_v51 }
 0x3e3   : > { %3962 = vst.msk [vmem:[%s4983_s19] sm:$0x3] %vm425_vm1, %v3961_v63 }
 0x3e4 PF: > { %s6252_s22 = sld [smem:[#allocation6_spill]] }
 0x3e5   : > { %s6253_s13 = sld [smem:[#allocation4_spill]] }
 0x3e6   : > { %s6254_s14 = sld [smem:[#allocation5_spill]] }
 0x3e7   : > { %s6255_s15 = sld [smem:[#allocation7_spill]] }
 0x3e8   : > { %s6256_s16 = sld [smem:[#allocation8_spill]] }
 0x3ea   : > { %s21_s17 = sadd.s32 1, %s6252_s22  }
 0x3eb   : > { %p18_p12 = scmp.ge.s32.totalorder %s21_s17, 10  }
 0x3ed   :  { %20 = sbr.rel (!%p18_p12) target bundleno = 3 (0x3), region = 153 }

</bundles_post_ra>
